<compile_context>
chip_gen: v5e
topology: v5e:2x2
jax: 0.10.0
libtpu: 0.0.40
codegen_flags: <defaults>
</compile_context>

<pallas_src>
import functools

import jax
import jax.numpy as jnp
from jax import lax
from jax.experimental import pallas as pl
from jax.experimental.pallas import tpu as pltpu

_LANE = 128


# ---------------------------------------------------------------------------
# Small helpers (tiling / padding / VMEM limit)
# ---------------------------------------------------------------------------
def _round_up(x, m):
    return ((x + m - 1) // m) * m


def _pad_lane(c):
    return _round_up(max(c, 1), _LANE)


_VMEM_LIMIT_CACHE = [None]


def _vmem_limit_bytes():
    """~3/4 of physical VMEM, capped at 96 MiB (v5e/v6e ~96 MiB, v7x ~48 MiB)."""
    if _VMEM_LIMIT_CACHE[0] is None:
        try:
            cap = int(pltpu.get_tpu_info().vmem_capacity_bytes)
        except Exception:  # conservative fallback if the query is unavailable
            cap = 64 * 1024 * 1024
        _VMEM_LIMIT_CACHE[0] = int(min(96 * 1024 * 1024, (cap * 3) // 4))
    return _VMEM_LIMIT_CACHE[0]


def _row_budget_bytes():
    """Per-step activation budget, derived from the VMEM limit (gen-aware)."""
    return max(4 * 1024 * 1024, min(24 * 1024 * 1024, _vmem_limit_bytes() // 4))


def _choose_row_tile(m, row_bytes, row_tile=None):
    """Pick a row tile TM (multiple of 8) that fits the budget; prefer >=2 steps."""
    cap = row_tile if row_tile is not None else 2048
    tm = min(m, cap, max(8, _row_budget_bytes() // max(row_bytes, 1)))
    if m > 8:
        # Guarantee at least two grid steps so megacore / v7x's 2 TensorCores
        # both get work and DMA pipelines against compute.
        tm = min(tm, _round_up(-(-m // 2), 8))
    tm = max(8, (tm // 8) * 8)
    m_pad = _round_up(m, tm)
    return tm, m_pad


# ---------------------------------------------------------------------------
# Pallas kernels
# ---------------------------------------------------------------------------
def _dist_kernel(a_ref, o_ref):
    """Squared pairwise distances for a tile of batch elements."""
    a = a_ref[...].astype(jnp.float32)                       # (BT, P, C)
    m = lax.dot_general(a, a, (((2,), (2,)), ((0,), (0,))),
                        preferred_element_type=jnp.float32)  # (BT, P, P)
    sq = a * a
    r_rows = jnp.sum(sq, axis=2, keepdims=True)              # (BT, P, 1)
    r_cols = jnp.sum(sq, axis=2)[:, None, :]                 # (BT, 1, P)
    o_ref[...] = r_rows - 2.0 * m + r_cols


def pairwise_dist(a):
    """batch_distance_matrix_general(A, A); a: (N, P, C)."""
    n, p, c = a.shape
    budget = _row_budget_bytes()
    bt = 1
    for cand in (8, 4, 2):
        if n % cand == 0 and n // cand >= 2 and cand * p * (p + c) * 4 * 3 <= budget:
            bt = cand
            break
    return pl.pallas_call(
        _dist_kernel,
        out_shape=jax.ShapeDtypeStruct((n, p, p), jnp.float32),
        grid=(n // bt,),
        in_specs=[pl.BlockSpec((bt, p, c), lambda b: (b, 0, 0))],
        out_specs=pl.BlockSpec((bt, p, p), lambda b: (b, 0, 0)),
        compiler_params=pltpu.CompilerParams(
            dimension_semantics=("parallel",),
            vmem_limit_bytes=_vmem_limit_bytes()),
    )(a)


def _edge_conv_kernel(*refs, k, n_mid):
    """Fused EdgeConv for one batch element: in-kernel KNN gather (one-hot MXU
    matmul), split first conv, batched mid convs, K-mean, shortcut, mask."""
    feat_ref, idx_ref, mask_ref = refs[0], refs[1], refs[2]
    wc_ref, wd_ref, s0_ref, b0_ref = refs[3:7]
    pos = 7
    mids = []
    for _ in range(n_mid):
        mids.append(tuple(refs[pos:pos + 3]))
        pos += 3
    wsc_ref, ssc_ref, bsc_ref = refs[pos:pos + 3]
    o_ref = refs[pos + 3]

    feats = feat_ref[0]                              # (P, Cin) bf16
    feats_f32 = feats.astype(jnp.float32)
    idx = idx_ref[0]                                 # (P, K) int32
    msk = mask_ref[0]                                # (P, 1) f32
    p = feats.shape[0]

    # shortcut: conv + folded BN + ReLU, added after the K-mean (as in the
    # reference module, which applies no activation after the residual add).
    sc = jnp.dot(feats, wsc_ref[...], preferred_element_type=jnp.float32)
    sc = jnp.maximum(sc * ssc_ref[...] + bsc_ref[...], 0.0)

    # centre half of the first 1x1 conv -- shared by all K neighbours.
    w_c, w_d = wc_ref[...], wd_ref[...]
    s0, b0 = s0_ref[...], b0_ref[...]
    cpart = jnp.dot(feats, w_c, preferred_element_type=jnp.float32)

    col = lax.broadcasted_iota(jnp.int32, (p, p), 1)
    a_parts = []
    for kk in range(k):                              # K is small and static
        sel = idx[:, kk:kk + 1]                                        # (P, 1)
        onehot = jnp.where(col == sel, 1.0, 0.0).astype(jnp.bfloat16)  # (P, P)
        # exact gather of the neighbour features via a one-hot MXU matmul
        nbr = jnp.dot(onehot, feats, preferred_element_type=jnp.float32)
        diff = (nbr - feats_f32).astype(jnp.bfloat16)
        a0 = jnp.dot(diff, w_d, preferred_element_type=jnp.float32)
        a_parts.append(jnp.maximum((a0 + cpart) * s0 + b0, 0.0))

    if n_mid == 0:
        pooled = a_parts[0]
        for kk in range(1, k):
            pooled = pooled + a_parts[kk]
    else:
        # one long-M operand (K*P, C0) so every mid conv is a single MXU call
        a = jnp.concatenate(a_parts, axis=0)
        for w_ref, s_ref, b_ref in mids:
            a = jnp.dot(a.astype(jnp.bfloat16), w_ref[...],
                        preferred_element_type=jnp.float32)
            a = jnp.maximum(a * s_ref[...] + b_ref[...], 0.0)
        pooled = a[0:p]
        for kk in range(1, k):
            pooled = pooled + a[kk * p:(kk + 1) * p]

    out = pooled * (1.0 / k) + sc
    o_ref[0] = (out * msk).astype(o_ref.dtype)


def fused_edge_conv(blk, feats, idx, mask):
    """feats: (N,P,Cin_pad) bf16; idx: (N,P,K) int32; mask: (N,P,1) f32.
    Returns (N, P, Cout_pad) bf16 (mask already applied)."""
    n, p, c_in = feats.shape
    k = idx.shape[2]
    conv0 = blk["convs"][0]
    mids = blk["convs"][1:]
    sc = blk["sc"]
    c0p = conv0["w_c"].shape[1]
    c_out_p = sc["w"].shape[1]

    args = [feats, idx, mask,
            conv0["w_c"], conv0["w_d"], conv0["scale"], conv0["bias"]]
    specs = [pl.BlockSpec((1, p, c_in), lambda b: (b, 0, 0)),
             pl.BlockSpec((1, p, k), lambda b: (b, 0, 0)),
             pl.BlockSpec((1, p, 1), lambda b: (b, 0, 0)),
             pl.BlockSpec((c_in, c0p), lambda b: (0, 0)),
             pl.BlockSpec((c_in, c0p), lambda b: (0, 0)),
             pl.BlockSpec((1, c0p), lambda b: (0, 0)),
             pl.BlockSpec((1, c0p), lambda b: (0, 0))]
    for layer in mids:
        ci, co = layer["w"].shape
        args += [layer["w"], layer["scale"], layer["bias"]]
        specs += [pl.BlockSpec((ci, co), lambda b: (0, 0)),
                  pl.BlockSpec((1, co), lambda b: (0, 0)),
                  pl.BlockSpec((1, co), lambda b: (0, 0))]
    args += [sc["w"], sc["scale"], sc["bias"]]
    specs += [pl.BlockSpec((c_in, c_out_p), lambda b: (0, 0)),
              pl.BlockSpec((1, c_out_p), lambda b: (0, 0)),
              pl.BlockSpec((1, c_out_p), lambda b: (0, 0))]

    flops = 2 * n * p * (c_in * (c0p + c_out_p) + k * (p * c_in + c_in * c0p))
    w_bytes = 2 * (conv0["w_c"].size + conv0["w_d"].size + sc["w"].size)
    for layer in mids:
        ci, co = layer["w"].shape
        flops += 2 * n * p * k * ci * co
        w_bytes += 2 * layer["w"].size
    bytes_accessed = int(n * p * (c_in * 2 + k * 4 + 4 + c_out_p * 2) + w_bytes)

    return pl.pallas_call(
        functools.partial(_edge_conv_kernel, k=k, n_mid=len(mids)),
        out_shape=jax.ShapeDtypeStruct((n, p, c_out_p), jnp.bfloat16),
        grid=(n,),
        in_specs=specs,
        out_specs=pl.BlockSpec((1, p, c_out_p), lambda b: (b, 0, 0)),
        compiler_params=pltpu.CompilerParams(
            dimension_semantics=("parallel",),
            vmem_limit_bytes=_vmem_limit_bytes()),
        cost_estimate=pl.CostEstimate(flops=int(flops), transcendentals=0,
                                      bytes_accessed=bytes_accessed),
    )(*args)


def _mm_affine_kernel(x_ref, w_ref, s_ref, b_ref, m_ref, o_ref, *, do_relu):
    y = jnp.dot(x_ref[...], w_ref[...], preferred_element_type=jnp.float32)
    y = y * s_ref[...] + b_ref[...]
    if do_relu:
        y = jnp.maximum(y, 0.0)
    o_ref[...] = (y * m_ref[...]).astype(o_ref.dtype)


def mm_affine(x, w, scale, bias, mask_rows, *, relu=True,
              out_dtype=jnp.float32, row_tile=None):
    """Row-tiled fused matmul + per-channel affine (+ReLU) + mask epilogue."""
    m, kd = x.shape
    n_out = w.shape[1]
    out_isz = jnp.dtype(out_dtype).itemsize
    row_bytes = 2 * (kd * x.dtype.itemsize + n_out * out_isz + 4)
    tm, m_pad = _choose_row_tile(m, row_bytes, row_tile)
    if m_pad != m:
        x = jnp.pad(x, ((0, m_pad - m), (0, 0)))
        mask_rows = jnp.pad(mask_rows, ((0, m_pad - m), (0, 0)))
    cost = pl.CostEstimate(
        flops=int(2 * m_pad * kd * n_out), transcendentals=0,
        bytes_accessed=int(m_pad * kd * x.dtype.itemsize
                           + kd * n_out * w.dtype.itemsize
                           + m_pad * n_out * out_isz + m_pad * 4))
    out = pl.pallas_call(
        functools.partial(_mm_affine_kernel, do_relu=relu),
        out_shape=jax.ShapeDtypeStruct((m_pad, n_out), out_dtype),
        grid=(m_pad // tm,),
        in_specs=[pl.BlockSpec((tm, kd), lambda i: (i, 0)),
                  pl.BlockSpec((kd, n_out), lambda i: (0, 0)),
                  pl.BlockSpec((1, n_out), lambda i: (0, 0)),
                  pl.BlockSpec((1, n_out), lambda i: (0, 0)),
                  pl.BlockSpec((tm, 1), lambda i: (i, 0))],
        out_specs=pl.BlockSpec((tm, n_out), lambda i: (i, 0)),
        compiler_params=pltpu.CompilerParams(
            dimension_semantics=("parallel",),
            vmem_limit_bytes=_vmem_limit_bytes()),
        cost_estimate=cost,
    )(x, w, scale, bias, mask_rows)
    return out[:m] if m_pad != m else out


def _fc_head_kernel(*refs, n_fc):
    x = refs[0][...].astype(jnp.float32)
    pos = 1
    for _ in range(n_fc):
        w_ref, b_ref = refs[pos], refs[pos + 1]
        pos += 2
        x = jnp.dot(x.astype(jnp.bfloat16), w_ref[...],
                    preferred_element_type=jnp.float32) + b_ref[...]
        x = jnp.maximum(x, 0.0)
        # TODO(synk): Dropout is inference-mode identity here (no RNG drop).
    wf_ref, bf_ref = refs[pos], refs[pos + 1]
    o_ref = refs[pos + 2]
    o_ref[...] = jnp.dot(x.astype(jnp.bfloat16), wf_ref[...],
                         preferred_element_type=jnp.float32) + bf_ref[...]


def fc_head(fc_layers, final, pooled, *, row_tile=None):
    """FC layers + final classifier, fused and row-tiled over the batch."""
    n, c = pooled.shape
    num_classes = final["w"].shape[1]
    w_cols = max([l["w"].shape[1] for l in fc_layers] + [num_classes])
    row_bytes = 4 * (c + 2 * w_cols)
    tn, n_pad = _choose_row_tile(n, row_bytes, row_tile)
    if n_pad != n:
        pooled = jnp.pad(pooled, ((0, n_pad - n), (0, 0)))
    args = [pooled]
    specs = [pl.BlockSpec((tn, c), lambda i: (i, 0))]
    for layer in list(fc_layers) + [final]:
        w, b = layer["w"], layer["bias"]
        args += [w, b]
        specs += [pl.BlockSpec(tuple(w.shape), lambda i: (0, 0)),
                  pl.BlockSpec(tuple(b.shape), lambda i: (0, 0))]
    out = pl.pallas_call(
        functools.partial(_fc_head_kernel, n_fc=len(fc_layers)),
        out_shape=jax.ShapeDtypeStruct((n_pad, num_classes), jnp.float32),
        grid=(n_pad // tn,),
        in_specs=specs,
        out_specs=pl.BlockSpec((tn, num_classes), lambda i: (i, 0)),
        compiler_params=pltpu.CompilerParams(
            dimension_semantics=("parallel",),
            vmem_limit_bytes=_vmem_limit_bytes()),
    )(*args)
    return out[:n] if n_pad != n else out


# ---------------------------------------------------------------------------
# Parameter construction (BN folded to eval-mode affine, channels lane-padded)
# ---------------------------------------------------------------------------
def _fold_bn(key, c):
    kg, kb = jax.random.split(key)
    gamma = 1.0 + 0.1 * jax.random.normal(kg, (c,), jnp.float32)
    beta = 0.1 * jax.random.normal(kb, (c,), jnp.float32)
    running_mean = jnp.zeros((c,), jnp.float32)
    running_var = jnp.ones((c,), jnp.float32)
    scale = gamma / jnp.sqrt(running_var + 1e-5)
    bias = beta - running_mean * scale
    return scale, bias


def _weight(key, c_in, c_out):
    return jax.random.normal(key, (c_in, c_out), jnp.float32) / jnp.sqrt(c_in)


def _pad_affine(scale, bias, c_pad):
    s = jnp.pad(scale[None, :], ((0, 0), (0, c_pad - scale.shape[0])),
                constant_values=1.0)
    b = jnp.pad(bias[None, :], ((0, 0), (0, c_pad - bias.shape[0])),
                constant_values=0.0)
    return s, b


def _pad_weight(w, rows_to, cols_to):
    return jnp.pad(w, ((0, rows_to - w.shape[0]), (0, cols_to - w.shape[1])))


def build_params(key, input_dims, num_classes, conv_params, fc_params):
    keys = iter(jax.random.split(key, 512))
    params = {}

    s, b = _fold_bn(next(keys), input_dims)                  # use_fts_bn
    params["bn_fts"] = {"scale": s, "bias": b}

    edge_blocks = []
    in_real, in_pad = input_dims, _pad_lane(input_dims)
    for _k_nbrs, channels in conv_params:                    # K kept OUT of params
        blk = {"convs": []}
        c_prev_real, c_prev_pad = in_real, in_pad
        for li, c_out in enumerate(channels):
            c_out_p = _pad_lane(c_out)
            s_, b_ = _fold_bn(next(keys), c_out)
            s_p, b_p = _pad_affine(s_, b_, c_out_p)
            if li == 0:
                w = _weight(next(keys), 2 * in_real, c_out)  # [center, diff]
                w_c = _pad_weight(w[:in_real], in_pad, c_out_p)
                w_d = _pad_weight(w[in_real:], in_pad, c_out_p)
                blk["convs"].append({"w_c": w_c.astype(jnp.bfloat16),
                                     "w_d": w_d.astype(jnp.bfloat16),
                                     "scale": s_p, "bias": b_p})
            else:
                w = _pad_weight(_weight(next(keys), c_prev_real, c_out),
                                c_prev_pad, c_out_p)
                blk["convs"].append({"w": w.astype(jnp.bfloat16),
                                     "scale": s_p, "bias": b_p})
            c_prev_real, c_prev_pad = c_out, c_out_p
        c_last, c_last_p = channels[-1], _pad_lane(channels[-1])
        w = _pad_weight(_weight(next(keys), in_real, c_last), in_pad, c_last_p)
        s_, b_ = _fold_bn(next(keys), c_last)
        s_p, b_p = _pad_affine(s_, b_, c_last_p)
        blk["sc"] = {"w": w.astype(jnp.bfloat16), "scale": s_p, "bias": b_p}
        edge_blocks.append(blk)
        in_real, in_pad = c_last, c_last_p
    params["edge_convs"] = edge_blocks

    # fusion block: densely packed concat of the REAL block outputs, padded once
    in_chn_real = sum(c[-1] for _, c in conv_params)
    in_chn_pad = _pad_lane(in_chn_real)
    out_chn = max(128, min(1024, in_chn_real // 128 * 128))
    out_chn_p = _pad_lane(out_chn)
    w_fus = _pad_weight(_weight(next(keys), in_chn_real, out_chn),
                        in_chn_pad, out_chn_p)
    s_, b_ = _fold_bn(next(keys), out_chn)
    s_p, b_p = _pad_affine(s_, b_, out_chn_p)
    params["fusion"] = {"w": w_fus.astype(jnp.bfloat16),
                        "scale": s_p, "bias": b_p}

    # fully-connected head
    fcs = []
    in_fc_real, in_fc_pad = out_chn, out_chn_p
    for units, _drop in fc_params:
        w = _pad_weight(_weight(next(keys), in_fc_real, units), in_fc_pad, units)
        bias = 0.1 * jax.random.normal(next(keys), (units,), jnp.float32)
        fcs.append({"w": w.astype(jnp.bfloat16), "bias": bias[None, :]})
        in_fc_real = in_fc_pad = units
    params["fc"] = fcs
    w = _weight(next(keys), in_fc_real, num_classes)
    bias = 0.1 * jax.random.normal(next(keys), (num_classes,), jnp.float32)
    params["fc_final"] = {"w": w.astype(jnp.bfloat16), "bias": bias[None, :]}
    return params


# ---------------------------------------------------------------------------
# Forward pass
# ---------------------------------------------------------------------------
def particlenet_forward(params, points, features, mask=None, *,
                        conv_ks, conv_out_channels, row_tile=None):
    """conv_ks / conv_out_channels are STATIC tuples (bound via partial)."""
    if mask is None:
        mask = (jnp.abs(features).sum(axis=2, keepdims=True) != 0).astype(
            jnp.float32)
    else:
        mask = mask.astype(jnp.float32)

    n, p, in_dims = features.shape
    p_pad = _round_up(p, 8)
    if p_pad != p:                      # padded rows are fully masked out
        rowpad = ((0, 0), (0, p_pad - p), (0, 0))
        features = jnp.pad(features, rowpad)
        points = jnp.pad(points, rowpad)
        mask = jnp.pad(mask, rowpad)
        p = p_pad

    coord_shift = (mask == 0).astype(jnp.float32) * 1e9

    # input BatchNorm1d (eval-mode affine) + mask, then lane-pad channels
    bn = params["bn_fts"]
    fts = (features * bn["scale"] + bn["bias"]) * mask
    cin_pad = _pad_lane(in_dims)
    fts = jnp.pad(fts, ((0, 0), (0, 0), (0, cin_pad - in_dims))
                  ).astype(jnp.bfloat16)

    outputs = []
    for bi, blk in enumerate(params["edge_convs"]):
        k = conv_ks[bi]
        pts_input = (points if bi == 0 else fts) + coord_shift
        d = pairwise_dist(pts_input.astype(jnp.float32))      # (N, P, P)
        # TODO(synk): lax.approx_min_k is the faster TPU path but is not
        # bit-identical to torch.topk; keep the exact sort-based top_k here.
        _, idx = lax.top_k(-d, k + 1)
        idx = idx[:, :, 1:].astype(jnp.int32)                 # drop self
        fts = fused_edge_conv(blk, fts, idx, mask)            # bf16, masked
        outputs.append(fts[..., :conv_out_channels[bi]])      # real channels

    # fusion block: dense concat padded once to a lane multiple
    fused = jnp.concatenate(outputs, axis=2)
    c_real = fused.shape[2]
    c_dense = _pad_lane(c_real)
    if c_dense != c_real:
        fused = jnp.pad(fused, ((0, 0), (0, 0), (0, c_dense - c_real)))
    fb = params["fusion"]
    rows = n * p
    fts = mm_affine(fused.reshape(rows, c_dense), fb["w"], fb["scale"],
                    fb["bias"], mask.reshape(rows, 1), relu=True,
                    out_dtype=jnp.bfloat16, row_tile=row_tile
                    ).reshape(n, p, -1)

    # global pooling with counts (guarded against fully-masked events)
    counts = jnp.maximum(mask.sum(axis=1), 1.0)               # (N, 1)
    pooled = jnp.sum(fts.astype(jnp.float32), axis=1) / counts

    return fc_head(params["fc"], params["fc_final"], pooled, row_tile=row_tile)


# ---------------------------------------------------------------------------
# Main
# ---------------------------------------------------------------------------
if __name__ == "__main__":
    N, P = 2, 128
    COORD_DIMS = 2
    INPUT_DIMS = 4
    NUM_CLASSES = 5
    CONV_PARAMS = [(4, (8, 8, 8)), (4, (16, 16, 16))]
    FC_PARAMS = [(32, 0.1)]

    key = jax.random.PRNGKey(0)
    k_pts, k_fts, k_par = jax.random.split(key, 3)

    points = jax.random.normal(k_pts, (N, P, COORD_DIMS), jnp.float32)
    features = jax.random.normal(k_fts, (N, P, INPUT_DIMS), jnp.float32)
    # Zero out the last 16 particles of batch 0 so the mask path is exercised.
    features = features.at[0, P - 16:, :].set(0.0)

    params = build_params(k_par, INPUT_DIMS, NUM_CLASSES, CONV_PARAMS,
                          FC_PARAMS)

    fwd = jax.jit(functools.partial(
        particlenet_forward,
        conv_ks=tuple(k for k, _ in CONV_PARAMS),
        conv_out_channels=tuple(c[-1] for _, c in CONV_PARAMS)))

    logits = fwd(params, points, features)
    logits = jax.block_until_ready(logits)
    assert logits.shape == (N, NUM_CLASSES)
    assert bool(jnp.all(jnp.isfinite(logits)))
    print("KERNEL_OK")
</pallas_src>

<mosaic_0001>
module attributes {stable_mosaic.version = 11 : i64} {
  func.func @_dist_kernel(%arg0: i32, %arg1: memref<1x128x2xf32, #tpu.memory_space<vmem>>, %arg2: memref<1x128x128xf32, #tpu.memory_space<vmem>>) attributes {dimension_semantics = [#tpu.dimension_semantics<parallel>], iteration_bounds = array<i64: 2>, scalar_prefetch = 0 : i64, scratch_operands = 0 : i64, tpu.core_type = #tpu.core_type<tc>, window_params = [{transform_indices = @transform_0, window_bounds = array<i64: 1, 128, 2>}, {transform_indices = @transform_1, window_bounds = array<i64: 1, 128, 128>}]} {
    %c0 = arith.constant 0 : index
    %c0_0 = arith.constant 0 : index
    %c0_1 = arith.constant 0 : index
    %0 = vector.load %arg1[%c0, %c0_0, %c0_1] : memref<1x128x2xf32, #tpu.memory_space<vmem>>, vector<1x128x2xf32>
    %cst = arith.constant dense<0.000000e+00> : vector<1x128x128xf32>
    %1 = tpu.matmul %0, %0, %cst {dimension_numbers = #tpu.dot_dimension_numbers<[2], [2], [1], [1], [0, 0, 0, 1, 1, 1], [0], [0]>} : vector<1x128x2xf32>, vector<1x128x2xf32>, vector<1x128x128xf32> -> vector<1x128x128xf32>
    %2 = arith.mulf %0, %0 : vector<1x128x2xf32>
    %cst_2 = arith.constant dense<0.000000e+00> : vector<1x128xf32>
    %3 = vector.multi_reduction <add>, %2, %cst_2 [2] : vector<1x128x2xf32> to vector<1x128xf32>
    %4 = vector.shape_cast %3 : vector<1x128xf32> to vector<1x128x1xf32>
    %cst_3 = arith.constant dense<0.000000e+00> : vector<1x128xf32>
    %5 = vector.multi_reduction <add>, %2, %cst_3 [2] : vector<1x128x2xf32> to vector<1x128xf32>
    %6 = vector.shape_cast %5 : vector<1x128xf32> to vector<1x1x128xf32>
    %cst_4 = arith.constant 2.000000e+00 : f32
    %7 = vector.broadcast %cst_4 : f32 to vector<1x128x128xf32>
    %8 = arith.mulf %7, %1 : vector<1x128x128xf32>
    %9 = vector.broadcast %4 : vector<1x128x1xf32> to vector<1x128x128xf32>
    %10 = arith.subf %9, %8 : vector<1x128x128xf32>
    %11 = vector.broadcast %6 : vector<1x1x128xf32> to vector<1x128x128xf32>
    %12 = arith.addf %10, %11 : vector<1x128x128xf32>
    %c0_5 = arith.constant 0 : index
    %c0_6 = arith.constant 0 : index
    %c0_7 = arith.constant 0 : index
    %13 = vector.load %arg2[%c0_5, %c0_6, %c0_7] : memref<1x128x128xf32, #tpu.memory_space<vmem>>, vector<1x128x128xf32>
    tpu.vector_store %arg2[%c0_5, %c0_6, %c0_7], %12 {strides = array<i32>} : memref<1x128x128xf32, #tpu.memory_space<vmem>>, vector<1x128x128xf32>,
    return
  }
  func.func @transform_0(%arg0: i32) -> (i32, i32, i32) {
    %c0_i32 = arith.constant 0 : i32
    %c0_i32_0 = arith.constant 0 : i32
    %c0_i32_1 = arith.constant 0 : i32
    return %arg0, %c0_i32, %c0_i32_0 : i32, i32, i32
  }
  func.func @transform_1(%arg0: i32) -> (i32, i32, i32) {
    %c0_i32 = arith.constant 0 : i32
    %c0_i32_0 = arith.constant 0 : i32
    %c0_i32_1 = arith.constant 0 : i32
    return %arg0, %c0_i32, %c0_i32_0 : i32, i32, i32
  }
}

module attributes {stable_mosaic.version = 11 : i64} {
  func.func @_edge_conv_kernel(%arg0: i32, %arg1: memref<1x128x128xbf16, #tpu.memory_space<vmem>>, %arg2: memref<1x128x4xi32, #tpu.memory_space<vmem>>, %arg3: memref<1x128x1xf32, #tpu.memory_space<vmem>>, %arg4: memref<128x128xbf16, #tpu.memory_space<vmem>>, %arg5: memref<128x128xbf16, #tpu.memory_space<vmem>>, %arg6: memref<1x128xf32, #tpu.memory_space<vmem>>, %arg7: memref<1x128xf32, #tpu.memory_space<vmem>>, %arg8: memref<128x128xbf16, #tpu.memory_space<vmem>>, %arg9: memref<1x128xf32, #tpu.memory_space<vmem>>, %arg10: memref<1x128xf32, #tpu.memory_space<vmem>>, %arg11: memref<128x128xbf16, #tpu.memory_space<vmem>>, %arg12: memref<1x128xf32, #tpu.memory_space<vmem>>, %arg13: memref<1x128xf32, #tpu.memory_space<vmem>>, %arg14: memref<128x128xbf16, #tpu.memory_space<vmem>>, %arg15: memref<1x128xf32, #tpu.memory_space<vmem>>, %arg16: memref<1x128xf32, #tpu.memory_space<vmem>>, %arg17: memref<1x128x128xbf16, #tpu.memory_space<vmem>>) attributes {dimension_semantics = [#tpu.dimension_semantics<parallel>], iteration_bounds = array<i64: 2>, scalar_prefetch = 0 : i64, scratch_operands = 0 : i64, tpu.core_type = #tpu.core_type<tc>, window_params = [{transform_indices = @transform_0, window_bounds = array<i64: 1, 128, 128>}, {transform_indices = @transform_1, window_bounds = array<i64: 1, 128, 4>}, {transform_indices = @transform_2, window_bounds = array<i64: 1, 128, 1>}, {pipeline_mode = #tpu.pipeline_mode<synchronous>, transform_indices = @transform_3, window_bounds = array<i64: 128, 128>}, {pipeline_mode = #tpu.pipeline_mode<synchronous>, transform_indices = @transform_4, window_bounds = array<i64: 128, 128>}, {pipeline_mode = #tpu.pipeline_mode<synchronous>, transform_indices = @transform_5, window_bounds = array<i64: 1, 128>}, {pipeline_mode = #tpu.pipeline_mode<synchronous>, transform_indices = @transform_6, window_bounds = array<i64: 1, 128>}, {pipeline_mode = #tpu.pipeline_mode<synchronous>, transform_indices = @transform_7, window_bounds = array<i64: 128, 128>}, {pipeline_mode = #tpu.pipeline_mode<synchronous>, transform_indices = @transform_8, window_bounds = array<i64: 1, 128>}, {pipeline_mode = #tpu.pipeline_mode<synchronous>, transform_indices = @transform_9, window_bounds = array<i64: 1, 128>}, {pipeline_mode = #tpu.pipeline_mode<synchronous>, transform_indices = @transform_10, window_bounds = array<i64: 128, 128>}, {pipeline_mode = #tpu.pipeline_mode<synchronous>, transform_indices = @transform_11, window_bounds = array<i64: 1, 128>}, {pipeline_mode = #tpu.pipeline_mode<synchronous>, transform_indices = @transform_12, window_bounds = array<i64: 1, 128>}, {pipeline_mode = #tpu.pipeline_mode<synchronous>, transform_indices = @transform_13, window_bounds = array<i64: 128, 128>}, {pipeline_mode = #tpu.pipeline_mode<synchronous>, transform_indices = @transform_14, window_bounds = array<i64: 1, 128>}, {pipeline_mode = #tpu.pipeline_mode<synchronous>, transform_indices = @transform_15, window_bounds = array<i64: 1, 128>}, {transform_indices = @transform_16, window_bounds = array<i64: 1, 128, 128>}]} {
    %c0 = arith.constant 0 : index
    %c0_0 = arith.constant 0 : index
    %c0_1 = arith.constant 0 : index
    %0 = vector.load %arg1[%c0, %c0_0, %c0_1] : memref<1x128x128xbf16, #tpu.memory_space<vmem>>, vector<1x128x128xbf16>
    %1 = vector.shape_cast %0 : vector<1x128x128xbf16> to vector<128x128xbf16>
    %2 = arith.extf %1 : vector<128x128xbf16> to vector<128x128xf32>
    %c0_2 = arith.constant 0 : index
    %c0_3 = arith.constant 0 : index
    %c0_4 = arith.constant 0 : index
    %3 = vector.load %arg2[%c0_2, %c0_3, %c0_4] : memref<1x128x4xi32, #tpu.memory_space<vmem>>, vector<1x128x4xi32>
    %4 = vector.shape_cast %3 : vector<1x128x4xi32> to vector<128x4xi32>
    %c0_5 = arith.constant 0 : index
    %c0_6 = arith.constant 0 : index
    %c0_7 = arith.constant 0 : index
    %5 = vector.load %arg3[%c0_5, %c0_6, %c0_7] : memref<1x128x1xf32, #tpu.memory_space<vmem>>, vector<1x128x1xf32>
    %6 = vector.shape_cast %5 : vector<1x128x1xf32> to vector<128x1xf32>
    %c0_8 = arith.constant 0 : index
    %c0_9 = arith.constant 0 : index
    %7 = vector.load %arg14[%c0_8, %c0_9] : memref<128x128xbf16, #tpu.memory_space<vmem>>, vector<128x128xbf16>
    %cst = arith.constant dense<0.000000e+00> : vector<128x128xf32>
    %8 = tpu.matmul %1, %7, %cst {dimension_numbers = #tpu.dot_dimension_numbers<[1], [0], [0], [1], [0, 0, 1, 1], [], []>} : vector<128x128xbf16>, vector<128x128xbf16>, vector<128x128xf32> -> vector<128x128xf32>
    %c0_10 = arith.constant 0 : index
    %c0_11 = arith.constant 0 : index
    %9 = vector.load %arg15[%c0_10, %c0_11] : memref<1x128xf32, #tpu.memory_space<vmem>>, vector<1x128xf32>
    %10 = vector.broadcast %9 : vector<1x128xf32> to vector<128x128xf32>
    %11 = arith.mulf %8, %10 : vector<128x128xf32>
    %c0_12 = arith.constant 0 : index
    %c0_13 = arith.constant 0 : index
    %12 = vector.load %arg16[%c0_12, %c0_13] : memref<1x128xf32, #tpu.memory_space<vmem>>, vector<1x128xf32>
    %13 = vector.broadcast %12 : vector<1x128xf32> to vector<128x128xf32>
    %14 = arith.addf %11, %13 : vector<128x128xf32>
    %cst_14 = arith.constant 0.000000e+00 : f32
    %15 = vector.broadcast %cst_14 : f32 to vector<128x128xf32>
    %16 = arith.maximumf %14, %15 : vector<128x128xf32>
    %c0_15 = arith.constant 0 : index
    %c0_16 = arith.constant 0 : index
    %17 = vector.load %arg4[%c0_15, %c0_16] : memref<128x128xbf16, #tpu.memory_space<vmem>>, vector<128x128xbf16>
    %c0_17 = arith.constant 0 : index
    %c0_18 = arith.constant 0 : index
    %18 = vector.load %arg5[%c0_17, %c0_18] : memref<128x128xbf16, #tpu.memory_space<vmem>>, vector<128x128xbf16>
    %c0_19 = arith.constant 0 : index
    %c0_20 = arith.constant 0 : index
    %19 = vector.load %arg6[%c0_19, %c0_20] : memref<1x128xf32, #tpu.memory_space<vmem>>, vector<1x128xf32>
    %c0_21 = arith.constant 0 : index
    %c0_22 = arith.constant 0 : index
    %20 = vector.load %arg7[%c0_21, %c0_22] : memref<1x128xf32, #tpu.memory_space<vmem>>, vector<1x128xf32>
    %cst_23 = arith.constant dense<0.000000e+00> : vector<128x128xf32>
    %21 = tpu.matmul %1, %17, %cst_23 {dimension_numbers = #tpu.dot_dimension_numbers<[1], [0], [0], [1], [0, 0, 1, 1], [], []>} : vector<128x128xbf16>, vector<128x128xbf16>, vector<128x128xf32> -> vector<128x128xf32>
    %22 = tpu.iota {dimensions = array<i32: 1>} : vector<128x128xi32>
    %23 = vector.extract_strided_slice %4 {offsets = [0, 0], sizes = [128, 1], strides = [1, 1]} : vector<128x4xi32> to vector<128x1xi32>
    %24 = vector.broadcast %23 : vector<128x1xi32> to vector<128x128xi32>
    %25 = arith.cmpi eq, %22, %24 : vector<128x128xi32>
    %cst_24 = arith.constant 1.000000e+00 : f32
    %cst_25 = arith.constant 0.000000e+00 : f32
    %26 = vector.broadcast %cst_24 : f32 to vector<128x128xf32>
    %27 = vector.broadcast %cst_25 : f32 to vector<128x128xf32>
    %28 = arith.select %25, %26, %27 : vector<128x128xi1>, vector<128x128xf32>
    %29 = arith.truncf %28 : vector<128x128xf32> to vector<128x128xbf16>
    %cst_26 = arith.constant dense<0.000000e+00> : vector<128x128xf32>
    %30 = tpu.matmul %29, %1, %cst_26 {dimension_numbers = #tpu.dot_dimension_numbers<[1], [0], [0], [1], [0, 0, 1, 1], [], []>} : vector<128x128xbf16>, vector<128x128xbf16>, vector<128x128xf32> -> vector<128x128xf32>
    %31 = arith.subf %30, %2 : vector<128x128xf32>
    %32 = arith.truncf %31 : vector<128x128xf32> to vector<128x128xbf16>
    %cst_27 = arith.constant dense<0.000000e+00> : vector<128x128xf32>
    %33 = tpu.matmul %32, %18, %cst_27 {dimension_numbers = #tpu.dot_dimension_numbers<[1], [0], [0], [1], [0, 0, 1, 1], [], []>} : vector<128x128xbf16>, vector<128x128xbf16>, vector<128x128xf32> -> vector<128x128xf32>
    %34 = arith.addf %33, %21 : vector<128x128xf32>
    %35 = vector.broadcast %19 : vector<1x128xf32> to vector<128x128xf32>
    %36 = arith.mulf %34, %35 : vector<128x128xf32>
    %37 = vector.broadcast %20 : vector<1x128xf32> to vector<128x128xf32>
    %38 = arith.addf %36, %37 : vector<128x128xf32>
    %cst_28 = arith.constant 0.000000e+00 : f32
    %39 = vector.broadcast %cst_28 : f32 to vector<128x128xf32>
    %40 = arith.maximumf %38, %39 : vector<128x128xf32>
    %41 = vector.extract_strided_slice %4 {offsets = [0, 1], sizes = [128, 1], strides = [1, 1]} : vector<128x4xi32> to vector<128x1xi32>
    %42 = vector.broadcast %41 : vector<128x1xi32> to vector<128x128xi32>
    %43 = arith.cmpi eq, %22, %42 : vector<128x128xi32>
    %cst_29 = arith.constant 1.000000e+00 : f32
    %cst_30 = arith.constant 0.000000e+00 : f32
    %44 = vector.broadcast %cst_29 : f32 to vector<128x128xf32>
    %45 = vector.broadcast %cst_30 : f32 to vector<128x128xf32>
    %46 = arith.select %43, %44, %45 : vector<128x128xi1>, vector<128x128xf32>
    %47 = arith.truncf %46 : vector<128x128xf32> to vector<128x128xbf16>
    %cst_31 = arith.constant dense<0.000000e+00> : vector<128x128xf32>
    %48 = tpu.matmul %47, %1, %cst_31 {dimension_numbers = #tpu.dot_dimension_numbers<[1], [0], [0], [1], [0, 0, 1, 1], [], []>} : vector<128x128xbf16>, vector<128x128xbf16>, vector<128x128xf32> -> vector<128x128xf32>
    %49 = arith.subf %48, %2 : vector<128x128xf32>
    %50 = arith.truncf %49 : vector<128x128xf32> to vector<128x128xbf16>
    %cst_32 = arith.constant dense<0.000000e+00> : vector<128x128xf32>
    %51 = tpu.matmul %50, %18, %cst_32 {dimension_numbers = #tpu.dot_dimension_numbers<[1], [0], [0], [1], [0, 0, 1, 1], [], []>} : vector<128x128xbf16>, vector<128x128xbf16>, vector<128x128xf32> -> vector<128x128xf32>
    %52 = arith.addf %51, %21 : vector<128x128xf32>
    %53 = vector.broadcast %19 : vector<1x128xf32> to vector<128x128xf32>
    %54 = arith.mulf %52, %53 : vector<128x128xf32>
    %55 = vector.broadcast %20 : vector<1x128xf32> to vector<128x128xf32>
    %56 = arith.addf %54, %55 : vector<128x128xf32>
    %cst_33 = arith.constant 0.000000e+00 : f32
    %57 = vector.broadcast %cst_33 : f32 to vector<128x128xf32>
    %58 = arith.maximumf %56, %57 : vector<128x128xf32>
    %59 = vector.extract_strided_slice %4 {offsets = [0, 2], sizes = [128, 1], strides = [1, 1]} : vector<128x4xi32> to vector<128x1xi32>
    %60 = vector.broadcast %59 : vector<128x1xi32> to vector<128x128xi32>
    %61 = arith.cmpi eq, %22, %60 : vector<128x128xi32>
    %cst_34 = arith.constant 1.000000e+00 : f32
    %cst_35 = arith.constant 0.000000e+00 : f32
    %62 = vector.broadcast %cst_34 : f32 to vector<128x128xf32>
    %63 = vector.broadcast %cst_35 : f32 to vector<128x128xf32>
    %64 = arith.select %61, %62, %63 : vector<128x128xi1>, vector<128x128xf32>
    %65 = arith.truncf %64 : vector<128x128xf32> to vector<128x128xbf16>
    %cst_36 = arith.constant dense<0.000000e+00> : vector<128x128xf32>
    %66 = tpu.matmul %65, %1, %cst_36 {dimension_numbers = #tpu.dot_dimension_numbers<[1], [0], [0], [1], [0, 0, 1, 1], [], []>} : vector<128x128xbf16>, vector<128x128xbf16>, vector<128x128xf32> -> vector<128x128xf32>
    %67 = arith.subf %66, %2 : vector<128x128xf32>
    %68 = arith.truncf %67 : vector<128x128xf32> to vector<128x128xbf16>
    %cst_37 = arith.constant dense<0.000000e+00> : vector<128x128xf32>
    %69 = tpu.matmul %68, %18, %cst_37 {dimension_numbers = #tpu.dot_dimension_numbers<[1], [0], [0], [1], [0, 0, 1, 1], [], []>} : vector<128x128xbf16>, vector<128x128xbf16>, vector<128x128xf32> -> vector<128x128xf32>
    %70 = arith.addf %69, %21 : vector<128x128xf32>
    %71 = vector.broadcast %19 : vector<1x128xf32> to vector<128x128xf32>
    %72 = arith.mulf %70, %71 : vector<128x128xf32>
    %73 = vector.broadcast %20 : vector<1x128xf32> to vector<128x128xf32>
    %74 = arith.addf %72, %73 : vector<128x128xf32>
    %cst_38 = arith.constant 0.000000e+00 : f32
    %75 = vector.broadcast %cst_38 : f32 to vector<128x128xf32>
    %76 = arith.maximumf %74, %75 : vector<128x128xf32>
    %77 = vector.extract_strided_slice %4 {offsets = [0, 3], sizes = [128, 1], strides = [1, 1]} : vector<128x4xi32> to vector<128x1xi32>
    %78 = vector.broadcast %77 : vector<128x1xi32> to vector<128x128xi32>
    %79 = arith.cmpi eq, %22, %78 : vector<128x128xi32>
    %cst_39 = arith.constant 1.000000e+00 : f32
    %cst_40 = arith.constant 0.000000e+00 : f32
    %80 = vector.broadcast %cst_39 : f32 to vector<128x128xf32>
    %81 = vector.broadcast %cst_40 : f32 to vector<128x128xf32>
    %82 = arith.select %79, %80, %81 : vector<128x128xi1>, vector<128x128xf32>
    %83 = arith.truncf %82 : vector<128x128xf32> to vector<128x128xbf16>
    %cst_41 = arith.constant dense<0.000000e+00> : vector<128x128xf32>
    %84 = tpu.matmul %83, %1, %cst_41 {dimension_numbers = #tpu.dot_dimension_numbers<[1], [0], [0], [1], [0, 0, 1, 1], [], []>} : vector<128x128xbf16>, vector<128x128xbf16>, vector<128x128xf32> -> vector<128x128xf32>
    %85 = arith.subf %84, %2 : vector<128x128xf32>
    %86 = arith.truncf %85 : vector<128x128xf32> to vector<128x128xbf16>
    %cst_42 = arith.constant dense<0.000000e+00> : vector<128x128xf32>
    %87 = tpu.matmul %86, %18, %cst_42 {dimension_numbers = #tpu.dot_dimension_numbers<[1], [0], [0], [1], [0, 0, 1, 1], [], []>} : vector<128x128xbf16>, vector<128x128xbf16>, vector<128x128xf32> -> vector<128x128xf32>
    %88 = arith.addf %87, %21 : vector<128x128xf32>
    %89 = vector.broadcast %19 : vector<1x128xf32> to vector<128x128xf32>
    %90 = arith.mulf %88, %89 : vector<128x128xf32>
    %91 = vector.broadcast %20 : vector<1x128xf32> to vector<128x128xf32>
    %92 = arith.addf %90, %91 : vector<128x128xf32>
    %cst_43 = arith.constant 0.000000e+00 : f32
    %93 = vector.broadcast %cst_43 : f32 to vector<128x128xf32>
    %94 = arith.maximumf %92, %93 : vector<128x128xf32>
    %95 = tpu.concatenate %40, %58, %76, %94 in 0 : vector<128x128xf32>, vector<128x128xf32>, vector<128x128xf32>, vector<128x128xf32> -> vector<512x128xf32>
    %96 = arith.truncf %95 : vector<512x128xf32> to vector<512x128xbf16>
    %c0_44 = arith.constant 0 : index
    %c0_45 = arith.constant 0 : index
    %97 = vector.load %arg8[%c0_44, %c0_45] : memref<128x128xbf16, #tpu.memory_space<vmem>>, vector<128x128xbf16>
    %cst_46 = arith.constant dense<0.000000e+00> : vector<512x128xf32>
    %98 = tpu.matmul %96, %97, %cst_46 {dimension_numbers = #tpu.dot_dimension_numbers<[1], [0], [0], [1], [0, 0, 1, 1], [], []>} : vector<512x128xbf16>, vector<128x128xbf16>, vector<512x128xf32> -> vector<512x128xf32>
    %c0_47 = arith.constant 0 : index
    %c0_48 = arith.constant 0 : index
    %99 = vector.load %arg9[%c0_47, %c0_48] : memref<1x128xf32, #tpu.memory_space<vmem>>, vector<1x128xf32>
    %100 = vector.broadcast %99 : vector<1x128xf32> to vector<512x128xf32>
    %101 = arith.mulf %98, %100 : vector<512x128xf32>
    %c0_49 = arith.constant 0 : index
    %c0_50 = arith.constant 0 : index
    %102 = vector.load %arg10[%c0_49, %c0_50] : memref<1x128xf32, #tpu.memory_space<vmem>>, vector<1x128xf32>
    %103 = vector.broadcast %102 : vector<1x128xf32> to vector<512x128xf32>
    %104 = arith.addf %101, %103 : vector<512x128xf32>
    %cst_51 = arith.constant 0.000000e+00 : f32
    %105 = vector.broadcast %cst_51 : f32 to vector<512x128xf32>
    %106 = arith.maximumf %104, %105 : vector<512x128xf32>
    %107 = arith.truncf %106 : vector<512x128xf32> to vector<512x128xbf16>
    %c0_52 = arith.constant 0 : index
    %c0_53 = arith.constant 0 : index
    %108 = vector.load %arg11[%c0_52, %c0_53] : memref<128x128xbf16, #tpu.memory_space<vmem>>, vector<128x128xbf16>
    %cst_54 = arith.constant dense<0.000000e+00> : vector<512x128xf32>
    %109 = tpu.matmul %107, %108, %cst_54 {dimension_numbers = #tpu.dot_dimension_numbers<[1], [0], [0], [1], [0, 0, 1, 1], [], []>} : vector<512x128xbf16>, vector<128x128xbf16>, vector<512x128xf32> -> vector<512x128xf32>
    %c0_55 = arith.constant 0 : index
    %c0_56 = arith.constant 0 : index
    %110 = vector.load %arg12[%c0_55, %c0_56] : memref<1x128xf32, #tpu.memory_space<vmem>>, vector<1x128xf32>
    %111 = vector.broadcast %110 : vector<1x128xf32> to vector<512x128xf32>
    %112 = arith.mulf %109, %111 : vector<512x128xf32>
    %c0_57 = arith.constant 0 : index
    %c0_58 = arith.constant 0 : index
    %113 = vector.load %arg13[%c0_57, %c0_58] : memref<1x128xf32, #tpu.memory_space<vmem>>, vector<1x128xf32>
    %114 = vector.broadcast %113 : vector<1x128xf32> to vector<512x128xf32>
    %115 = arith.addf %112, %114 : vector<512x128xf32>
    %cst_59 = arith.constant 0.000000e+00 : f32
    %116 = vector.broadcast %cst_59 : f32 to vector<512x128xf32>
    %117 = arith.maximumf %115, %116 : vector<512x128xf32>
    %118 = vector.extract_strided_slice %117 {offsets = [0, 0], sizes = [128, 128], strides = [1, 1]} : vector<512x128xf32> to vector<128x128xf32>
    %119 = vector.extract_strided_slice %117 {offsets = [128, 0], sizes = [128, 128], strides = [1, 1]} : vector<512x128xf32> to vector<128x128xf32>
    %120 = arith.addf %118, %119 : vector<128x128xf32>
    %121 = vector.extract_strided_slice %117 {offsets = [256, 0], sizes = [128, 128], strides = [1, 1]} : vector<512x128xf32> to vector<128x128xf32>
    %122 = arith.addf %120, %121 : vector<128x128xf32>
    %123 = vector.extract_strided_slice %117 {offsets = [384, 0], sizes = [128, 128], strides = [1, 1]} : vector<512x128xf32> to vector<128x128xf32>
    %124 = arith.addf %122, %123 : vector<128x128xf32>
    %cst_60 = arith.constant 2.500000e-01 : f32
    %125 = vector.broadcast %cst_60 : f32 to vector<128x128xf32>
    %126 = arith.mulf %124, %125 : vector<128x128xf32>
    %127 = arith.addf %126, %16 : vector<128x128xf32>
    %128 = vector.broadcast %6 : vector<128x1xf32> to vector<128x128xf32>
    %129 = arith.mulf %127, %128 : vector<128x128xf32>
    %130 = arith.truncf %129 : vector<128x128xf32> to vector<128x128xbf16>
    %c0_61 = arith.constant 0 : index
    %c0_62 = arith.constant 0 : index
    %c0_63 = arith.constant 0 : index
    %131 = vector.load %arg17[%c0_61, %c0_62, %c0_63] : memref<1x128x128xbf16, #tpu.memory_space<vmem>>, vector<1x128x128xbf16>
    %132 = vector.shape_cast %131 : vector<1x128x128xbf16> to vector<128x128xbf16>
    %133 = vector.shape_cast %130 : vector<128x128xbf16> to vector<1x128x128xbf16>
    tpu.vector_store %arg17[%c0_61, %c0_62, %c0_63], %133 {strides = array<i32>} : memref<1x128x128xbf16, #tpu.memory_space<vmem>>, vector<1x128x128xbf16>,
    return
  }
  func.func @transform_0(%arg0: i32) -> (i32, i32, i32) {
    %c0_i32 = arith.constant 0 : i32
    %c0_i32_0 = arith.constant 0 : i32
    %c0_i32_1 = arith.constant 0 : i32
    return %arg0, %c0_i32, %c0_i32_0 : i32, i32, i32
  }
  func.func @transform_1(%arg0: i32) -> (i32, i32, i32) {
    %c0_i32 = arith.constant 0 : i32
    %c0_i32_0 = arith.constant 0 : i32
    %c0_i32_1 = arith.constant 0 : i32
    return %arg0, %c0_i32, %c0_i32_0 : i32, i32, i32
  }
  func.func @transform_2(%arg0: i32) -> (i32, i32, i32) {
    %c0_i32 = arith.constant 0 : i32
    %c0_i32_0 = arith.constant 0 : i32
    %c0_i32_1 = arith.constant 0 : i32
    return %arg0, %c0_i32, %c0_i32_0 : i32, i32, i32
  }
  func.func @transform_3(%arg0: i32) -> (i32, i32) {
    %c0_i32 = arith.constant 0 : i32
    %c0_i32_0 = arith.constant 0 : i32
    %c0_i32_1 = arith.constant 0 : i32
    return %c0_i32, %c0_i32_0 : i32, i32
  }
  func.func @transform_4(%arg0: i32) -> (i32, i32) {
    %c0_i32 = arith.constant 0 : i32
    %c0_i32_0 = arith.constant 0 : i32
    %c0_i32_1 = arith.constant 0 : i32
    return %c0_i32, %c0_i32_0 : i32, i32
  }
  func.func @transform_5(%arg0: i32) -> (i32, i32) {
    %c0_i32 = arith.constant 0 : i32
    %c0_i32_0 = arith.constant 0 : i32
    %c0_i32_1 = arith.constant 0 : i32
    return %c0_i32, %c0_i32_0 : i32, i32
  }
  func.func @transform_6(%arg0: i32) -> (i32, i32) {
    %c0_i32 = arith.constant 0 : i32
    %c0_i32_0 = arith.constant 0 : i32
    %c0_i32_1 = arith.constant 0 : i32
    return %c0_i32, %c0_i32_0 : i32, i32
  }
  func.func @transform_7(%arg0: i32) -> (i32, i32) {
    %c0_i32 = arith.constant 0 : i32
    %c0_i32_0 = arith.constant 0 : i32
    %c0_i32_1 = arith.constant 0 : i32
    return %c0_i32, %c0_i32_0 : i32, i32
  }
  func.func @transform_8(%arg0: i32) -> (i32, i32) {
    %c0_i32 = arith.constant 0 : i32
    %c0_i32_0 = arith.constant 0 : i32
    %c0_i32_1 = arith.constant 0 : i32
    return %c0_i32, %c0_i32_0 : i32, i32
  }
  func.func @transform_9(%arg0: i32) -> (i32, i32) {
    %c0_i32 = arith.constant 0 : i32
    %c0_i32_0 = arith.constant 0 : i32
    %c0_i32_1 = arith.constant 0 : i32
    return %c0_i32, %c0_i32_0 : i32, i32
  }
  func.func @transform_10(%arg0: i32) -> (i32, i32) {
    %c0_i32 = arith.constant 0 : i32
    %c0_i32_0 = arith.constant 0 : i32
    %c0_i32_1 = arith.constant 0 : i32
    return %c0_i32, %c0_i32_0 : i32, i32
  }
  func.func @transform_11(%arg0: i32) -> (i32, i32) {
    %c0_i32 = arith.constant 0 : i32
    %c0_i32_0 = arith.constant 0 : i32
    %c0_i32_1 = arith.constant 0 : i32
    return %c0_i32, %c0_i32_0 : i32, i32
  }
  func.func @transform_12(%arg0: i32) -> (i32, i32) {
    %c0_i32 = arith.constant 0 : i32
    %c0_i32_0 = arith.constant 0 : i32
    %c0_i32_1 = arith.constant 0 : i32
    return %c0_i32, %c0_i32_0 : i32, i32
  }
  func.func @transform_13(%arg0: i32) -> (i32, i32) {
    %c0_i32 = arith.constant 0 : i32
    %c0_i32_0 = arith.constant 0 : i32
    %c0_i32_1 = arith.constant 0 : i32
    return %c0_i32, %c0_i32_0 : i32, i32
  }
  func.func @transform_14(%arg0: i32) -> (i32, i32) {
    %c0_i32 = arith.constant 0 : i32
    %c0_i32_0 = arith.constant 0 : i32
    %c0_i32_1 = arith.constant 0 : i32
    return %c0_i32, %c0_i32_0 : i32, i32
  }
  func.func @transform_15(%arg0: i32) -> (i32, i32) {
    %c0_i32 = arith.constant 0 : i32
    %c0_i32_0 = arith.constant 0 : i32
    %c0_i32_1 = arith.constant 0 : i32
    return %c0_i32, %c0_i32_0 : i32, i32
  }
  func.func @transform_16(%arg0: i32) -> (i32, i32, i32) {
    %c0_i32 = arith.constant 0 : i32
    %c0_i32_0 = arith.constant 0 : i32
    %c0_i32_1 = arith.constant 0 : i32
    return %arg0, %c0_i32, %c0_i32_0 : i32, i32, i32
  }
}

module attributes {stable_mosaic.version = 11 : i64} {
  func.func @_dist_kernel(%arg0: i32, %arg1: memref<1x128x128xf32, #tpu.memory_space<vmem>>, %arg2: memref<1x128x128xf32, #tpu.memory_space<vmem>>) attributes {dimension_semantics = [#tpu.dimension_semantics<parallel>], iteration_bounds = array<i64: 2>, scalar_prefetch = 0 : i64, scratch_operands = 0 : i64, tpu.core_type = #tpu.core_type<tc>, window_params = [{transform_indices = @transform_0, window_bounds = array<i64: 1, 128, 128>}, {transform_indices = @transform_1, window_bounds = array<i64: 1, 128, 128>}]} {
    %c0 = arith.constant 0 : index
    %c0_0 = arith.constant 0 : index
    %c0_1 = arith.constant 0 : index
    %0 = vector.load %arg1[%c0, %c0_0, %c0_1] : memref<1x128x128xf32, #tpu.memory_space<vmem>>, vector<1x128x128xf32>
    %cst = arith.constant dense<0.000000e+00> : vector<1x128x128xf32>
    %1 = tpu.matmul %0, %0, %cst {dimension_numbers = #tpu.dot_dimension_numbers<[2], [2], [1], [1], [0, 0, 0, 1, 1, 1], [0], [0]>} : vector<1x128x128xf32>, vector<1x128x128xf32>, vector<1x128x128xf32> -> vector<1x128x128xf32>
    %2 = arith.mulf %0, %0 : vector<1x128x128xf32>
    %cst_2 = arith.constant dense<0.000000e+00> : vector<1x128xf32>
    %3 = vector.multi_reduction <add>, %2, %cst_2 [2] : vector<1x128x128xf32> to vector<1x128xf32>
    %4 = vector.shape_cast %3 : vector<1x128xf32> to vector<1x128x1xf32>
    %cst_3 = arith.constant dense<0.000000e+00> : vector<1x128xf32>
    %5 = vector.multi_reduction <add>, %2, %cst_3 [2] : vector<1x128x128xf32> to vector<1x128xf32>
    %6 = vector.shape_cast %5 : vector<1x128xf32> to vector<1x1x128xf32>
    %cst_4 = arith.constant 2.000000e+00 : f32
    %7 = vector.broadcast %cst_4 : f32 to vector<1x128x128xf32>
    %8 = arith.mulf %7, %1 : vector<1x128x128xf32>
    %9 = vector.broadcast %4 : vector<1x128x1xf32> to vector<1x128x128xf32>
    %10 = arith.subf %9, %8 : vector<1x128x128xf32>
    %11 = vector.broadcast %6 : vector<1x1x128xf32> to vector<1x128x128xf32>
    %12 = arith.addf %10, %11 : vector<1x128x128xf32>
    %c0_5 = arith.constant 0 : index
    %c0_6 = arith.constant 0 : index
    %c0_7 = arith.constant 0 : index
    %13 = vector.load %arg2[%c0_5, %c0_6, %c0_7] : memref<1x128x128xf32, #tpu.memory_space<vmem>>, vector<1x128x128xf32>
    tpu.vector_store %arg2[%c0_5, %c0_6, %c0_7], %12 {strides = array<i32>} : memref<1x128x128xf32, #tpu.memory_space<vmem>>, vector<1x128x128xf32>,
    return
  }
  func.func @transform_0(%arg0: i32) -> (i32, i32, i32) {
    %c0_i32 = arith.constant 0 : i32
    %c0_i32_0 = arith.constant 0 : i32
    %c0_i32_1 = arith.constant 0 : i32
    return %arg0, %c0_i32, %c0_i32_0 : i32, i32, i32
  }
  func.func @transform_1(%arg0: i32) -> (i32, i32, i32) {
    %c0_i32 = arith.constant 0 : i32
    %c0_i32_0 = arith.constant 0 : i32
    %c0_i32_1 = arith.constant 0 : i32
    return %arg0, %c0_i32, %c0_i32_0 : i32, i32, i32
  }
}

module attributes {stable_mosaic.version = 11 : i64} {
  func.func @_mm_affine_kernel(%arg0: i32, %arg1: memref<128x128xbf16, #tpu.memory_space<vmem>>, %arg2: memref<128x128xbf16, #tpu.memory_space<vmem>>, %arg3: memref<1x128xf32, #tpu.memory_space<vmem>>, %arg4: memref<1x128xf32, #tpu.memory_space<vmem>>, %arg5: memref<128x1xf32, #tpu.memory_space<vmem>>, %arg6: memref<128x128xbf16, #tpu.memory_space<vmem>>) attributes {dimension_semantics = [#tpu.dimension_semantics<parallel>], iteration_bounds = array<i64: 2>, scalar_prefetch = 0 : i64, scratch_operands = 0 : i64, tpu.core_type = #tpu.core_type<tc>, window_params = [{transform_indices = @transform_0, window_bounds = array<i64: 128, 128>}, {pipeline_mode = #tpu.pipeline_mode<synchronous>, transform_indices = @transform_1, window_bounds = array<i64: 128, 128>}, {pipeline_mode = #tpu.pipeline_mode<synchronous>, transform_indices = @transform_2, window_bounds = array<i64: 1, 128>}, {pipeline_mode = #tpu.pipeline_mode<synchronous>, transform_indices = @transform_3, window_bounds = array<i64: 1, 128>}, {transform_indices = @transform_4, window_bounds = array<i64: 128, 1>}, {transform_indices = @transform_5, window_bounds = array<i64: 128, 128>}]} {
    %c0 = arith.constant 0 : index
    %c0_0 = arith.constant 0 : index
    %0 = vector.load %arg1[%c0, %c0_0] : memref<128x128xbf16, #tpu.memory_space<vmem>>, vector<128x128xbf16>
    %c0_1 = arith.constant 0 : index
    %c0_2 = arith.constant 0 : index
    %1 = vector.load %arg2[%c0_1, %c0_2] : memref<128x128xbf16, #tpu.memory_space<vmem>>, vector<128x128xbf16>
    %cst = arith.constant dense<0.000000e+00> : vector<128x128xf32>
    %2 = tpu.matmul %0, %1, %cst {dimension_numbers = #tpu.dot_dimension_numbers<[1], [0], [0], [1], [0, 0, 1, 1], [], []>} : vector<128x128xbf16>, vector<128x128xbf16>, vector<128x128xf32> -> vector<128x128xf32>
    %c0_3 = arith.constant 0 : index
    %c0_4 = arith.constant 0 : index
    %3 = vector.load %arg3[%c0_3, %c0_4] : memref<1x128xf32, #tpu.memory_space<vmem>>, vector<1x128xf32>
    %4 = vector.broadcast %3 : vector<1x128xf32> to vector<128x128xf32>
    %5 = arith.mulf %2, %4 : vector<128x128xf32>
    %c0_5 = arith.constant 0 : index
    %c0_6 = arith.constant 0 : index
    %6 = vector.load %arg4[%c0_5, %c0_6] : memref<1x128xf32, #tpu.memory_space<vmem>>, vector<1x128xf32>
    %7 = vector.broadcast %6 : vector<1x128xf32> to vector<128x128xf32>
    %8 = arith.addf %5, %7 : vector<128x128xf32>
    %cst_7 = arith.constant 0.000000e+00 : f32
    %9 = vector.broadcast %cst_7 : f32 to vector<128x128xf32>
    %10 = arith.maximumf %8, %9 : vector<128x128xf32>
    %c0_8 = arith.constant 0 : index
    %c0_9 = arith.constant 0 : index
    %11 = vector.load %arg5[%c0_8, %c0_9] : memref<128x1xf32, #tpu.memory_space<vmem>>, vector<128x1xf32>
    %12 = vector.broadcast %11 : vector<128x1xf32> to vector<128x128xf32>
    %13 = arith.mulf %10, %12 : vector<128x128xf32>
    %14 = arith.truncf %13 : vector<128x128xf32> to vector<128x128xbf16>
    %c0_10 = arith.constant 0 : index
    %c0_11 = arith.constant 0 : index
    %15 = vector.load %arg6[%c0_10, %c0_11] : memref<128x128xbf16, #tpu.memory_space<vmem>>, vector<128x128xbf16>
    tpu.vector_store %arg6[%c0_10, %c0_11], %14 {strides = array<i32>} : memref<128x128xbf16, #tpu.memory_space<vmem>>, vector<128x128xbf16>,
    return
  }
  func.func @transform_0(%arg0: i32) -> (i32, i32) {
    %c0_i32 = arith.constant 0 : i32
    %c0_i32_0 = arith.constant 0 : i32
    return %arg0, %c0_i32 : i32, i32
  }
  func.func @transform_1(%arg0: i32) -> (i32, i32) {
    %c0_i32 = arith.constant 0 : i32
    %c0_i32_0 = arith.constant 0 : i32
    %c0_i32_1 = arith.constant 0 : i32
    return %c0_i32, %c0_i32_0 : i32, i32
  }
  func.func @transform_2(%arg0: i32) -> (i32, i32) {
    %c0_i32 = arith.constant 0 : i32
    %c0_i32_0 = arith.constant 0 : i32
    %c0_i32_1 = arith.constant 0 : i32
    return %c0_i32, %c0_i32_0 : i32, i32
  }
  func.func @transform_3(%arg0: i32) -> (i32, i32) {
    %c0_i32 = arith.constant 0 : i32
    %c0_i32_0 = arith.constant 0 : i32
    %c0_i32_1 = arith.constant 0 : i32
    return %c0_i32, %c0_i32_0 : i32, i32
  }
  func.func @transform_4(%arg0: i32) -> (i32, i32) {
    %c0_i32 = arith.constant 0 : i32
    %c0_i32_0 = arith.constant 0 : i32
    return %arg0, %c0_i32 : i32, i32
  }
  func.func @transform_5(%arg0: i32) -> (i32, i32) {
    %c0_i32 = arith.constant 0 : i32
    %c0_i32_0 = arith.constant 0 : i32
    return %arg0, %c0_i32 : i32, i32
  }
}

module attributes {stable_mosaic.version = 11 : i64} {
  func.func @_fc_head_kernel(%arg0: i32, %arg1: memref<8x128xf32, #tpu.memory_space<vmem>>, %arg2: memref<128x32xbf16, #tpu.memory_space<vmem>>, %arg3: memref<1x32xf32, #tpu.memory_space<vmem>>, %arg4: memref<32x5xbf16, #tpu.memory_space<vmem>>, %arg5: memref<1x5xf32, #tpu.memory_space<vmem>>, %arg6: memref<8x5xf32, #tpu.memory_space<vmem>>) attributes {dimension_semantics = [#tpu.dimension_semantics<parallel>], iteration_bounds = array<i64: 1>, scalar_prefetch = 0 : i64, scratch_operands = 0 : i64, tpu.core_type = #tpu.core_type<tc>, window_params = [{transform_indices = @transform_0, window_bounds = array<i64: 8, 128>}, {pipeline_mode = #tpu.pipeline_mode<synchronous>, transform_indices = @transform_1, window_bounds = array<i64: 128, 32>}, {pipeline_mode = #tpu.pipeline_mode<synchronous>, transform_indices = @transform_2, window_bounds = array<i64: 1, 32>}, {pipeline_mode = #tpu.pipeline_mode<synchronous>, transform_indices = @transform_3, window_bounds = array<i64: 32, 5>}, {pipeline_mode = #tpu.pipeline_mode<synchronous>, transform_indices = @transform_4, window_bounds = array<i64: 1, 5>}, {transform_indices = @transform_5, window_bounds = array<i64: 8, 5>}]} {
    %c0 = arith.constant 0 : index
    %c0_0 = arith.constant 0 : index
    %0 = vector.load %arg1[%c0, %c0_0] : memref<8x128xf32, #tpu.memory_space<vmem>>, vector<8x128xf32>
    %1 = arith.truncf %0 : vector<8x128xf32> to vector<8x128xbf16>
    %c0_1 = arith.constant 0 : index
    %c0_2 = arith.constant 0 : index
    %2 = vector.load %arg2[%c0_1, %c0_2] : memref<128x32xbf16, #tpu.memory_space<vmem>>, vector<128x32xbf16>
    %cst = arith.constant dense<0.000000e+00> : vector<8x32xf32>
    %3 = tpu.matmul %1, %2, %cst {dimension_numbers = #tpu.dot_dimension_numbers<[1], [0], [0], [1], [0, 0, 1, 1], [], []>} : vector<8x128xbf16>, vector<128x32xbf16>, vector<8x32xf32> -> vector<8x32xf32>
    %c0_3 = arith.constant 0 : index
    %c0_4 = arith.constant 0 : index
    %4 = vector.load %arg3[%c0_3, %c0_4] : memref<1x32xf32, #tpu.memory_space<vmem>>, vector<1x32xf32>
    %5 = vector.broadcast %4 : vector<1x32xf32> to vector<8x32xf32>
    %6 = arith.addf %3, %5 : vector<8x32xf32>
    %cst_5 = arith.constant 0.000000e+00 : f32
    %7 = vector.broadcast %cst_5 : f32 to vector<8x32xf32>
    %8 = arith.maximumf %6, %7 : vector<8x32xf32>
    %9 = arith.truncf %8 : vector<8x32xf32> to vector<8x32xbf16>
    %c0_6 = arith.constant 0 : index
    %c0_7 = arith.constant 0 : index
    %10 = vector.load %arg4[%c0_6, %c0_7] : memref<32x5xbf16, #tpu.memory_space<vmem>>, vector<32x5xbf16>
    %cst_8 = arith.constant dense<0.000000e+00> : vector<8x5xf32>
    %11 = tpu.matmul %9, %10, %cst_8 {dimension_numbers = #tpu.dot_dimension_numbers<[1], [0], [0], [1], [0, 0, 1, 1], [], []>} : vector<8x32xbf16>, vector<32x5xbf16>, vector<8x5xf32> -> vector<8x5xf32>
    %c0_9 = arith.constant 0 : index
    %c0_10 = arith.constant 0 : index
    %12 = vector.load %arg5[%c0_9, %c0_10] : memref<1x5xf32, #tpu.memory_space<vmem>>, vector<1x5xf32>
    %13 = vector.broadcast %12 : vector<1x5xf32> to vector<8x5xf32>
    %14 = arith.addf %11, %13 : vector<8x5xf32>
    %c0_11 = arith.constant 0 : index
    %c0_12 = arith.constant 0 : index
    %15 = vector.load %arg6[%c0_11, %c0_12] : memref<8x5xf32, #tpu.memory_space<vmem>>, vector<8x5xf32>
    tpu.vector_store %arg6[%c0_11, %c0_12], %14 {strides = array<i32>} : memref<8x5xf32, #tpu.memory_space<vmem>>, vector<8x5xf32>,
    return
  }
  func.func @transform_0(%arg0: i32) -> (i32, i32) {
    %c0_i32 = arith.constant 0 : i32
    %c0_i32_0 = arith.constant 0 : i32
    return %arg0, %c0_i32 : i32, i32
  }
  func.func @transform_1(%arg0: i32) -> (i32, i32) {
    %c0_i32 = arith.constant 0 : i32
    %c0_i32_0 = arith.constant 0 : i32
    %c0_i32_1 = arith.constant 0 : i32
    return %c0_i32, %c0_i32_0 : i32, i32
  }
  func.func @transform_2(%arg0: i32) -> (i32, i32) {
    %c0_i32 = arith.constant 0 : i32
    %c0_i32_0 = arith.constant 0 : i32
    %c0_i32_1 = arith.constant 0 : i32
    return %c0_i32, %c0_i32_0 : i32, i32
  }
  func.func @transform_3(%arg0: i32) -> (i32, i32) {
    %c0_i32 = arith.constant 0 : i32
    %c0_i32_0 = arith.constant 0 : i32
    %c0_i32_1 = arith.constant 0 : i32
    return %c0_i32, %c0_i32_0 : i32, i32
  }
  func.func @transform_4(%arg0: i32) -> (i32, i32) {
    %c0_i32 = arith.constant 0 : i32
    %c0_i32_0 = arith.constant 0 : i32
    %c0_i32_1 = arith.constant 0 : i32
    return %c0_i32, %c0_i32_0 : i32, i32
  }
  func.func @transform_5(%arg0: i32) -> (i32, i32) {
    %c0_i32 = arith.constant 0 : i32
    %c0_i32_0 = arith.constant 0 : i32
    return %arg0, %c0_i32 : i32, i32
  }
}

</mosaic_0001>

<bundles_post_ra>
// kernel: neg.2
= control target key start
LH: loop header
LB: loop body
LE: loop exit
PB: predicated region body
PF: predicated region fallthrough
CT: control target
= control target key end

     0   :  { %s520_s0 = inlined_call_operand.vmem [shape: f32[2,128,128], index: 0, kind: input, shape index: {}]   ;;  %s521_s1 = inlined_call_operand.vmem [shape: f32[2,128,128], index: 1, kind: output, shape index: {}]  }
   0x1   :  { %v2_v0 = vld [vmem:[%s520_s0] sm:$0xff]  ;;  %v258_v2 = vld [vmem:[%s520_s0 + $0x8] sm:$0xff]  ;;  %v262_v7 = vld [vmem:[%s520_s0 + $0x10] sm:$0xff] }
   0x2   :  { %v256_v1 = vld [vmem:[%s520_s0 + $0x80] sm:$0xff]  ;;  %v5_v3 = vxor.u32 2147483648, %v2_v0  ;;  %v20_v5 = vxor.u32 2147483648, %v258_v2  ;;  %v260_v6 = vld [vmem:[%s520_s0 + $0x88] sm:$0xff]  ;;  %v264_v8 = vld [vmem:[%s520_s0 + $0x90] sm:$0xff]  ;;  %v36_v11 = vxor.u32 2147483648, %v262_v7 }
   0x3   :  { %v12_v4 = vxor.u32 2147483648, %v256_v1  ;;  %v28_v9 = vxor.u32 2147483648, %v260_v6  ;;  %v266_v10 = vld [vmem:[%s520_s0 + $0x18] sm:$0xff]  ;;  %v44_v13 = vxor.u32 2147483648, %v264_v8  ;;  %v270_v14 = vld [vmem:[%s520_s0 + $0x20] sm:$0xff]  ;;  %v274_v18 = vld [vmem:[%s520_s0 + $0x28] sm:$0xff] }
   0x4   :  { %7 = vst [vmem:[%s521_s1] sm:$0xff] %v5_v3  ;;  %v268_v12 = vld [vmem:[%s520_s0 + $0x98] sm:$0xff]  ;;  %v52_v15 = vxor.u32 2147483648, %v266_v10  ;;  %v272_v16 = vld [vmem:[%s520_s0 + $0xa0] sm:$0xff]  ;;  %v68_v19 = vxor.u32 2147483648, %v270_v14  ;;  %v276_v20 = vld [vmem:[%s520_s0 + $0xa8] sm:$0xff]  ;;  %v84_v23 = vxor.u32 2147483648, %v274_v18 }
   0x5   :  { %257 = vst [vmem:[%s521_s1 + $0x80] sm:$0xff] %v12_v4  ;;  %v60_v17 = vxor.u32 2147483648, %v268_v12  ;;  %v76_v21 = vxor.u32 2147483648, %v272_v16  ;;  %v278_v22 = vld [vmem:[%s520_s0 + $0x30] sm:$0xff]  ;;  %v92_v25 = vxor.u32 2147483648, %v276_v20  ;;  %v282_v26 = vld [vmem:[%s520_s0 + $0x38] sm:$0xff] }
   0x6   :  { %259 = vst [vmem:[%s521_s1 + $0x8] sm:$0xff] %v20_v5  ;;  %v280_v24 = vld [vmem:[%s520_s0 + $0xb0] sm:$0xff]  ;;  %v100_v27 = vxor.u32 2147483648, %v278_v22  ;;  %v284_v28 = vld [vmem:[%s520_s0 + $0xb8] sm:$0xff]  ;;  %v286_v30 = vld [vmem:[%s520_s0 + $0x40] sm:$0xff]  ;;  %v116_v31 = vxor.u32 2147483648, %v282_v26 }
   0x7   :  { %261 = vst [vmem:[%s521_s1 + $0x88] sm:$0xff] %v28_v9  ;;  %v108_v29 = vxor.u32 2147483648, %v280_v24  ;;  %v288_v32 = vld [vmem:[%s520_s0 + $0xc0] sm:$0xff]  ;;  %v124_v33 = vxor.u32 2147483648, %v284_v28  ;;  %v290_v34 = vld [vmem:[%s520_s0 + $0x48] sm:$0xff]  ;;  %v132_v35 = vxor.u32 2147483648, %v286_v30 }
   0x8   :  { %263 = vst [vmem:[%s521_s1 + $0x10] sm:$0xff] %v36_v11  ;;  %v292_v36 = vld [vmem:[%s520_s0 + $0xc8] sm:$0xff]  ;;  %v140_v37 = vxor.u32 2147483648, %v288_v32  ;;  %v294_v38 = vld [vmem:[%s520_s0 + $0x50] sm:$0xff]  ;;  %v148_v39 = vxor.u32 2147483648, %v290_v34  ;;  %v298_v42 = vld [vmem:[%s520_s0 + $0x58] sm:$0xff] }
   0x9   :  { %265 = vst [vmem:[%s521_s1 + $0x90] sm:$0xff] %v44_v13  ;;  %v296_v40 = vld [vmem:[%s520_s0 + $0xd0] sm:$0xff]  ;;  %v156_v41 = vxor.u32 2147483648, %v292_v36  ;;  %v164_v43 = vxor.u32 2147483648, %v294_v38  ;;  %v300_v44 = vld [vmem:[%s520_s0 + $0xd8] sm:$0xff]  ;;  %v302_v46 = vld [vmem:[%s520_s0 + $0x60] sm:$0xff] }
   0xa   :  { %267 = vst [vmem:[%s521_s1 + $0x18] sm:$0xff] %v52_v15  ;;  %v172_v45 = vxor.u32 2147483648, %v296_v40  ;;  %v180_v47 = vxor.u32 2147483648, %v298_v42  ;;  %v304_v48 = vld [vmem:[%s520_s0 + $0xe0] sm:$0xff]  ;;  %v188_v49 = vxor.u32 2147483648, %v300_v44  ;;  %v306_v50 = vld [vmem:[%s520_s0 + $0x68] sm:$0xff] }
   0xb   :  { %269 = vst [vmem:[%s521_s1 + $0x98] sm:$0xff] %v60_v17  ;;  %v196_v51 = vxor.u32 2147483648, %v302_v46  ;;  %v308_v52 = vld [vmem:[%s520_s0 + $0xe8] sm:$0xff]  ;;  %v204_v53 = vxor.u32 2147483648, %v304_v48  ;;  %v310_v54 = vld [vmem:[%s520_s0 + $0x70] sm:$0xff]  ;;  %v212_v55 = vxor.u32 2147483648, %v306_v50 }
   0xc   :  { %271 = vst [vmem:[%s521_s1 + $0x20] sm:$0xff] %v68_v19  ;;  %v312_v56 = vld [vmem:[%s520_s0 + $0xf0] sm:$0xff]  ;;  %v220_v57 = vxor.u32 2147483648, %v308_v52  ;;  %v314_v58 = vld [vmem:[%s520_s0 + $0x78] sm:$0xff]  ;;  %v228_v59 = vxor.u32 2147483648, %v310_v54 }
   0xd   :  { %273 = vst [vmem:[%s521_s1 + $0xa0] sm:$0xff] %v76_v21  ;;  %v316_v60 = vld [vmem:[%s520_s0 + $0xf8] sm:$0xff]  ;;  %v236_v61 = vxor.u32 2147483648, %v312_v56  ;;  %v244_v62 = vxor.u32 2147483648, %v314_v58 }
   0xe   :  { %275 = vst [vmem:[%s521_s1 + $0x28] sm:$0xff] %v84_v23  ;;  %v252_v63 = vxor.u32 2147483648, %v316_v60 }
   0xf   :  { %277 = vst [vmem:[%s521_s1 + $0xa8] sm:$0xff] %v92_v25 }
  0x10   :  { %279 = vst [vmem:[%s521_s1 + $0x30] sm:$0xff] %v100_v27 }
  0x11   :  { %281 = vst [vmem:[%s521_s1 + $0xb0] sm:$0xff] %v108_v29 }
  0x12   :  { %283 = vst [vmem:[%s521_s1 + $0x38] sm:$0xff] %v116_v31 }
  0x13   :  { %285 = vst [vmem:[%s521_s1 + $0xb8] sm:$0xff] %v124_v33 }
  0x14   :  { %287 = vst [vmem:[%s521_s1 + $0x40] sm:$0xff] %v132_v35 }
  0x15   :  { %289 = vst [vmem:[%s521_s1 + $0xc0] sm:$0xff] %v140_v37 }
  0x16   :  { %291 = vst [vmem:[%s521_s1 + $0x48] sm:$0xff] %v148_v39 }
  0x17   :  { %293 = vst [vmem:[%s521_s1 + $0xc8] sm:$0xff] %v156_v41 }
  0x18   :  { %295 = vst [vmem:[%s521_s1 + $0x50] sm:$0xff] %v164_v43 }
  0x19   :  { %297 = vst [vmem:[%s521_s1 + $0xd0] sm:$0xff] %v172_v45 }
  0x1a   :  { %299 = vst [vmem:[%s521_s1 + $0x58] sm:$0xff] %v180_v47 }
  0x1b   :  { %301 = vst [vmem:[%s521_s1 + $0xd8] sm:$0xff] %v188_v49 }
  0x1c   :  { %303 = vst [vmem:[%s521_s1 + $0x60] sm:$0xff] %v196_v51 }
  0x1d   :  { %305 = vst [vmem:[%s521_s1 + $0xe0] sm:$0xff] %v204_v53 }
  0x1e   :  { %307 = vst [vmem:[%s521_s1 + $0x68] sm:$0xff] %v212_v55 }
  0x1f   :  { %309 = vst [vmem:[%s521_s1 + $0xe8] sm:$0xff] %v220_v57 }
  0x20   :  { %311 = vst [vmem:[%s521_s1 + $0x70] sm:$0xff] %v228_v59 }
  0x21   :  { %313 = vst [vmem:[%s521_s1 + $0xf0] sm:$0xff] %v236_v61 }
  0x22   :  { %315 = vst [vmem:[%s521_s1 + $0x78] sm:$0xff] %v244_v62 }
  0x23   :  { %317 = vst [vmem:[%s521_s1 + $0xf8] sm:$0xff] %v252_v63 }

// kernel: particlenet_forward.7
= control target key start
LH: loop header
LB: loop body
LE: loop exit
PB: predicated region body
PF: predicated region fallthrough
CT: control target
= control target key end

     0   :  { %s3817_s21 = smov 0   ;;  %s5306_s0 = inlined_call_operand.vmem [shape: bf16[2,128,128], index: 0, kind: input, shape index: {}]   ;;  %s5307_s1 = inlined_call_operand.vmem [shape: s32[2,128,4], index: 1, kind: input, shape index: {}]   ;;  %s5308_s2 = inlined_call_operand.vmem [shape: f32[2,128,1], index: 2, kind: input, shape index: {}]   ;;  %s5309_s3 = inlined_call_operand.vmem [shape: bf16[128,128], index: 3, kind: input, shape index: {}]   ;;  %s5310_s4 = inlined_call_operand.vmem [shape: bf16[128,128], index: 4, kind: input, shape index: {}]   ;;  %s5311_s5 = inlined_call_operand.vmem [shape: f32[1,128], index: 5, kind: input, shape index: {}]   ;;  %s5312_s6 = inlined_call_operand.vmem [shape: f32[1,128], index: 6, kind: input, shape index: {}]   ;;  %s5313_s7 = inlined_call_operand.vmem [shape: bf16[128,128], index: 7, kind: input, shape index: {}]   ;;  %s5314_s8 = inlined_call_operand.vmem [shape: f32[1,128], index: 8, kind: input, shape index: {}]   ;;  %s5315_s9 = inlined_call_operand.vmem [shape: f32[1,128], index: 9, kind: input, shape index: {}]   ;;  %s5316_s10 = inlined_call_operand.vmem [shape: bf16[128,128], index: 10, kind: input, shape index: {}]   ;;  %s5317_s11 = inlined_call_operand.vmem [shape: f32[1,128], index: 11, kind: input, shape index: {}]   ;;  %s5318_s12 = inlined_call_operand.vmem [shape: f32[1,128], index: 12, kind: input, shape index: {}]   ;;  %s5319_s13 = inlined_call_operand.vmem [shape: bf16[128,128], index: 13, kind: input, shape index: {}]   ;;  %s5320_s14 = inlined_call_operand.vmem [shape: f32[1,128], index: 14, kind: input, shape index: {}]   ;;  %s5321_s15 = inlined_call_operand.vmem [shape: f32[1,128], index: 15, kind: input, shape index: {}]   ;;  %s5322_s16 = inlined_call_operand.vmem [shape: bf16[2,128,128], index: 16, kind: output, shape index: {}]  }
   0x1   :  { %5323 = sst [smem:[#allocation7_spill]] %s5306_s0 }
   0x2 LB: > { %s3279_s22 = sadd.s32 4294967295, %s3725_s21   ;;  %p3283_p0 = scmp.ge.s32.totalorder %s3725_s21, 1  ;;  %s3725_s21 = sphi %s3817_s21, %s26_s21  }
   0x3   : > { %p482_p1 = scmp.lt.s32.totalorder %s3725_s21, 3 }
   0x5   : > { %p483_p2 = pnand %p3283_p0, %p482_p1 }
   0x7   : > { %486 = sbr.rel (%p483_p2) target bundleno = 1128 (0x468), region = 84 }
   0xc   : > { %v3569_v0 = vld [vmem:[%s5319_s13 + $0x38] sm:$0xff]  ;;  %p542_p3 = scmp.lt.s32.totalorder %s3279_s22, 1  ;;  %v3727_v1 = vmov 0   ;;  %v3728_v2 = vmov 1   ;;  %v3568_v3 = vld [vmem:[%s5319_s13 + $0x30] sm:$0xff]  ;;  %s5324_s19 = sld [smem:[#allocation7_spill]]  ;;  %v974_v43 = vlaneseq }
   0xd   : > { %3678 = vset.pattern.permute.xlu0 %v3727_v1  ;;  %3679 = vset.pattern.permute.xlu1 %v3728_v2  ;;  %v3567_v5 = vld [vmem:[%s5319_s13 + $0x28] sm:$0xff]  ;;  %v3566_v8 = vld [vmem:[%s5319_s13 + $0x20] sm:$0xff]  ;;  %v3565_v10 = vld [vmem:[%s5319_s13 + $0x18] sm:$0xff]  ;;  %v3729_v33 = vmov 2   ;;  %v3730_v52 = vmov 1.0|1.0  }
   0xe   : > { %738 = vmatpush.bf16.msra.mxu0 %v3569_v0  ;;  %s5342_s22 = smov (!%p542_p3, %s3279_s22), 1  ;;  %3680 = vset.pattern.permute.xlu2 %v3727_v1  ;;  %v3564_v13 = vld [vmem:[%s5319_s13 + $0x10] sm:$0xff]  ;;  %v3563_v15 = vld [vmem:[%s5319_s13 + $0x8] sm:$0xff]  ;;  %v3562_v16 = vld [vmem:[%s5319_s13] sm:$0xff]  ;;  %v4056_v47 = vand.u32 127, %v974_v43  ;;  %v3731_v56 = vmov 3  }
   0xf   : > { %s3551_s27 = sshll.u32 %s5342_s22, 7  ;;  %s3550_s28 = sshll.u32 %s5342_s22, 6  ;;  %v3577_v35 = vld [vmem:[%s5309_s3 + $0x38] sm:$0xff]  ;;  %v3576_v36 = vld [vmem:[%s5309_s3 + $0x30] sm:$0xff]  ;;  %v3575_v37 = vld [vmem:[%s5309_s3 + $0x28] sm:$0xff] }
  0x10   : > { %s3843_s0 = scalar_lea.vmem %s5307_s1, %s3551_s27  ;;  %925 = vmatpush.bf16.msra.mxu1 %v3577_v35  ;;  %v3574_v39 = vld [vmem:[%s5309_s3 + $0x20] sm:$0xff]  ;;  %v3573_v40 = vld [vmem:[%s5309_s3 + $0x18] sm:$0xff]  ;;  %v3572_v41 = vld [vmem:[%s5309_s3 + $0x10] sm:$0xff]  ;;  %s5015_s26 = scalar_lea.vmem %s5308_s2, %s3551_s27 }
  0x11   : > { %v3846_v4 = vld [vmem:[%s3843_s0] sm:$0xff]  ;;  %v3864_v7 = vld [vmem:[%s3843_s0 + $0x10] sm:$0xff]  ;;  %v3872_v9 = vld [vmem:[%s3843_s0 + $0x8] sm:$0xff]  ;;  %s5218_s23 = scalar_lea.vmem %s5322_s16, %s3550_s28 }
  0x12   : > { %739 = vmatpush.bf16.msra.mxu0 %v3568_v3  ;;  %s3853_s20 = scalar_lea.vmem %s5324_s19, %s3550_s28  ;;  %977 = vperm.xlu0 %3678, %v3846_v4   ;;  %v3880_v11 = vld [vmem:[%s3843_s0 + $0x18] sm:$0xff]  ;;  %v3891_v14 = vld [vmem:[%s3843_s0 + $0x20] sm:$0xff]  ;;  %v3907_v18 = vld [vmem:[%s3843_s0 + $0x28] sm:$0xff] }
  0x13   : > { %1289 = vperm.xlu1 %3679, %v3846_v4   ;;  %v3861_v6 = vld [vmem:[%s3853_s20 + $0x38] sm:$0xff]  ;;  %983 = vperm.xlu2 %3680, %v3864_v7   ;;  %v3884_v12 = vld [vmem:[%s3853_s20 + $0x30] sm:$0xff]  ;;  %v3904_v17 = vld [vmem:[%s3853_s20] sm:$0xff] }
  0x14   : > { %1064 = vmatpush.bf16.msra.mxu2 %v3861_v6  ;;  %v3915_v19 = vld [vmem:[%s3853_s20 + $0x28] sm:$0xff]  ;;  %v3922_v20 = vld [vmem:[%s3843_s0 + $0x30] sm:$0xff]  ;;  %v3928_v21 = vld [vmem:[%s3843_s0 + $0x38] sm:$0xff]  ;;  %926 = vmatpush.bf16.msra.mxu1 %v3576_v36 }
  0x15   : > { %v3933_v22 = vld [vmem:[%s3853_s20 + $0x8] sm:$0xff]  ;;  %v3943_v24 = vld [vmem:[%s3853_s20 + $0x20] sm:$0xff]  ;;  %v3953_v26 = vld [vmem:[%s3853_s20 + $0x18] sm:$0xff] }
  0x16   : > { %740 = vmatpush.bf16.msra.mxu0 %v3567_v5  ;;  %v3936_v23 = vld [vmem:[%s3843_s0 + $0x48] sm:$0xff]  ;;  %v3946_v25 = vld [vmem:[%s3843_s0 + $0x40] sm:$0xff]  ;;  %v3959_v27 = vld [vmem:[%s3853_s20 + $0x10] sm:$0xff] }
  0x17   : > { %v3962_v28 = vld [vmem:[%s3843_s0 + $0x50] sm:$0xff]  ;;  %v3975_v29 = vld [vmem:[%s3843_s0 + $0x68] sm:$0xff]  ;;  %v3980_v30 = vld [vmem:[%s3843_s0 + $0x58] sm:$0xff] }
  0x18   : > { %1065 = vmatpush.bf16.msra.mxu2 %v3884_v12  ;;  %v3991_v31 = vld [vmem:[%s3843_s0 + $0x70] sm:$0xff]  ;;  %v4000_v32 = vld [vmem:[%s3843_s0 + $0x60] sm:$0xff]  ;;  %v4019_v34 = vld [vmem:[%s3843_s0 + $0x78] sm:$0xff]  ;;  %927 = vmatpush.bf16.msra.mxu1 %v3575_v37 }
  0x19   : > { %v3571_v44 = vld [vmem:[%s5309_s3 + $0x8] sm:$0xff]  ;;  %v3570_v48 = vld [vmem:[%s5309_s3] sm:$0xff]  ;;  %v4078_v55 = vld [vmem:[%s5310_s4 + $0x38] sm:$0xff] }
  0x1a   : > { %741 = vmatpush.bf16.msra.mxu0 %v3566_v8  ;;  %980 = vperm.xlu0 %3678, %v3872_v9   ;;  %v4098_v62 = vld [vmem:[%s5310_s4 + $0x30] sm:$0xff] }
  0x1b   : > { %1292 = vperm.xlu1 %3679, %v3872_v9   ;;  %986 = vperm.xlu2 %3680, %v3880_v11  }
  0x1c   : > { %1066 = vmatpush.bf16.msra.mxu2 %v3915_v19  ;;  %928 = vmatpush.bf16.msra.mxu1 %v3574_v39 }
  0x1d   : > { %1185 = vmatpush.bf16.msra.mxu3 %v4078_v55 }
  0x1e   : > { %742 = vmatpush.bf16.msra.mxu0 %v3565_v10 }
  0x20   : > { %1067 = vmatpush.bf16.msra.mxu2 %v3943_v24  ;;  %929 = vmatpush.bf16.msra.mxu1 %v3573_v40 }
  0x21   : > { %1186 = vmatpush.bf16.msra.mxu3 %v4098_v62 }
  0x22   : > { %743 = vmatpush.bf16.msra.mxu0 %v3564_v13  ;;  %3681 = vset.pattern.permute.xlu0 %v3728_v2 }
  0x23   : > { %1298 = vperm.xlu1 %3679, %v3880_v11   ;;  %1295 = vperm.xlu0 %3681, %v3864_v7  }
  0x24   : > { %989 = vperm.xlu2 %3680, %v3891_v14   ;;  %1068 = vmatpush.bf16.msra.mxu2 %v3953_v26 }
  0x25   : > { %930 = vmatpush.bf16.msra.mxu1 %v3572_v41 }
  0x26   : > { %744 = vmatpush.bf16.msra.mxu0 %v3563_v15 }
  0x28   : > { %1069 = vmatpush.bf16.msra.mxu2 %v3959_v27 }
  0x29   : > { %931 = vmatpush.bf16.msra.mxu1 %v3571_v44  ;;  %v3579_v44 = vld [vmem:[%s5310_s4 + $0x8] sm:$0xff] }
  0x2a   : > { %745 = vmatpush.bf16.msra.mxu0 %v3562_v16 }
  0x2b   : > { %3682 = vset.pattern.permute.xlu1 %v3727_v1  ;;  %1304 = vperm.xlu0 %3681, %v3907_v18  }
  0x2c   : > { %992 = vperm.xlu1 %3682, %v3907_v18   ;;  %3683 = vset.pattern.permute.xlu2 %v3728_v2 }
  0x2d   : > { %746 = vmatmul.bf16.vlgmr.msra.gmra.mxu0 %v3904_v17  ;;  %1301 = vperm.xlu2 %3683, %v3891_v14  }
  0x2e   : > { %1376 = vmatpush.bf16.msrb.mxu0 %v3861_v6  ;;  %1070 = vmatpush.bf16.msra.mxu2 %v3933_v22 }
  0x2f   : > { %932 = vmatpush.bf16.msra.mxu1 %v3570_v48 }
  0x32   : > { %1377 = vmatpush.bf16.msrb.mxu0 %v3884_v12  ;;  %1071 = vmatpush.bf16.msra.mxu2 %v3904_v17 }
  0x33   : > { %1307 = vperm.xlu0 %3681, %v3922_v20   ;;  %933 = vmatmul.bf16.vlgmr.msra.gmra.mxu1 %v3904_v17 }
  0x34   : > { %995 = vperm.xlu1 %3682, %v3922_v20   ;;  %1449 = vmatpush.bf16.msrb.mxu1 %v4078_v55 }
  0x35   : > { %3684 = vset.pattern.permute.xlu2 %v3727_v1 }
  0x36   : > { %1378 = vmatpush.bf16.msrb.mxu0 %v3915_v19  ;;  %998 = vperm.xlu2 %3684, %v3928_v21  }
  0x37   : > { %1634 = vmatpush.bf16.msrb.mxu2 %v3861_v6 }
  0x38   : > { %1450 = vmatpush.bf16.msrb.mxu1 %v4098_v62 }
  0x3a   : > { %1379 = vmatpush.bf16.msrb.mxu0 %v3943_v24 }
  0x3b   : > { %3686 = vset.pattern.permute.xlu0 %v3727_v1  ;;  %1635 = vmatpush.bf16.msrb.mxu2 %v3884_v12 }
  0x3c   : > { %3685 = vset.pattern.permute.xlu1 %v3728_v2  ;;  %1004 = vperm.xlu0 %3686, %v3936_v23  }
  0x3d   : > { %751 = vmatmul.bf16.gmra.mxu0 %v3933_v22  ;;  %1310 = vperm.xlu1 %3685, %v3928_v21  }
  0x3e   : > { %1001 = vperm.xlu2 %3684, %v3946_v25   ;;  %1380 = vmatpush.bf16.msrb.mxu0 %v3953_v26 }
  0x3f   : > { %1636 = vmatpush.bf16.msrb.mxu2 %v3915_v19 }
  0x42   : > { %1381 = vmatpush.bf16.msrb.mxu0 %v3959_v27 }
  0x43   : > { %1637 = vmatpush.bf16.msrb.mxu2 %v3943_v24  ;;  %938 = vmatmul.bf16.gmra.mxu1 %v3933_v22 }
  0x44   : > { %3690 = vset.pattern.permute.xlu0 %v3728_v2 }
  0x45   : > { %1313 = vperm.xlu1 %3685, %v3946_v25   ;;  %1319 = vperm.xlu0 %3690, %v3962_v28  }
  0x46   : > { %3687 = vset.pattern.permute.xlu2 %v3728_v2  ;;  %1382 = vmatpush.bf16.msrb.mxu0 %v3933_v22 }
  0x47   : > { %1316 = vperm.xlu2 %3687, %v3936_v23   ;;  %1638 = vmatpush.bf16.msrb.mxu2 %v3953_v26 }
  0x4a   : > { %1383 = vmatpush.bf16.msrb.mxu0 %v3904_v17 }
  0x4b   : > { %1639 = vmatpush.bf16.msrb.mxu2 %v3959_v27 }
  0x4d   : > { %756 = vmatmul.bf16.gmra.mxu0 %v3959_v27  ;;  %3688 = vset.pattern.permute.xlu1 %v3727_v1 }
  0x4e   : > { %1007 = vperm.xlu1 %3688, %v3962_v28   ;;  %1328 = vperm.xlu0 %3690, %v3975_v29  }
  0x4f   : > { %3689 = vset.pattern.permute.xlu2 %v3727_v1  ;;  %1892 = vmatpush.bf16.msra.mxu0 %v3861_v6 }
  0x50   : > { %1010 = vperm.xlu2 %3689, %v3980_v30   ;;  %1640 = vmatpush.bf16.msrb.mxu2 %v3933_v22 }
  0x53   : > { %1893 = vmatpush.bf16.msra.mxu0 %v3884_v12  ;;  %943 = vmatmul.bf16.gmra.mxu1 %v3959_v27 }
  0x54   : > { %1641 = vmatpush.bf16.msrb.mxu2 %v3904_v17 }
  0x56   : > { %3691 = vset.pattern.permute.xlu1 %v3728_v2  ;;  %1331 = vperm.xlu0 %3690, %v3991_v31  }
  0x57   : > { %1322 = vperm.xlu1 %3691, %v3980_v30   ;;  %1894 = vmatpush.bf16.msra.mxu0 %v3915_v19 }
  0x58   : > { %1013 = vperm.xlu2 %3689, %v4000_v32  }
  0x5b   : > { %1895 = vmatpush.bf16.msra.mxu0 %v3943_v24 }
  0x5d   : > { %761 = vmatmul.bf16.gmra.mxu0 %v3953_v26 }
  0x5e   : > { %3697 = vset.pattern.permute.xlu0 %v3729_v33 }
  0x5f   : > { %3692 = vset.pattern.permute.xlu1 %v3727_v1  ;;  %1896 = vmatpush.bf16.msra.mxu0 %v3953_v26 }
  0x60   : > { %1016 = vperm.xlu1 %3692, %v3975_v29   ;;  %3693 = vset.pattern.permute.xlu2 %v3728_v2 }
  0x61   : > { %1325 = vperm.xlu2 %3693, %v4000_v32   ;;  %1550 = vperm.xlu0 %3697, %v3872_v9  }
  0x63   : > { %1897 = vmatpush.bf16.msra.mxu0 %v3959_v27  ;;  %948 = vmatmul.bf16.gmra.mxu1 %v3953_v26 }
  0x67   : > { %1898 = vmatpush.bf16.msra.mxu0 %v3933_v22 }
  0x68   : > { %1019 = vperm.xlu1 %3692, %v3991_v31  }
  0x69   : > { %3694 = vset.pattern.permute.xlu2 %v3727_v1  ;;  %1565 = vperm.xlu0 %3697, %v3922_v20  }
  0x6a   : > { %1022 = vperm.xlu2 %3694, %v4019_v34  }
  0x6b   : > { %1899 = vmatpush.bf16.msra.mxu0 %v3904_v17 }
  0x6d   : > { %766 = vmatmul.bf16.gmra.mxu0 %v3943_v24  ;;  %v984_v38 = vpop.permute.xlu2 %983 }
  0x6e   : > { %vm1026_vm3 = vcmp.eq.s32.totalorder %v4056_v47, %v984_v38 }
  0x70   : > { %3695 = vset.pattern.permute.xlu1 %v3728_v2 }
  0x71   : > { %1334 = vperm.xlu1 %3695, %v4019_v34   ;;  %1574 = vperm.xlu0 %3697, %v3936_v23  }
  0x72   : > { %3696 = vset.pattern.permute.xlu2 %v3729_v33 }
  0x73   : > { %1547 = vperm.xlu2 %3696, %v3846_v4   ;;  %953 = vmatmul.bf16.gmra.mxu1 %v3943_v24 }
  0x75   : > { %v987_v42 = vpop.permute.xlu2 %986 }
  0x76   : > { %vm1027_vm4 = vcmp.eq.s32.totalorder %v4056_v47, %v987_v42 }
  0x77   : > { %vm3390_vm5 = vmpackc.low %vm1027_vm4, %vm1026_vm3 }
  0x79   : > { %3698 = vset.pattern.permute.xlu1 %v3729_v33  ;;  %1583 = vperm.xlu0 %3697, %v4000_v32  }
  0x7a   : > { %1553 = vperm.xlu1 %3698, %v3864_v7  }
  0x7b   : > { %1556 = vperm.xlu2 %3696, %v3880_v11  }
  0x7d   : > { %771 = vmatmul.bf16.gmra.mxu0 %v3915_v19 }
  0x7e   : > { %v990_v49 = vpop.permute.xlu2 %989 }
  0x7f   : > { %vm1028_vm9 = vcmp.eq.s32.totalorder %v4056_v47, %v990_v49 }
  0x81   : > { %1592 = vperm.xlu0 %3697, %v4019_v34  }
  0x82   : > { %1559 = vperm.xlu1 %3698, %v3891_v14  }
  0x83   : > { %1562 = vperm.xlu2 %3696, %v3907_v18   ;;  %958 = vmatmul.bf16.gmra.mxu1 %v3915_v19 }
  0x84   : > { %v978_v45 = vpop.permute.xlu0 %977 }
  0x85   : > { %v1290_v46 = vpop.permute.xlu1 %1289  ;;  %vm1024_vm0 = vcmp.eq.s32.totalorder %v4056_v47, %v978_v45  ;;  %v3578_v45 = vld [vmem:[%s5310_s4] sm:$0xff] }
  0x86   : > { %vm1336_vm6 = vcmp.eq.s32.totalorder %v4056_v47, %v1290_v46 }
  0x87   : > { %v4073_v54 = vpop.permute.xlu2 %1301 }
  0x88   : > { %vm1340_vm3 = vcmp.eq.s32.totalorder %v4056_v47, %v4073_v54 }
  0x89   : > { %3701 = vset.pattern.permute.xlu0 %v3731_v56 }
  0x8a   : > { %1568 = vperm.xlu1 %3698, %v3928_v21   ;;  %1811 = vperm.xlu0 %3701, %v3864_v7  }
  0x8b   : > { %1571 = vperm.xlu2 %3696, %v3946_v25  }
  0x8c   : > { %v981_v50 = vpop.permute.xlu0 %980 }
  0x8d   : > { %776 = vmatmul.bf16.gmra.mxu0 %v3884_v12  ;;  %v1293_v51 = vpop.permute.xlu1 %1292  ;;  %vm1025_vm1 = vcmp.eq.s32.totalorder %v4056_v47, %v981_v50  ;;  %v3589_v50 = vld [vmem:[%s5313_s7 + $0x18] sm:$0xff] }
  0x8e   : > { %vm3388_vm2 = vmpackc.low %vm1025_vm1, %vm1024_vm0  ;;  %vm1337_vm7 = vcmp.eq.s32.totalorder %v4056_v47, %v1293_v51 }
  0x8f   : > { %3389 = vmatmul.msk.bf16.vlgmr.msra.gmra.mxu2 %vm3388_vm2, %v3730_v52  ;;  %vm3436_vm8 = vmpackc.low %vm1337_vm7, %vm1336_vm6 }
  0x90   : > { %v999_v57 = vpop.permute.xlu2 %998 }
  0x91   : > { %vm1031_vm15 = vcmp.eq.s32.totalorder %v4056_v47, %v999_v57 }
  0x92   : > { %1577 = vperm.xlu1 %3698, %v3962_v28   ;;  %1826 = vperm.xlu0 %3701, %v3928_v21  }
  0x93   : > { %1580 = vperm.xlu2 %3696, %v3980_v30   ;;  %963 = vmatmul.bf16.gmra.mxu1 %v3884_v12 }
  0x95   : > { %v4071_v53 = vpop.permute.xlu1 %1298  ;;  %v1296_v59 = vpop.permute.xlu0 %1295 }
  0x96   : > { %vm1339_vm12 = vcmp.eq.s32.totalorder %v4056_v47, %v4071_v53  ;;  %vm1338_vm13 = vcmp.eq.s32.totalorder %v4056_v47, %v1296_v59 }
  0x97   : > { %vm3438_vm0 = vmpackc.low %vm1339_vm12, %vm1338_vm13 }
  0x98   : > { %v4093_v61 = vpop.permute.xlu2 %1001 }
  0x99   : > { %vm1032_vm4 = vcmp.eq.s32.totalorder %v4056_v47, %v4093_v61 }
  0x9a   : > { %1586 = vperm.xlu1 %3698, %v3975_v29   ;;  %1835 = vperm.xlu0 %3701, %v3962_v28  }
  0x9b   : > { %1589 = vperm.xlu2 %3696, %v3991_v31  }
  0x9d   : > { %781 = vmatmul.bf16.gmra.mxu0 %v3861_v6  ;;  %v1305_v0 = vpop.permute.xlu0 %1304 }
  0x9e   : > { %v993_v58 = vpop.permute.xlu1 %992  ;;  %vm1341_vm2 = vcmp.eq.s32.totalorder %v4056_v47, %v1305_v0 }
  0x9f   : > { %3391 = vmatmul.msk.bf16.gmra.mxu2 %vm3390_vm5, %v3730_v52  ;;  %vm1029_vm10 = vcmp.eq.s32.totalorder %v4056_v47, %v993_v58  ;;  %vm3440_vm6 = vmpackc.low %vm1341_vm2, %vm1340_vm3  ;;  %v562_v58 = vld [vmem:[%s3853_s20] sm:$0xff]  }
  0xa0   : > { %vm3392_vm11 = vmpackc.low %vm1029_vm10, %vm1028_vm9  ;;  %v4314_v61 = vunpack.c.l.bf16 %v562_v58 }
  0xa1   : > { %v4114_v3 = vpop.permute.xlu2 %1316 }
  0xa2   : > { %3699 = vset.pattern.permute.xlu1 %v3731_v56  ;;  %1844 = vperm.xlu0 %3701, %v3975_v29   ;;  %v4190_v29 = vld [vmem:[%s5310_s4 + $0x18] sm:$0xff] }
  0xa3   : > { %1805 = vperm.xlu1 %3699, %v3846_v4   ;;  %3700 = vset.pattern.permute.xlu2 %v3731_v56  ;;  %v3592_v56 = vld [vmem:[%s5313_s7 + $0x30] sm:$0xff] }
  0xa4   : > { %1808 = vperm.xlu2 %3700, %v3872_v9   ;;  %v4128_v9 = vld [vmem:[%s5310_s4 + $0x28] sm:$0xff]  ;;  %968 = vmatmul.bf16.gmra.mxu1 %v3861_v6  ;;  %v3593_v6 = vld [vmem:[%s5313_s7 + $0x38] sm:$0xff] }
  0xa5   : > { %v1308_v5 = vpop.permute.xlu0 %1307  ;;  %1451 = vmatpush.bf16.msrb.mxu1 %v4128_v9  ;;  %1187 = vmatpush.bf16.msra.mxu3 %v4128_v9 }
  0xa6   : > { %v996_v60 = vpop.permute.xlu1 %995  ;;  %vm1342_vm9 = vcmp.eq.s32.totalorder %v4056_v47, %v1308_v5  ;;  %3649 = vmatpush.bf16.msra.mxu2 %v3593_v6 }
  0xa7   : > { %vm1030_vm14 = vcmp.eq.s32.totalorder %v4056_v47, %v996_v60 }
  0xa8   : > { %vm3394_vm1 = vmpackc.low %vm1031_vm15, %vm1030_vm14  ;;  %vm1345_vm14 = vcmp.eq.s32.totalorder %v4056_v47, %v4114_v3 }
  0xaa   : > { %v4105_v63 = vpop.f32.mrf.mxu0  ;;  %v1011_v8 = vpop.permute.xlu2 %1010  ;;  %3702 = vset.pattern.permute.xlu0 %v3727_v1  ;;  %3650 = vmatpush.bf16.msra.mxu2 %v3592_v56 }
  0xab   : > { %1814 = vperm.xlu1 %3699, %v3880_v11   ;;  %vm1035_vm10 = vcmp.eq.s32.totalorder %v4056_v47, %v1011_v8 }
  0xac   : > { %1817 = vperm.xlu2 %3700, %v3891_v14  }
  0xad   : > { %3437 = vmatmul.msk.bf16.vlgmr.msrb.gmra.mxu0 %vm3436_vm8, %v3730_v52 }
  0xae   : > { %v1005_v11 = vpop.permute.xlu0 %1004  ;;  %2158 = vmatpush.bf16.msrb.mxu0 %v3593_v6 }
  0xaf   : > { %v4112_v2 = vpop.permute.xlu1 %1310  ;;  %3393 = vmatmul.msk.bf16.gmra.mxu2 %vm3392_vm11, %v3730_v52  ;;  %vm1033_vm5 = vcmp.eq.s32.totalorder %v4056_v47, %v1005_v11  ;;  %v564_v11 = vld [vmem:[%s3853_s20 + $0x8] sm:$0xff]  }
  0xb0   : > { %vm3396_vm7 = vmpackc.low %vm1033_vm5, %vm1032_vm4  ;;  %vm1343_vm8 = vcmp.eq.s32.totalorder %v4056_v47, %v4112_v2  ;;  %v4312_v60 = vpop.f32.mrf.mxu1 }
  0xb1   : > { %vm3442_vm12 = vmpackc.low %vm1343_vm8, %vm1342_vm9 }
  0xb2   : > { %v4119_v4 = vpop.f32.mrf.mxu0  ;;  %v4143_v13 = vpop.permute.xlu2 %1013  ;;  %2159 = vmatpush.bf16.msrb.mxu0 %v3592_v56 }
  0xb3   : > { %1820 = vperm.xlu1 %3699, %v3907_v18   ;;  %v4158_v18 = vld [vmem:[%s5310_s4 + $0x20] sm:$0xff] }
  0xb4   : > { %1823 = vperm.xlu2 %3700, %v3922_v20   ;;  %1452 = vmatpush.bf16.msrb.mxu1 %v4158_v18 }
  0xb5   : > { %1188 = vmatpush.bf16.msra.mxu3 %v4158_v18 }
  0xb7   : > { %v4123_v7 = vpop.permute.xlu1 %1313  ;;  %v4151_v16 = vpop.permute.xlu0 %1319 }
  0xb8   : > { %1453 = vmatpush.bf16.msrb.mxu1 %v4190_v29  ;;  %vm1344_vm15 = vcmp.eq.s32.totalorder %v4056_v47, %v4123_v7  ;;  %vm1346_vm5 = vcmp.eq.s32.totalorder %v4056_v47, %v4151_v16  ;;  %v4331_v8 = vpop.f32.mrf.mxu1 }
  0xb9   : > { %1189 = vmatpush.bf16.msra.mxu3 %v4190_v29  ;;  %vm3444_vm2 = vmpackc.low %vm1345_vm14, %vm1344_vm15 }
  0xba   : > { %v4137_v10 = vpop.f32.mrf.mxu0 }
  0xbb   : > { %1829 = vperm.xlu1 %3699, %v3946_v25   ;;  %v4153_v17 = vpop.permute.xlu2 %1325 }
  0xbc   : > { %1832 = vperm.xlu2 %3700, %v3936_v23  }
  0xbd   : > { %3439 = vmatmul.msk.bf16.gmra.mxu0 %vm3438_vm0, %v3730_v52  ;;  %vm1036_vm0 = vcmp.eq.s32.totalorder %v4056_v47, %v4143_v13 }
  0xbf   : > { %3395 = vmatmul.msk.bf16.gmra.mxu2 %vm3394_vm1, %v3730_v52 }
  0xc0   : > { %v1008_v14 = vpop.permute.xlu1 %1007  ;;  %v4175_v22 = vpop.permute.xlu0 %1328 }
  0xc1   : > { %vm1034_vm11 = vcmp.eq.s32.totalorder %v4056_v47, %v1008_v14 }
  0xc2   : > { %v4147_v15 = vpop.f32.mrf.mxu0  ;;  %vm3398_vm13 = vmpackc.low %vm1035_vm10, %vm1034_vm11 }
  0xc3   : > { %1838 = vperm.xlu1 %3699, %v3980_v30  }
  0xc4   : > { %1841 = vperm.xlu2 %3700, %v4000_v32   ;;  %v1023_v23 = vpop.permute.xlu2 %1022 }
  0xc8   : > { %v4183_v27 = vpop.permute.xlu0 %1331 }
  0xc9   : > { %v4163_v20 = vpop.permute.xlu1 %1322 }
  0xca   : > { %v4169_v21 = vpop.f32.mrf.mxu0  ;;  %vm1347_vm4 = vcmp.eq.s32.totalorder %v4056_v47, %v4163_v20  ;;  %v4343_v20 = vpop.f32.mrf.mxu1 }
  0xcb   : > { %1847 = vperm.xlu1 %3699, %v3991_v31   ;;  %vm3446_vm8 = vmpackc.low %vm1347_vm4, %vm1346_vm5 }
  0xcc   : > { %1850 = vperm.xlu2 %3700, %v4019_v34  }
  0xcd   : > { %3441 = vmatmul.msk.bf16.gmra.mxu0 %vm3440_vm6, %v3730_v52  ;;  %v4185_v28 = vpop.permute.xlu2 %1547  ;;  %vm1039_vm6 = vcmp.eq.s32.totalorder %v4056_v47, %v1023_v23 }
  0xcf   : > { %3397 = vmatmul.msk.bf16.gmra.mxu2 %vm3396_vm7, %v3730_v52 }
  0xd2   : > { %v4179_v25 = vpop.f32.mrf.mxu0  ;;  %v1017_v26 = vpop.permute.xlu1 %1016 }
  0xd3   : > { %3703 = vset.pattern.permute.xlu1 %v3727_v1  ;;  %v4203_v31 = vpop.permute.xlu0 %1550  ;;  %vm1037_vm1 = vcmp.eq.s32.totalorder %v4056_v47, %v1017_v26 }
  0xd4   : > { %3704 = vset.pattern.permute.xlu2 %v3727_v1  ;;  %v4220_v1 = vld [vmem:[%s5310_s4 + $0x10] sm:$0xff]  ;;  %vm3400_vm3 = vmpackc.low %vm1037_vm1, %vm1036_vm0  ;;  %vm1348_vm0 = vcmp.eq.s32.totalorder %v4056_v47, %v4153_v17  ;;  %vm1349_vm1 = vcmp.eq.s32.totalorder %v4056_v47, %v4175_v22  ;;  %v4337_v17 = vunpack.c.l.bf16 %v564_v11 }
  0xd5   : > { %v4205_v32 = vpop.permute.xlu2 %1556  ;;  %1454 = vmatpush.bf16.msrb.mxu1 %v4220_v1  ;;  %1190 = vmatpush.bf16.msra.mxu3 %v4220_v1  ;;  %vm3448_vm5 = vmpackc.low %vm1349_vm1, %vm1348_vm0 }
  0xd9   : > { %1455 = vmatpush.bf16.msrb.mxu1 %v3579_v44  ;;  %1191 = vmatpush.bf16.msra.mxu3 %v3579_v44 }
  0xda   : > { %v4199_v24 = vpop.f32.mrf.mxu0  ;;  %v1020_v30 = vpop.permute.xlu1 %1019 }
  0xdb   : > { %v4213_v35 = vpop.permute.xlu0 %1565  ;;  %vm1038_vm7 = vcmp.eq.s32.totalorder %v4056_v47, %v1020_v30 }
  0xdc   : > { %vm3402_vm9 = vmpackc.low %vm1039_vm6, %vm1038_vm7 }
  0xdd   : > { %3443 = vmatmul.msk.bf16.gmra.mxu0 %vm3442_vm12, %v3730_v52  ;;  %v4215_v36 = vpop.permute.xlu2 %1562  ;;  %1192 = vmatpush.bf16.msra.mxu3 %v3578_v45 }
  0xde   : > { %1456 = vmatpush.bf16.msrb.mxu1 %v3578_v45 }
  0xdf   : > { %3399 = vmatmul.msk.bf16.gmra.mxu2 %vm3398_vm13, %v3730_v52 }
  0xe1   : > { %1707 = vmatpush.bf16.msrb.mxu3 %v4078_v55 }
  0xe2   : > { %v4209_v33 = vpop.f32.mrf.mxu0  ;;  %1965 = vmatpush.bf16.msra.mxu1 %v4078_v55 }
  0xe3   : > { %v4211_v34 = vpop.permute.xlu1 %1334  ;;  %v4236_v38 = vpop.permute.xlu0 %1574 }
  0xe5   : > { %v4238_v39 = vpop.permute.xlu2 %1571  ;;  %1708 = vmatpush.bf16.msrb.mxu3 %v4098_v62 }
  0xe6   : > { %1966 = vmatpush.bf16.msra.mxu1 %v4098_v62  ;;  %v4316_v62 = vunpack.c.h.bf16 %v562_v58 }
  0xe9   : > { %1709 = vmatpush.bf16.msrb.mxu3 %v4128_v9 }
  0xea   : > { %v4231_v19 = vpop.f32.mrf.mxu0  ;;  %1967 = vmatpush.bf16.msra.mxu1 %v4128_v9 }
  0xeb   : > { %v1584_v42 = vpop.permute.xlu0 %1583 }
  0xec   : > { %v4233_v37 = vpop.permute.xlu1 %1553  ;;  %vm1606_vm4 = vcmp.eq.s32.totalorder %v4056_v47, %v1584_v42 }
  0xed   : > { %3445 = vmatmul.msk.bf16.gmra.mxu0 %vm3444_vm2, %v3730_v52  ;;  %v1581_v43 = vpop.permute.xlu2 %1580  ;;  %vm1594_vm2 = vcmp.eq.s32.totalorder %v4056_v47, %v4185_v28  ;;  %1710 = vmatpush.bf16.msrb.mxu3 %v4158_v18 }
  0xee   : > { %vm1605_vm13 = vcmp.eq.s32.totalorder %v4056_v47, %v1581_v43  ;;  %1968 = vmatpush.bf16.msra.mxu1 %v4158_v18  ;;  %v4341_v18 = vunpack.c.h.bf16 %v564_v11 }
  0xef   : > { %3401 = vmatmul.msk.bf16.gmra.mxu2 %vm3400_vm3, %v3730_v52  ;;  %vm1595_vm3 = vcmp.eq.s32.totalorder %v4056_v47, %v4203_v31 }
  0xf0   : > { %vm3452_vm6 = vmpackc.low %vm1595_vm3, %vm1594_vm2 }
  0xf1   : > { %1711 = vmatpush.bf16.msrb.mxu3 %v4190_v29 }
  0xf2   : > { %v4242_v40 = vpop.f32.mrf.mxu0  ;;  %1969 = vmatpush.bf16.msra.mxu1 %v4190_v29 }
  0xf3   : > { %v1593_v48 = vpop.permute.xlu0 %1592 }
  0xf4   : > { %v4244_v41 = vpop.permute.xlu1 %1559  ;;  %vm1609_vm10 = vcmp.eq.s32.totalorder %v4056_v47, %v1593_v48 }
  0xf5   : > { %v1590_v49 = vpop.permute.xlu2 %1589  ;;  %1712 = vmatpush.bf16.msrb.mxu3 %v4220_v1 }
  0xf6   : > { %vm1608_vm11 = vcmp.eq.s32.totalorder %v4056_v47, %v1590_v49  ;;  %1970 = vmatpush.bf16.msra.mxu1 %v4220_v1 }
  0xf7   : > { %vm4269_vm12 = vmpackc.low %vm1609_vm10, %vm1608_vm11  ;;  %vm1350_vm10 = vcmp.eq.s32.totalorder %v4056_v47, %v4183_v27  ;;  %vm1597_vm11 = vcmp.eq.s32.totalorder %v4056_v47, %v4205_v32 }
  0xf9   : > { %1713 = vmatpush.bf16.msrb.mxu3 %v3579_v44 }
  0xfa   : > { %v4255_v12 = vpop.f32.mrf.mxu0  ;;  %1971 = vmatpush.bf16.msra.mxu1 %v3579_v44 }
  0xfc   : > { %v4260_v46 = vpop.permute.xlu1 %1568  ;;  %v1812_v1 = vpop.permute.xlu0 %1811 }
  0xfd   : > { %3447 = vmatmul.msk.bf16.gmra.mxu0 %vm3446_vm8, %v3730_v52  ;;  %1714 = vmatpush.bf16.msrb.mxu3 %v3578_v45 }
  0xfe   : > { %1972 = vmatpush.bf16.msra.mxu1 %v3578_v45  ;;  %v1809_v14 = vpop.permute.xlu2 %1808 }
  0xff   : > { %3403 = vmatmul.msk.bf16.gmra.mxu2 %vm3402_vm9, %v3730_v52  ;;  %vm1351_vm9 = vcmp.eq.s32.totalorder %v4056_v47, %v4211_v34  ;;  %vm1853_vm1 = vcmp.eq.s32.totalorder %v4056_v47, %v1809_v14  ;;  %v4355_v34 = vpop.f32.mrf.mxu1 }
 0x102   : > { %v4273_v51 = vpop.f32.mrf.mxu0 }
 0x103   : > { %5327 = vst [vmem:[#allocation2_spill] sm:$0xff] %v4273_v51 }
 0x104   : > { %v1578_v53 = vpop.permute.xlu1 %1577 }
 0x105   : > { %vm1604_vm14 = vcmp.eq.s32.totalorder %v4056_v47, %v1578_v53 }
 0x106   : > { %vm4279_vm15 = vmpackc.low %vm1605_vm13, %vm1604_vm14  ;;  %vm1596_vm13 = vcmp.eq.s32.totalorder %v4056_v47, %v4233_v37  ;;  %v566_v37 = vld [vmem:[%s3853_s20 + $0x10] sm:$0xff]  }
 0x107   : > { %vm3450_vm14 = vmpackc.low %vm1351_vm9, %vm1350_vm10  ;;  %vm1854_vm9 = vcmp.eq.s32.totalorder %v4056_v47, %v1812_v1  ;;  %v4360_v42 = vunpack.c.l.bf16 %v566_v37  ;;  %v4362_v43 = vunpack.c.h.bf16 %v566_v37  ;;  %v4371_v53 = vpop.f32.mrf.mxu1 }
 0x108   : > { %vm3454_vm0 = vmpackc.low %vm1597_vm11, %vm1596_vm13  ;;  %vm1600_vm11 = vcmp.eq.s32.totalorder %v4056_v47, %v4213_v35  ;;  %vm1601_vm13 = vcmp.eq.s32.totalorder %v4056_v47, %v4260_v46  ;;  %v1818_v46 = vpop.permute.xlu2 %1817 }
 0x10a   : > { %v4293_v54 = vpop.f32.mrf.mxu0 }
 0x10b   : > { %5330 = vst [vmem:[#allocation3_spill] sm:$0xff] %v4293_v54 }
 0x10c   : > { %v1587_v55 = vpop.permute.xlu1 %1586 }
 0x10d   : > { %3449 = vmatmul.msk.bf16.gmra.mxu0 %vm3448_vm5, %v3730_v52  ;;  %vm1607_vm7 = vcmp.eq.s32.totalorder %v4056_v47, %v1587_v55  ;;  %vm1598_vm5 = vcmp.eq.s32.totalorder %v4056_v47, %v4244_v41 }
 0x10e   : > { %vm4300_vm8 = vmpackc.low %vm1607_vm7, %vm1606_vm4  ;;  %vm1599_vm4 = vcmp.eq.s32.totalorder %v4056_v47, %v4215_v36 }
 0x10f   : > { %3453 = vmatmul.msk.bf16.vlgmr.msrb.gmra.mxu2 %vm3452_vm6, %v3730_v52  ;;  %vm3456_vm6 = vmpackc.low %vm1599_vm4, %vm1598_vm5  ;;  %v4379_v11 = vpop.f32.mrf.mxu1  ;;  %vm1603_vm4 = vcmp.eq.s32.totalorder %v4056_v47, %v4236_v38 }
 0x110   : > { %v1824_v38 = vpop.permute.xlu2 %1823 }
 0x112   : > { %v4307_v57 = vpop.f32.mrf.mxu0  ;;  %v1073_v59 = vpop.f32.mrf.mxu2 }
 0x113   : > { %5333 = vst [vmem:[#allocation4_spill] sm:$0xff] %v4307_v57  ;;  %v1113_v0 = vsub.f32 %v1073_v59, %v4314_v61 }
 0x115   : > { %v1806_v16 = vpop.permute.xlu1 %1805 }
 0x116   : > { %vm1852_vm2 = vcmp.eq.s32.totalorder %v4056_v47, %v1806_v16 }
 0x117   : > { %vm3468_vm3 = vmpackc.low %vm1853_vm1, %vm1852_vm2 }
 0x11a   : > { %v4327_v2 = vpop.f32.mrf.mxu0  ;;  %v1075_v3 = vpop.f32.mrf.mxu2 }
 0x11b   : > { %5334 = vst [vmem:[#allocation5_spill] sm:$0xff] %v4327_v2  ;;  %v1114_v5 = vsub.f32 %v1075_v3, %v4316_v62 }
 0x11d   : > { %3451 = vmatmul.msk.bf16.gmra.mxu0 %vm3450_vm14, %v3730_v52  ;;  %v1129_v7 = vpack.c.bf16 %v1114_v5, %v1113_v0  ;;  %v1815_v36 = vpop.permute.xlu1 %1814  ;;  %vm3458_vm14 = vmpackc.low %vm1601_vm13, %vm1600_vm11  ;;  %v568_v5 = vld [vmem:[%s3853_s20 + $0x18] sm:$0xff]  }
 0x11e   : > { %vm1855_vm7 = vcmp.eq.s32.totalorder %v4056_v47, %v1815_v36  ;;  %v4383_v14 = vunpack.c.h.bf16 %v568_v5  ;;  %v570_v36 = vld [vmem:[%s3853_s20 + $0x20] sm:$0xff]  }
 0x11f   : > { %1193 = vmatmul.bf16.vlgmr.msra.gmra.mxu3 %v1129_v7  ;;  %3455 = vmatmul.msk.bf16.gmra.mxu2 %vm3454_vm0, %v3730_v52  ;;  %vm3470_vm10 = vmpackc.low %vm1855_vm7, %vm1854_vm9  ;;  %vm1856_vm0 = vcmp.eq.s32.totalorder %v4056_v47, %v1818_v46  ;;  %v4400_v37 = vunpack.c.l.bf16 %v570_v36 }
 0x122   : > { %v4334_v9 = vpop.f32.mrf.mxu0  ;;  %v1078_v13 = vpop.f32.mrf.mxu2 }
 0x123   : > { %5335 = vst [vmem:[#allocation6_spill] sm:$0xff] %v4334_v9  ;;  %v1115_v22 = vsub.f32 %v1078_v13, %v4337_v17  ;;  %v4381_v13 = vunpack.c.l.bf16 %v568_v5  ;;  %v1833_v5 = vpop.permute.xlu2 %1832 }
 0x125   : > { %v1821_v3 = vpop.permute.xlu1 %1820 }
 0x126   : > { %vm1857_vm1 = vcmp.eq.s32.totalorder %v4056_v47, %v1821_v3 }
 0x127   : > { %vm3472_vm2 = vmpackc.low %vm1857_vm1, %vm1856_vm0 }
 0x12a   : > { %v1385_v23 = vpop.f32.mrf.mxu0  ;;  %v1080_v26 = vpop.f32.mrf.mxu2 }
 0x12b   : > { %v1116_v27 = vsub.f32 %v1080_v26, %v4341_v18  ;;  %v1425_v30 = vsub.f32 %v1385_v23, %v4314_v61 }
 0x12d   : > { %3469 = vmatmul.msk.bf16.vlgmr.msra.gmra.mxu0 %vm3468_vm3, %v3730_v52  ;;  %v1130_v28 = vpack.c.bf16 %v1116_v27, %v1115_v22  ;;  %vm1602_vm3 = vcmp.eq.s32.totalorder %v4056_v47, %v4238_v39 }
 0x12e   : > { %vm3460_vm5 = vmpackc.low %vm1603_vm4, %vm1602_vm3 }
 0x12f   : > { %1198 = vmatmul.bf16.gmra.mxu3 %v1130_v28  ;;  %3457 = vmatmul.msk.bf16.gmra.mxu2 %vm3456_vm6, %v3730_v52  ;;  %v4393_v28 = vpop.f32.mrf.mxu1  ;;  %vm1858_vm6 = vcmp.eq.s32.totalorder %v4056_v47, %v1824_v38 }
 0x132   : > { %v1387_v29 = vpop.f32.mrf.mxu0  ;;  %v1083_v31 = vpop.f32.mrf.mxu2 }
 0x133   : > { %v1426_v32 = vsub.f32 %v1387_v29, %v4316_v62  ;;  %v1117_v48 = vsub.f32 %v1083_v31, %v4360_v42 }
 0x135   : > { %v1441_v41 = vpack.c.bf16 %v1426_v32, %v1425_v30  ;;  %v1827_v32 = vpop.permute.xlu0 %1826 }
 0x136   : > { %vm1859_vm7 = vcmp.eq.s32.totalorder %v4056_v47, %v1827_v32 }
 0x137   : > { %1457 = vmatmul.bf16.vlgmr.msrb.gmra.mxu1 %v1441_v41  ;;  %v4402_v41 = vunpack.c.h.bf16 %v570_v36  ;;  %vm3474_vm9 = vmpackc.low %vm1859_vm7, %vm1858_vm6 }
 0x13a   : > { %v1390_v44 = vpop.f32.mrf.mxu0  ;;  %v1085_v45 = vpop.f32.mrf.mxu2 }
 0x13b   : > { %v1118_v49 = vsub.f32 %v1085_v45, %v4362_v43  ;;  %v1427_v35 = vsub.f32 %v1390_v44, %v4337_v17 }
 0x13d   : > { %3471 = vmatmul.msk.bf16.gmra.mxu0 %vm3470_vm10, %v3730_v52  ;;  %v1131_v55 = vpack.c.bf16 %v1118_v49, %v1117_v48  ;;  %v4404_v48 = vpop.f32.mrf.mxu1  ;;  %vm1861_vm10 = vcmp.eq.s32.totalorder %v4056_v47, %v1833_v5 }
 0x13f   : > { %1203 = vmatmul.bf16.gmra.mxu3 %v1131_v55  ;;  %3459 = vmatmul.msk.bf16.gmra.mxu2 %vm3458_vm14, %v3730_v52 }
 0x142   : > { %v1392_v58 = vpop.f32.mrf.mxu0  ;;  %v1088_v59 = vpop.f32.mrf.mxu2 }
 0x143   : > { %v1428_v0 = vsub.f32 %v1392_v58, %v4341_v18  ;;  %v1119_v23 = vsub.f32 %v1088_v59, %v4381_v13 }
 0x145   : > { %v1442_v7 = vpack.c.bf16 %v1428_v0, %v1427_v35  ;;  %v572_v0 = vld [vmem:[%s3853_s20 + $0x28] sm:$0xff]  }
 0x147   : > { %1462 = vmatmul.bf16.gmra.mxu1 %v1442_v7  ;;  %v1830_v7 = vpop.permute.xlu1 %1829 }
 0x148   : > { %vm1860_vm11 = vcmp.eq.s32.totalorder %v4056_v47, %v1830_v7 }
 0x14a   : > { %v1395_v16 = vpop.f32.mrf.mxu0  ;;  %v1090_v22 = vpop.f32.mrf.mxu2 }
 0x14b   : > { %v1120_v26 = vsub.f32 %v1090_v22, %v4383_v14  ;;  %v1429_v39 = vsub.f32 %v1395_v16, %v4360_v42  ;;  %v4415_v22 = vpop.f32.mrf.mxu1 }
 0x14d   : > { %3473 = vmatmul.msk.bf16.gmra.mxu0 %vm3472_vm2, %v3730_v52  ;;  %v1132_v27 = vpack.c.bf16 %v1120_v26, %v1119_v23  ;;  %v4417_v23 = vunpack.c.l.bf16 %v572_v0  ;;  %v4424_v26 = vunpack.c.h.bf16 %v572_v0 }
 0x14f   : > { %1208 = vmatmul.bf16.gmra.mxu3 %v1132_v27  ;;  %3461 = vmatmul.msk.bf16.gmra.mxu2 %vm3460_vm5, %v3730_v52 }
 0x152   : > { %v1397_v29 = vpop.f32.mrf.mxu0  ;;  %v1093_v30 = vpop.f32.mrf.mxu2 }
 0x153   : > { %v1430_v31 = vsub.f32 %v1397_v29, %v4362_v43  ;;  %v1121_v49 = vsub.f32 %v1093_v30, %v4400_v37  ;;  %v4429_v38 = vpop.f32.mrf.mxu1 }
 0x155   : > { %v1443_v1 = vpack.c.bf16 %v1430_v31, %v1429_v39 }
 0x157   : > { %1467 = vmatmul.bf16.gmra.mxu1 %v1443_v1 }
 0x15a   : > { %v1400_v44 = vpop.f32.mrf.mxu0  ;;  %v1095_v45 = vpop.f32.mrf.mxu2 }
 0x15b   : > { %v1122_v55 = vsub.f32 %v1095_v45, %v4402_v41  ;;  %v1431_v59 = vsub.f32 %v1400_v44, %v4381_v13  ;;  %v1839_v45 = vpop.permute.xlu1 %1838  ;;  %v4446_v0 = vpop.f32.mrf.mxu1 }
 0x15c   : > { %vm1863_vm13 = vcmp.eq.s32.totalorder %v4056_v47, %v1839_v45 }
 0x15d   : > { %3475 = vmatmul.msk.bf16.gmra.mxu0 %vm3474_vm9, %v3730_v52  ;;  %v1133_v58 = vpack.c.bf16 %v1122_v55, %v1121_v49  ;;  %v1836_v49 = vpop.permute.xlu0 %1835  ;;  %v574_v55 = vld [vmem:[%s3853_s20 + $0x30] sm:$0xff]  }
 0x15e   : > { %vm1862_vm14 = vcmp.eq.s32.totalorder %v4056_v47, %v1836_v49 }
 0x15f   : > { %1213 = vmatmul.bf16.gmra.mxu3 %v1133_v58  ;;  %3463 = vmatmul.msk.bf16.gmra.mxu2 %vm4279_vm15, %v3730_v52  ;;  %vm3476_vm15 = vmpackc.low %vm1861_vm10, %vm1860_vm11 }
 0x162   : > { %v1402_v35 = vpop.f32.mrf.mxu0  ;;  %v1098_v46 = vpop.f32.mrf.mxu2 }
 0x163   : > { %v1432_v3 = vsub.f32 %v1402_v35, %v4383_v14  ;;  %v1123_v27 = vsub.f32 %v1098_v46, %v4417_v23  ;;  %v4442_v35 = vunpack.c.l.bf16 %v574_v55 }
 0x165   : > { %v1444_v16 = vpack.c.bf16 %v1432_v3, %v1431_v59  ;;  %v4444_v59 = vunpack.c.h.bf16 %v574_v55 }
 0x167   : > { %1472 = vmatmul.bf16.gmra.mxu1 %v1444_v16  ;;  %v3591_v16 = vld [vmem:[%s5313_s7 + $0x28] sm:$0xff] }
 0x168   : > { %2160 = vmatpush.bf16.msrb.mxu0 %v3591_v16  ;;  %3651 = vmatpush.bf16.msra.mxu2 %v3591_v16 }
 0x16a   : > { %v1405_v29 = vpop.f32.mrf.mxu0  ;;  %v1100_v39 = vpop.f32.mrf.mxu2 }
 0x16b   : > { %v1124_v30 = vsub.f32 %v1100_v39, %v4424_v26  ;;  %v1433_v36 = vsub.f32 %v1405_v29, %v4400_v37 }
 0x16d   : > { %3477 = vmatmul.msk.bf16.gmra.mxu0 %vm3476_vm15, %v3730_v52  ;;  %v1134_v31 = vpack.c.bf16 %v1124_v30, %v1123_v27  ;;  %v3590_v27 = vld [vmem:[%s5313_s7 + $0x20] sm:$0xff] }
 0x16e   : > { %2161 = vmatpush.bf16.msrb.mxu0 %v3590_v27  ;;  %3652 = vmatpush.bf16.msra.mxu2 %v3590_v27  ;;  %v3586_v27 = vld [vmem:[%s5313_s7] sm:$0xff] }
 0x16f   : > { %1218 = vmatmul.bf16.gmra.mxu3 %v1134_v31  ;;  %3465 = vmatmul.msk.bf16.gmra.mxu2 %vm4300_vm8, %v3730_v52  ;;  %vm3478_vm8 = vmpackc.low %vm1863_vm13, %vm1862_vm14 }
 0x172   : > { %v1407_v32 = vpop.f32.mrf.mxu0  ;;  %v1103_v1 = vpop.f32.mrf.mxu2  ;;  %2162 = vmatpush.bf16.msrb.mxu0 %v3589_v50  ;;  %3653 = vmatpush.bf16.msra.mxu2 %v3589_v50 }
 0x173   : > { %v1434_v44 = vsub.f32 %v1407_v32, %v4402_v41  ;;  %v1125_v5 = vsub.f32 %v1103_v1, %v4442_v35  ;;  %v4462_v32 = vpop.f32.mrf.mxu1  ;;  %v1845_v1 = vpop.permute.xlu0 %1844 }
 0x174   : > { %vm1865_vm0 = vcmp.eq.s32.totalorder %v4056_v47, %v1845_v1  ;;  %v1848_v1 = vpop.permute.xlu1 %1847 }
 0x175   : > { %v1445_v58 = vpack.c.bf16 %v1434_v44, %v1433_v36  ;;  %v1842_v36 = vpop.permute.xlu2 %1841  ;;  %v576_v44 = vld [vmem:[%s3853_s20 + $0x38] sm:$0xff]   ;;  %vm1866_vm3 = vcmp.eq.s32.totalorder %v4056_v47, %v1848_v1 }
 0x176   : > { %v4470_v49 = vunpack.c.l.bf16 %v576_v44  ;;  %v4472_v55 = vunpack.c.h.bf16 %v576_v44 }
 0x177   : > { %1477 = vmatmul.bf16.gmra.mxu1 %v1445_v58  ;;  %v3588_v58 = vld [vmem:[%s5313_s7 + $0x10] sm:$0xff] }
 0x178   : > { %2163 = vmatpush.bf16.msrb.mxu0 %v3588_v58  ;;  %3654 = vmatpush.bf16.msra.mxu2 %v3588_v58 }
 0x17a   : > { %v1410_v46 = vpop.f32.mrf.mxu0  ;;  %v1105_v3 = vpop.f32.mrf.mxu2 }
 0x17b   : > { %v1126_v7 = vsub.f32 %v1105_v3, %v4444_v59  ;;  %v1435_v39 = vsub.f32 %v1410_v46, %v4417_v23  ;;  %v4483_v16 = vpop.f32.mrf.mxu1 }
 0x17d   : > { %3479 = vmatmul.msk.bf16.gmra.mxu0 %vm3478_vm8, %v3730_v52  ;;  %v1135_v6 = vpack.c.bf16 %v1126_v7, %v1125_v5  ;;  %v3587_v7 = vld [vmem:[%s5313_s7 + $0x8] sm:$0xff] }
 0x17e   : > { %2164 = vmatpush.bf16.msrb.mxu0 %v3587_v7  ;;  %3655 = vmatpush.bf16.msra.mxu2 %v3587_v7 }
 0x17f   : > { %1223 = vmatmul.bf16.gmra.mxu3 %v1135_v6  ;;  %3467 = vmatmul.msk.bf16.gmra.mxu2 %vm4269_vm12, %v3730_v52  ;;  %vm1864_vm12 = vcmp.eq.s32.totalorder %v4056_v47, %v1842_v36  ;;  %v1851_v36 = vpop.permute.xlu2 %1850 }
 0x180   : > { %vm3480_vm1 = vmpackc.low %vm1865_vm0, %vm1864_vm12  ;;  %vm1867_vm2 = vcmp.eq.s32.totalorder %v4056_v47, %v1851_v36  ;;  %v4511_v36 = vld [vmem:[%s5312_s6] ss:$0 sm:$0xff] }
 0x181   : > { %vm3482_vm4 = vmpackc.low %vm1867_vm2, %vm1866_vm3 }
 0x182   : > { %v1412_v29 = vpop.f32.mrf.mxu0  ;;  %v1108_v30 = vpop.f32.mrf.mxu2  ;;  %2165 = vmatpush.bf16.msrb.mxu0 %v3586_v27  ;;  %3656 = vmatpush.bf16.msra.mxu2 %v3586_v27 }
 0x183   : > { %v1436_v31 = vsub.f32 %v1412_v29, %v4424_v26  ;;  %v1127_v3 = vsub.f32 %v1108_v30, %v4470_v49 }
 0x185   : > { %v1446_v45 = vpack.c.bf16 %v1436_v31, %v1435_v39 }
 0x187   : > { %1482 = vmatmul.bf16.gmra.mxu1 %v1446_v45  ;;  %v4492_v45 = vpop.f32.mrf.mxu1 }
 0x18a   : > { %v1415_v56 = vpop.f32.mrf.mxu0  ;;  %v1110_v46 = vpop.f32.mrf.mxu2 }
 0x18b   : > { %v1128_v5 = vsub.f32 %v1110_v46, %v4472_v55  ;;  %v1437_v39 = vsub.f32 %v1415_v56, %v4442_v35 }
 0x18d   : > { %3481 = vmatmul.msk.bf16.gmra.mxu0 %vm3480_vm1, %v3730_v52  ;;  %v1136_v6 = vpack.c.bf16 %v1128_v5, %v1127_v3 }
 0x18f   : > { %1228 = vmatmul.bf16.gmra.mxu3 %v1136_v6  ;;  %v4497_v5 = vpop.f32.mrf.mxu1 }
 0x192   : > { %v1417_v29 = vpop.f32.mrf.mxu0  ;;  %v1643_v31 = vpop.f32.mrf.mxu2 }
 0x193   : > { %v1438_v30 = vsub.f32 %v1417_v29, %v4444_v59  ;;  %v1683_v50 = vsub.f32 %v1643_v31, %v4314_v61  ;;  %v4505_v31 = vld [vmem:[%s5311_s5] ss:$0 sm:$0xff] }
 0x195   : > { %v1447_v44 = vpack.c.bf16 %v1438_v30, %v1437_v39 }
 0x197   : > { %1487 = vmatmul.bf16.gmra.mxu1 %v1447_v44 }
 0x19a   : > { %v1420_v58 = vpop.f32.mrf.mxu0  ;;  %v1645_v56 = vpop.f32.mrf.mxu2 }
 0x19b   : > { %v1684_v46 = vsub.f32 %v1645_v56, %v4316_v62  ;;  %v1439_v6 = vsub.f32 %v1420_v58, %v4470_v49  ;;  %v4514_v56 = vpop.f32.mrf.mxu1 }
 0x19d   : > { %3483 = vmatmul.msk.bf16.gmra.mxu0 %vm3482_vm4, %v3730_v52  ;;  %v1699_v3 = vpack.c.bf16 %v1684_v46, %v1683_v50 }
 0x19f   : > { %1715 = vmatmul.bf16.vlgmr.msrb.gmra.mxu3 %v1699_v3 }
 0x1a2   : > { %v1422_v7 = vpop.f32.mrf.mxu0  ;;  %v1194_v27 = vpop.f32.mrf.mxu3 }
 0x1a3   : > { %v1440_v47 = vsub.f32 %v1422_v7, %v4472_v55  ;;  %v1648_v29 = vpop.f32.mrf.mxu2  ;;  %v1195_v30 = vadd.f32 %v1194_v27, %v4312_v60 }
 0x1a4   : > { %v1685_v58 = vsub.f32 %v1648_v29, %v4337_v17 }
 0x1a5   : > { %v1448_v39 = vpack.c.bf16 %v1440_v47, %v1439_v6  ;;  %v1237_v52 = vmul.f32 %v4505_v31, %v1195_v30 }
 0x1a7   : > { %1492 = vmatmul.bf16.gmra.mxu1 %v1448_v39  ;;  %v1256_v7 = vadd.f32 %v4511_v36, %v1237_v52 }
 0x1a9   : > { %v1272_v30 = vmax.f32 %v1256_v7, 0.0 }
 0x1aa   : > { %v1901_v1 = vpop.f32.mrf.mxu0  ;;  %v1196_v44 = vpop.f32.mrf.mxu3 }
 0x1ab   : > { %v1650_v50 = vpop.f32.mrf.mxu2  ;;  %v1197_v46 = vadd.f32 %v1196_v44, %v4331_v8  ;;  %v1941_v39 = vsub.f32 %v1901_v1, %v4314_v61 }
 0x1ac   : > { %v1686_v3 = vsub.f32 %v1650_v50, %v4341_v18 }
 0x1ad   : > { %v1238_v6 = vmul.f32 %v4505_v31, %v1197_v46 }
 0x1ae   : > { %v1700_v27 = vpack.c.bf16 %v1686_v3, %v1685_v58 }
 0x1af   : > { %v1257_v47 = vadd.f32 %v4511_v36, %v1238_v6 }
 0x1b0   : > { %1720 = vmatmul.bf16.gmra.mxu3 %v1700_v27 }
 0x1b1   : > { %v1273_v9 = vmax.f32 %v1257_v47, 0.0 }
 0x1b2   : > { %v1903_v2 = vpop.f32.mrf.mxu0  ;;  %v1199_v29 = vpop.f32.mrf.mxu3 }
 0x1b3   : > { %v1653_v57 = vpop.f32.mrf.mxu2  ;;  %v1942_v54 = vsub.f32 %v1903_v2, %v4316_v62  ;;  %v2062_v44 = vpack.c.bf16 %v1273_v9, %v1272_v30  ;;  %v1200_v52 = vadd.f32 %v1199_v29, %v4343_v20 }
 0x1b4   : > { %v1458_v51 = vpop.f32.mrf.mxu1  ;;  %v1687_v6 = vsub.f32 %v1653_v57, %v4360_v42 }
 0x1b5   : > { %v1957_v50 = vpack.c.bf16 %v1942_v54, %v1941_v39  ;;  %2166 = vmatmul.bf16.vlgmr.msrb.gmra.mxu0 %v2062_v44  ;;  %v1459_v58 = vadd.f32 %v1458_v51, %v4312_v60  ;;  %v1239_v46 = vmul.f32 %v4505_v31, %v1200_v52 }
 0x1b7   : > { %1973 = vmatmul.bf16.vlgmr.msra.gmra.mxu1 %v1957_v50  ;;  %v1498_v61 = vmul.f32 %v4505_v31, %v1459_v58  ;;  %v1258_v27 = vadd.f32 %v4511_v36, %v1239_v46 }
 0x1b9   : > { %v1514_v39 = vadd.f32 %v4511_v36, %v1498_v61  ;;  %v1274_v50 = vmax.f32 %v1258_v27, 0.0 }
 0x1ba   : > { %v1906_v3 = vpop.f32.mrf.mxu0  ;;  %v1201_v1 = vpop.f32.mrf.mxu3 }
 0x1bb   : > { %v1655_v7 = vpop.f32.mrf.mxu2  ;;  %v1202_v62 = vadd.f32 %v1201_v1, %v4355_v34  ;;  %v1943_v57 = vsub.f32 %v1906_v3, %v4337_v17  ;;  %v1530_v1 = vmax.f32 %v1514_v39, 0.0 }
 0x1bc   : > { %v1688_v2 = vsub.f32 %v1655_v7, %v4362_v43  ;;  %v1460_v54 = vpop.f32.mrf.mxu1 }
 0x1bd   : > { %v1461_v9 = vadd.f32 %v1460_v54, %v4331_v8  ;;  %v1240_v51 = vmul.f32 %v4505_v31, %v1202_v62 }
 0x1be   : > { %v1701_v47 = vpack.c.bf16 %v1688_v2, %v1687_v6 }
 0x1bf   : > { %v1499_v30 = vmul.f32 %v4505_v31, %v1461_v9  ;;  %v1259_v29 = vadd.f32 %v4511_v36, %v1240_v51 }
 0x1c0   : > { %1725 = vmatmul.bf16.gmra.mxu3 %v1701_v47 }
 0x1c1   : > { %v1515_v44 = vadd.f32 %v4511_v36, %v1499_v30  ;;  %v1275_v58 = vmax.f32 %v1259_v29, 0.0 }
 0x1c2   : > { %v1908_v52 = vpop.f32.mrf.mxu0  ;;  %v1204_v7 = vpop.f32.mrf.mxu3 }
 0x1c3   : > { %v1658_v46 = vpop.f32.mrf.mxu2  ;;  %v1944_v62 = vsub.f32 %v1908_v52, %v4341_v18  ;;  %v1531_v6 = vmax.f32 %v1515_v44, 0.0  ;;  %v2063_v61 = vpack.c.bf16 %v1275_v58, %v1274_v50  ;;  %v1205_v51 = vadd.f32 %v1204_v7, %v4371_v53 }
 0x1c4   : > { %v1463_v2 = vpop.f32.mrf.mxu1  ;;  %v1689_v18 = vsub.f32 %v1658_v46, %v4381_v13 }
 0x1c5   : > { %v1958_v54 = vpack.c.bf16 %v1944_v62, %v1943_v57  ;;  %v4539_v9 = vpack.c.bf16 %v1531_v6, %v1530_v1  ;;  %2171 = vmatmul.bf16.gmra.mxu0 %v2063_v61  ;;  %v1464_v17 = vadd.f32 %v1463_v2, %v4343_v20  ;;  %v1241_v3 = vmul.f32 %v4505_v31, %v1205_v51 }
 0x1c7   : > { %1978 = vmatmul.bf16.gmra.mxu1 %v1958_v54  ;;  %v1500_v47 = vmul.f32 %v4505_v31, %v1464_v17  ;;  %v1260_v52 = vadd.f32 %v4511_v36, %v1241_v3 }
 0x1c9   : > { %v1516_v7 = vadd.f32 %v4511_v36, %v1500_v47  ;;  %v1276_v61 = vmax.f32 %v1260_v52, 0.0 }
 0x1ca   : > { %v1911_v27 = vpop.f32.mrf.mxu0  ;;  %v1206_v39 = vpop.f32.mrf.mxu3 }
 0x1cb   : > { %v1660_v30 = vpop.f32.mrf.mxu2  ;;  %v1207_v29 = vadd.f32 %v1206_v39, %v4379_v11  ;;  %v1945_v46 = vsub.f32 %v1911_v27, %v4360_v42  ;;  %v1532_v17 = vmax.f32 %v1516_v7, 0.0 }
 0x1cc   : > { %v1690_v57 = vsub.f32 %v1660_v30, %v4383_v14  ;;  %v1465_v44 = vpop.f32.mrf.mxu1 }
 0x1cd   : > { %v1466_v50 = vadd.f32 %v1465_v44, %v4355_v34  ;;  %v1242_v58 = vmul.f32 %v4505_v31, %v1207_v29 }
 0x1ce   : > { %v1702_v1 = vpack.c.bf16 %v1690_v57, %v1689_v18 }
 0x1cf   : > { %v1501_v62 = vmul.f32 %v4505_v31, %v1466_v50  ;;  %v1261_v6 = vadd.f32 %v4511_v36, %v1242_v58 }
 0x1d0   : > { %1730 = vmatmul.bf16.gmra.mxu3 %v1702_v1 }
 0x1d1   : > { %v1517_v2 = vadd.f32 %v4511_v36, %v1501_v62  ;;  %v1277_v51 = vmax.f32 %v1261_v6, 0.0 }
 0x1d2   : > { %v1913_v54 = vpop.f32.mrf.mxu0  ;;  %v1209_v39 = vpop.f32.mrf.mxu3 }
 0x1d3   : > { %v1663_v3 = vpop.f32.mrf.mxu2  ;;  %v1946_v30 = vsub.f32 %v1913_v54, %v4362_v43  ;;  %v1533_v18 = vmax.f32 %v1517_v2, 0.0  ;;  %v2064_v47 = vpack.c.bf16 %v1277_v51, %v1276_v61  ;;  %v1210_v50 = vadd.f32 %v1209_v39, %v4393_v28 }
 0x1d4   : > { %v1468_v29 = vpop.f32.mrf.mxu1  ;;  %v1691_v43 = vsub.f32 %v1663_v3, %v4400_v37 }
 0x1d5   : > { %v1959_v57 = vpack.c.bf16 %v1946_v30, %v1945_v46  ;;  %v4557_v44 = vpack.c.bf16 %v1533_v18, %v1532_v17  ;;  %2176 = vmatmul.bf16.gmra.mxu0 %v2064_v47  ;;  %v1469_v42 = vadd.f32 %v1468_v29, %v4371_v53  ;;  %v1243_v27 = vmul.f32 %v4505_v31, %v1210_v50 }
 0x1d7   : > { %1983 = vmatmul.bf16.gmra.mxu1 %v1959_v57  ;;  %v1502_v58 = vmul.f32 %v4505_v31, %v1469_v42  ;;  %v1262_v61 = vadd.f32 %v4511_v36, %v1243_v27 }
 0x1d9   : > { %v1518_v17 = vadd.f32 %v4511_v36, %v1502_v58  ;;  %v1278_v29 = vmax.f32 %v1262_v61, 0.0 }
 0x1da   : > { %v1916_v52 = vpop.f32.mrf.mxu0  ;;  %v1211_v1 = vpop.f32.mrf.mxu3 }
 0x1db   : > { %v1665_v7 = vpop.f32.mrf.mxu2  ;;  %v1212_v62 = vadd.f32 %v1211_v1, %v4404_v48  ;;  %v1947_v3 = vsub.f32 %v1916_v52, %v4381_v13  ;;  %v1534_v50 = vmax.f32 %v1518_v17, 0.0 }
 0x1dc   : > { %v1692_v6 = vsub.f32 %v1665_v7, %v4402_v41  ;;  %v1470_v46 = vpop.f32.mrf.mxu1 }
 0x1dd   : > { %v1471_v2 = vadd.f32 %v1470_v46, %v4379_v11  ;;  %v1244_v54 = vmul.f32 %v4505_v31, %v1212_v62 }
 0x1de   : > { %v1703_v51 = vpack.c.bf16 %v1692_v6, %v1691_v43 }
 0x1df   : > { %v1503_v39 = vmul.f32 %v4505_v31, %v1471_v2  ;;  %v1263_v30 = vadd.f32 %v4511_v36, %v1244_v54 }
 0x1e0   : > { %1735 = vmatmul.bf16.gmra.mxu3 %v1703_v51 }
 0x1e1   : > { %v1519_v18 = vadd.f32 %v4511_v36, %v1503_v39  ;;  %v1279_v57 = vmax.f32 %v1263_v30, 0.0 }
 0x1e2   : > { %v1918_v47 = vpop.f32.mrf.mxu0  ;;  %v1214_v42 = vpop.f32.mrf.mxu3 }
 0x1e3   : > { %v1668_v27 = vpop.f32.mrf.mxu2  ;;  %v1948_v1 = vsub.f32 %v1918_v47, %v4383_v14  ;;  %v1535_v7 = vmax.f32 %v1519_v18, 0.0  ;;  %v2065_v58 = vpack.c.bf16 %v1279_v57, %v1278_v29  ;;  %v1215_v46 = vadd.f32 %v1214_v42, %v4415_v22 }
 0x1e4   : > { %v1473_v43 = vpop.f32.mrf.mxu1  ;;  %v1693_v14 = vsub.f32 %v1668_v27, %v4417_v23 }
 0x1e5   : > { %v1960_v62 = vpack.c.bf16 %v1948_v1, %v1947_v3  ;;  %v4575_v6 = vpack.c.bf16 %v1535_v7, %v1534_v50  ;;  %2181 = vmatmul.bf16.gmra.mxu0 %v2065_v58  ;;  %v1474_v13 = vadd.f32 %v1473_v43, %v4393_v28  ;;  %v1245_v52 = vmul.f32 %v4505_v31, %v1215_v46 }
 0x1e7   : > { %1988 = vmatmul.bf16.gmra.mxu1 %v1960_v62  ;;  %v1504_v61 = vmul.f32 %v4505_v31, %v1474_v13  ;;  %v1264_v18 = vadd.f32 %v4511_v36, %v1245_v52 }
 0x1e9   : > { %v1520_v57 = vadd.f32 %v4511_v36, %v1504_v61  ;;  %v1280_v7 = vmax.f32 %v1264_v18, 0.0 }
 0x1ea   : > { %v1921_v2 = vpop.f32.mrf.mxu0  ;;  %v1216_v54 = vpop.f32.mrf.mxu3 }
 0x1eb   : > { %v1670_v51 = vpop.f32.mrf.mxu2  ;;  %v1217_v17 = vadd.f32 %v1216_v54, %v4429_v38  ;;  %v1949_v27 = vsub.f32 %v1921_v2, %v4400_v37  ;;  %v1536_v62 = vmax.f32 %v1520_v57, 0.0 }
 0x1ec   : > { %v1694_v39 = vsub.f32 %v1670_v51, %v4424_v26  ;;  %v1475_v30 = vpop.f32.mrf.mxu1 }
 0x1ed   : > { %v1476_v3 = vadd.f32 %v1475_v30, %v4404_v48  ;;  %v1246_v29 = vmul.f32 %v4505_v31, %v1217_v17 }
 0x1ee   : > { %v1704_v47 = vpack.c.bf16 %v1694_v39, %v1693_v14 }
 0x1ef   : > { %v1505_v50 = vmul.f32 %v4505_v31, %v1476_v3  ;;  %v1265_v42 = vadd.f32 %v4511_v36, %v1246_v29 }
 0x1f0   : > { %1740 = vmatmul.bf16.gmra.mxu3 %v1704_v47 }
 0x1f1   : > { %v1521_v1 = vadd.f32 %v4511_v36, %v1505_v50  ;;  %v1281_v58 = vmax.f32 %v1265_v42, 0.0 }
 0x1f2   : > { %v1923_v43 = vpop.f32.mrf.mxu0  ;;  %v1219_v46 = vpop.f32.mrf.mxu3 }
 0x1f3   : > { %v1673_v13 = vpop.f32.mrf.mxu2  ;;  %v1950_v52 = vsub.f32 %v1923_v43, %v4402_v41  ;;  %v1537_v54 = vmax.f32 %v1521_v1, 0.0  ;;  %v2066_v61 = vpack.c.bf16 %v1281_v58, %v1280_v7  ;;  %v1220_v39 = vadd.f32 %v1219_v46, %v4446_v0  ;;  %v3601_v46 = vld [vmem:[%s5316_s10 + $0x38] sm:$0xff] }
 0x1f4   : > { %v1478_v51 = vpop.f32.mrf.mxu1  ;;  %v1695_v41 = vsub.f32 %v1673_v13, %v4442_v35  ;;  %3657 = vmatpush.bf16.msra.mxu3 %v3601_v46  ;;  %2623 = vmatpush.bf16.msrb.mxu1 %v3601_v46 }
 0x1f5   : > { %v1961_v14 = vpack.c.bf16 %v1950_v52, %v1949_v27  ;;  %v4593_v17 = vpack.c.bf16 %v1537_v54, %v1536_v62  ;;  %2186 = vmatmul.bf16.gmra.mxu0 %v2066_v61  ;;  %v1479_v37 = vadd.f32 %v1478_v51, %v4415_v22  ;;  %v1247_v2 = vmul.f32 %v4505_v31, %v1220_v39 }
 0x1f7   : > { %1993 = vmatmul.bf16.gmra.mxu1 %v1961_v14  ;;  %v1506_v3 = vmul.f32 %v4505_v31, %v1479_v37  ;;  %v1266_v27 = vadd.f32 %v4511_v36, %v1247_v2 }
 0x1f9   : > { %v1522_v43 = vadd.f32 %v4511_v36, %v1506_v3  ;;  %v1282_v54 = vmax.f32 %v1266_v27, 0.0 }
 0x1fa   : > { %v1926_v30 = vpop.f32.mrf.mxu0  ;;  %v1221_v18 = vpop.f32.mrf.mxu3 }
 0x1fb   : > { %v1675_v29 = vpop.f32.mrf.mxu2  ;;  %v1222_v47 = vadd.f32 %v1221_v18, %v4462_v32  ;;  %v1951_v13 = vsub.f32 %v1926_v30, %v4417_v23  ;;  %v1538_v14 = vmax.f32 %v1522_v43, 0.0  ;;  %v3600_v30 = vld [vmem:[%s5316_s10 + $0x30] sm:$0xff] }
 0x1fc   : > { %v1696_v57 = vsub.f32 %v1675_v29, %v4444_v59  ;;  %v1480_v50 = vpop.f32.mrf.mxu1  ;;  %2624 = vmatpush.bf16.msrb.mxu1 %v3600_v30  ;;  %3658 = vmatpush.bf16.msra.mxu3 %v3600_v30 }
 0x1fd   : > { %v1481_v42 = vadd.f32 %v1480_v50, %v4429_v38  ;;  %v1248_v1 = vmul.f32 %v4505_v31, %v1222_v47 }
 0x1fe   : > { %v1705_v7 = vpack.c.bf16 %v1696_v57, %v1695_v41 }
 0x1ff   : > { %v1507_v58 = vmul.f32 %v4505_v31, %v1481_v42  ;;  %v1267_v62 = vadd.f32 %v4511_v36, %v1248_v1 }
 0x200   : > { %1745 = vmatmul.bf16.gmra.mxu3 %v1705_v7  ;;  %v3599_v7 = vld [vmem:[%s5316_s10 + $0x28] sm:$0xff] }
 0x201   : > { %v1523_v52 = vadd.f32 %v4511_v36, %v1507_v58  ;;  %v1283_v61 = vmax.f32 %v1267_v62, 0.0  ;;  %2625 = vmatpush.bf16.msrb.mxu1 %v3599_v7  ;;  %3659 = vmatpush.bf16.msra.mxu3 %v3599_v7 }
 0x202   : > { %v1928_v51 = vpop.f32.mrf.mxu0  ;;  %v1224_v37 = vpop.f32.mrf.mxu3 }
 0x203   : > { %v1539_v39 = vmax.f32 %v1523_v52, 0.0  ;;  %v1678_v2 = vpop.f32.mrf.mxu2  ;;  %v1952_v3 = vsub.f32 %v1928_v51, %v4424_v26  ;;  %v2067_v29 = vpack.c.bf16 %v1283_v61, %v1282_v54  ;;  %v1225_v57 = vadd.f32 %v1224_v37, %v4483_v16 }
 0x204   : > { %v1483_v18 = vpop.f32.mrf.mxu1  ;;  %v1697_v43 = vsub.f32 %v1678_v2, %v4470_v49 }
 0x205   : > { %v2074_v41 = vpack.c.bf16 %v1539_v39, %v1538_v14  ;;  %v1962_v47 = vpack.c.bf16 %v1952_v3, %v1951_v13  ;;  %2191 = vmatmul.bf16.gmra.mxu0 %v2067_v29  ;;  %v1484_v23 = vadd.f32 %v1483_v18, %v4446_v0  ;;  %v1249_v50 = vmul.f32 %v4505_v31, %v1225_v57  ;;  %v3598_v39 = vld [vmem:[%s5316_s10 + $0x20] sm:$0xff] }
 0x206   : > { %2626 = vmatpush.bf16.msrb.mxu1 %v3598_v39  ;;  %3660 = vmatpush.bf16.msra.mxu3 %v3598_v39 }
 0x207   : > { %1998 = vmatmul.bf16.gmra.mxu1 %v1962_v47  ;;  %2226 = vmatmul.bf16.vlgmr.msra.gmra.mxu2 %v2074_v41  ;;  %v1508_v42 = vmul.f32 %v4505_v31, %v1484_v23  ;;  %v1268_v52 = vadd.f32 %v4511_v36, %v1249_v50  ;;  %v3597_v50 = vld [vmem:[%s5316_s10 + $0x18] sm:$0xff] }
 0x209   : > { %v1524_v61 = vadd.f32 %v4511_v36, %v1508_v42  ;;  %v1284_v18 = vmax.f32 %v1268_v52, 0.0 }
 0x20a   : > { %v1931_v26 = vpop.f32.mrf.mxu0  ;;  %v1226_v27 = vpop.f32.mrf.mxu3  ;;  %2627 = vmatpush.bf16.msrb.mxu1 %v3597_v50  ;;  %3661 = vmatpush.bf16.msra.mxu3 %v3597_v50 }
 0x20b   : > { %v1680_v1 = vpop.f32.mrf.mxu2  ;;  %v1227_v58 = vadd.f32 %v1226_v27, %v4492_v45  ;;  %v1953_v2 = vsub.f32 %v1931_v26, %v4442_v35  ;;  %v1540_v47 = vmax.f32 %v1524_v61, 0.0 }
 0x20c   : > { %v1698_v62 = vsub.f32 %v1680_v1, %v4472_v55  ;;  %v1485_v46 = vpop.f32.mrf.mxu1 }
 0x20d   : > { %v1486_v13 = vadd.f32 %v1485_v46, %v4462_v32  ;;  %v1250_v54 = vmul.f32 %v4505_v31, %v1227_v58 }
 0x20e   : > { %v1706_v51 = vpack.c.bf16 %v1698_v62, %v1697_v43 }
 0x20f   : > { %v1509_v14 = vmul.f32 %v4505_v31, %v1486_v13  ;;  %v1269_v37 = vadd.f32 %v4511_v36, %v1250_v54  ;;  %v3595_v13 = vld [vmem:[%s5316_s10 + $0x8] sm:$0xff] }
 0x210   : > { %1750 = vmatmul.bf16.gmra.mxu3 %v1706_v51 }
 0x211   : > { %v1525_v3 = vadd.f32 %v4511_v36, %v1509_v14  ;;  %v1285_v41 = vmax.f32 %v1269_v37, 0.0 }
 0x212   : > { %v1933_v29 = vpop.f32.mrf.mxu0  ;;  %v1229_v57 = vpop.f32.mrf.mxu3 }
 0x213   : > { %v1954_v23 = vsub.f32 %v1933_v29, %v4444_v59  ;;  %v1541_v30 = vmax.f32 %v1525_v3, 0.0  ;;  %v2068_v27 = vpack.c.bf16 %v1285_v41, %v1284_v18  ;;  %v1230_v26 = vadd.f32 %v1229_v57, %v4497_v5  ;;  %v3596_v59 = vld [vmem:[%s5316_s10 + $0x10] sm:$0xff] }
 0x214   : > { %v1488_v42 = vpop.f32.mrf.mxu1  ;;  %2628 = vmatpush.bf16.msrb.mxu1 %v3596_v59  ;;  %3662 = vmatpush.bf16.msra.mxu3 %v3596_v59 }
 0x215   : > { %v1963_v1 = vpack.c.bf16 %v1954_v23, %v1953_v2  ;;  %v2075_v35 = vpack.c.bf16 %v1541_v30, %v1540_v47  ;;  %2196 = vmatmul.bf16.gmra.mxu0 %v2068_v27  ;;  %v1489_v7 = vadd.f32 %v1488_v42, %v4483_v16  ;;  %v1251_v43 = vmul.f32 %v4505_v31, %v1230_v26  ;;  %v3594_v2 = vld [vmem:[%s5316_s10] sm:$0xff] }
 0x217   : > { %2003 = vmatmul.bf16.gmra.mxu1 %v1963_v1  ;;  %2231 = vmatmul.bf16.gmra.mxu2 %v2075_v35  ;;  %v1510_v62 = vmul.f32 %v4505_v31, %v1489_v7  ;;  %v1270_v61 = vadd.f32 %v4511_v36, %v1251_v43 }
 0x218   : > { %2629 = vmatpush.bf16.msrb.mxu1 %v3595_v13  ;;  %3663 = vmatpush.bf16.msra.mxu3 %v3595_v13 }
 0x219   : > { %v1526_v39 = vadd.f32 %v4511_v36, %v1510_v62  ;;  %v1286_v41 = vmax.f32 %v1270_v61, 0.0  ;;  %v4674_v61 = vld [vmem:[%s5314_s8] ss:$0 sm:$0xff] }
 0x21a   : > { %v1936_v58 = vpop.f32.mrf.mxu0  ;;  %v1231_v46 = vpop.f32.mrf.mxu3 }
 0x21b   : > { %v1232_v52 = vadd.f32 %v1231_v46, %v4514_v56  ;;  %v1955_v18 = vsub.f32 %v1936_v58, %v4470_v49  ;;  %v1542_v23 = vmax.f32 %v1526_v39, 0.0 }
 0x21c   : > { %v1490_v54 = vpop.f32.mrf.mxu1  ;;  %2630 = vmatpush.bf16.msrb.mxu1 %v3594_v2  ;;  %3664 = vmatpush.bf16.msra.mxu3 %v3594_v2 }
 0x21d   : > { %v1491_v51 = vadd.f32 %v1490_v54, %v4492_v45  ;;  %v1252_v14 = vmul.f32 %v4505_v31, %v1232_v52 }
 0x21f   : > { %v1511_v37 = vmul.f32 %v4505_v31, %v1491_v51  ;;  %v1271_v3 = vadd.f32 %v4511_v36, %v1252_v14 }
 0x221   : > { %v1527_v29 = vadd.f32 %v4511_v36, %v1511_v37  ;;  %v1287_v57 = vmax.f32 %v1271_v3, 0.0 }
 0x222   : > { %v1938_v47 = vpop.f32.mrf.mxu0  ;;  %v1716_v30 = vpop.f32.mrf.mxu3 }
 0x223   : > { %v1956_v50 = vsub.f32 %v1938_v47, %v4472_v55  ;;  %v1543_v42 = vmax.f32 %v1527_v29, 0.0  ;;  %v2069_v1 = vpack.c.bf16 %v1287_v57, %v1286_v41  ;;  %v1717_v2 = vadd.f32 %v1716_v30, %v4312_v60 }
 0x224   : > { %v1493_v27 = vpop.f32.mrf.mxu1 }
 0x225   : > { %v1964_v35 = vpack.c.bf16 %v1956_v50, %v1955_v18  ;;  %v2076_v26 = vpack.c.bf16 %v1543_v42, %v1542_v23  ;;  %2201 = vmatmul.bf16.gmra.mxu0 %v2069_v1  ;;  %v1494_v7 = vadd.f32 %v1493_v27, %v4497_v5  ;;  %v4685_v18 = vld [vmem:[%s5315_s9] ss:$0 sm:$0xff]  ;;  %v1756_v41 = vmul.f32 %v4505_v31, %v1717_v2 }
 0x227   : > { %2008 = vmatmul.bf16.gmra.mxu1 %v1964_v35  ;;  %2236 = vmatmul.bf16.gmra.mxu2 %v2076_v26  ;;  %v1512_v49 = vmul.f32 %v4505_v31, %v1494_v7  ;;  %v1772_v27 = vadd.f32 %v4511_v36, %v1756_v41 }
 0x229   : > { %v1528_v62 = vadd.f32 %v4511_v36, %v1512_v49  ;;  %v1788_v49 = vmax.f32 %v1772_v27, 0.0 }
 0x22a   : > { %v1718_v59 = vpop.f32.mrf.mxu3 }
 0x22b   : > { %v1544_v13 = vmax.f32 %v1528_v62, 0.0  ;;  %v1719_v39 = vadd.f32 %v1718_v59, %v4331_v8 }
 0x22c   : > { %v1495_v43 = vpop.f32.mrf.mxu1 }
 0x22d   : > { %v1496_v58 = vadd.f32 %v1495_v43, %v4514_v56  ;;  %v1757_v29 = vmul.f32 %v4505_v31, %v1719_v39 }
 0x22f   : > { %v1513_v55 = vmul.f32 %v4505_v31, %v1496_v58  ;;  %v1773_v30 = vadd.f32 %v4511_v36, %v1757_v29 }
 0x231   : > { %v1529_v46 = vadd.f32 %v4511_v36, %v1513_v55  ;;  %v1789_v26 = vmax.f32 %v1773_v30, 0.0 }
 0x232   : > { %v2167_v54 = vpop.f32.mrf.mxu0 }
 0x233   : > { %v1721_v52 = vpop.f32.mrf.mxu3  ;;  %v1545_v51 = vmax.f32 %v1529_v46, 0.0  ;;  %v2331_v3 = vmul.f32 %v4674_v61, %v2167_v54  ;;  %v2078_v55 = vpack.c.bf16 %v1789_v26, %v1788_v49 }
 0x234   : > { %v4676_v14 = vpop.f32.mrf.mxu1  ;;  %v1722_v46 = vadd.f32 %v1721_v52, %v4343_v20 }
 0x235   : > { %v2077_v37 = vpack.c.bf16 %v1545_v51, %v1544_v13  ;;  %2206 = vmatmul.bf16.gmra.mxu0 %v4539_v9  ;;  %v2399_v23 = vadd.f32 %v4685_v18, %v2331_v3 }
 0x236   : > { %v1758_v51 = vmul.f32 %v4505_v31, %v1722_v46 }
 0x237   : > { %2241 = vmatmul.bf16.gmra.mxu2 %v2077_v37  ;;  %v2463_v1 = vmax.f32 %v2399_v23, 0.0 }
 0x238   : > { %v1774_v52 = vadd.f32 %v4511_v36, %v1758_v51 }
 0x23a   : > { %v2169_v57 = vpop.f32.mrf.mxu0  ;;  %v1790_v30 = vmax.f32 %v1774_v52, 0.0 }
 0x23b   : > { %v1723_v47 = vpop.f32.mrf.mxu3  ;;  %v2332_v9 = vmul.f32 %v4674_v61, %v2169_v57 }
 0x23c   : > { %v4691_v50 = vpop.f32.mrf.mxu1  ;;  %v1724_v62 = vadd.f32 %v1723_v47, %v4355_v34 }
 0x23d   : > { %v2400_v42 = vadd.f32 %v4685_v18, %v2332_v9 }
 0x23e   : > { %v1759_v54 = vmul.f32 %v4505_v31, %v1724_v62 }
 0x23f   : > { %v2464_v35 = vmax.f32 %v2400_v42, 0.0 }
 0x240   : > { %v1775_v41 = vadd.f32 %v4511_v36, %v1759_v54 }
 0x241   : > { %v2527_v7 = vpack.c.bf16 %v2464_v35, %v2463_v1 }
 0x242   : > { %v2172_v43 = vpop.f32.mrf.mxu0  ;;  %v1791_v23 = vmax.f32 %v1775_v41, 0.0 }
 0x243   : > { %v1726_v59 = vpop.f32.mrf.mxu3  ;;  %2631 = vmatmul.bf16.vlgmr.msrb.gmra.mxu1 %v2527_v7  ;;  %v2333_v13 = vmul.f32 %v4674_v61, %v2172_v43 }
 0x244   : > { %v4696_v58 = vpop.f32.mrf.mxu1  ;;  %v2079_v26 = vpack.c.bf16 %v1791_v23, %v1790_v30  ;;  %v1727_v7 = vadd.f32 %v1726_v59, %v4371_v53 }
 0x245   : > { %2211 = vmatmul.bf16.gmra.mxu0 %v4557_v44  ;;  %v2401_v2 = vadd.f32 %v4685_v18, %v2333_v13 }
 0x246   : > { %v1760_v62 = vmul.f32 %v4505_v31, %v1727_v7 }
 0x247   : > { %2246 = vmatmul.bf16.gmra.mxu2 %v2078_v55  ;;  %v2465_v47 = vmax.f32 %v2401_v2, 0.0 }
 0x248   : > { %v1776_v59 = vadd.f32 %v4511_v36, %v1760_v62 }
 0x24a   : > { %v2174_v37 = vpop.f32.mrf.mxu0 }
 0x24b   : > { %v1728_v39 = vpop.f32.mrf.mxu3  ;;  %v2334_v3 = vmul.f32 %v4674_v61, %v2174_v37 }
 0x24c   : > { %v4706_v29 = vpop.f32.mrf.mxu1  ;;  %v1729_v35 = vadd.f32 %v1728_v39, %v4379_v11 }
 0x24d   : > { %v2402_v44 = vadd.f32 %v4685_v18, %v2334_v3 }
 0x24e   : > { %v1761_v43 = vmul.f32 %v4505_v31, %v1729_v35 }
 0x24f   : > { %v2466_v57 = vmax.f32 %v2402_v44, 0.0  ;;  %v1792_v44 = vmax.f32 %v1776_v59, 0.0 }
 0x250   : > { %v1777_v39 = vadd.f32 %v4511_v36, %v1761_v43 }
 0x251   : > { %v2528_v9 = vpack.c.bf16 %v2466_v57, %v2465_v47 }
 0x252   : > { %v2177_v27 = vpop.f32.mrf.mxu0  ;;  %v1793_v3 = vmax.f32 %v1777_v39, 0.0 }
 0x253   : > { %v1731_v42 = vpop.f32.mrf.mxu3  ;;  %2636 = vmatmul.bf16.gmra.mxu1 %v2528_v9  ;;  %v2335_v49 = vmul.f32 %v4674_v61, %v2177_v27 }
 0x254   : > { %v4711_v1 = vpop.f32.mrf.mxu1  ;;  %v2080_v9 = vpack.c.bf16 %v1793_v3, %v1792_v44  ;;  %v1732_v30 = vadd.f32 %v1731_v42, %v4393_v28 }
 0x255   : > { %2216 = vmatmul.bf16.gmra.mxu0 %v4575_v6  ;;  %v2403_v13 = vadd.f32 %v4685_v18, %v2335_v49 }
 0x257   : > { %2251 = vmatmul.bf16.gmra.mxu2 %v2079_v26  ;;  %v2467_v37 = vmax.f32 %v2403_v13, 0.0  ;;  %v1762_v26 = vmul.f32 %v4505_v31, %v1732_v30 }
 0x259   : > { %v1778_v42 = vadd.f32 %v4511_v36, %v1762_v26 }
 0x25a   : > { %v2179_v46 = vpop.f32.mrf.mxu0 }
 0x25b   : > { %v1733_v55 = vpop.f32.mrf.mxu3  ;;  %v2336_v54 = vmul.f32 %v4674_v61, %v2179_v46  ;;  %v1794_v59 = vmax.f32 %v1778_v42, 0.0 }
 0x25c   : > { %v4721_v51 = vpop.f32.mrf.mxu1  ;;  %v1734_v23 = vadd.f32 %v1733_v55, %v4404_v48 }
 0x25d   : > { %v2404_v6 = vadd.f32 %v4685_v18, %v2336_v54 }
 0x25e   : > { %v1763_v35 = vmul.f32 %v4505_v31, %v1734_v23 }
 0x25f   : > { %v2468_v2 = vmax.f32 %v2404_v6, 0.0 }
 0x260   : > { %v1779_v55 = vadd.f32 %v4511_v36, %v1763_v35 }
 0x261   : > { %v2529_v41 = vpack.c.bf16 %v2468_v2, %v2467_v37 }
 0x262   : > { %v2182_v47 = vpop.f32.mrf.mxu0  ;;  %v1795_v39 = vmax.f32 %v1779_v55, 0.0 }
 0x263   : > { %v1736_v52 = vpop.f32.mrf.mxu3  ;;  %2641 = vmatmul.bf16.gmra.mxu1 %v2529_v41  ;;  %v2337_v27 = vmul.f32 %v4674_v61, %v2182_v47 }
 0x264   : > { %v4726_v57 = vpop.f32.mrf.mxu1  ;;  %v2081_v44 = vpack.c.bf16 %v1795_v39, %v1794_v59  ;;  %v1737_v47 = vadd.f32 %v1736_v52, %v4415_v22 }
 0x265   : > { %2221 = vmatmul.bf16.gmra.mxu0 %v4593_v17  ;;  %v2405_v43 = vadd.f32 %v4685_v18, %v2337_v27 }
 0x266   : > { %v1764_v30 = vmul.f32 %v4505_v31, %v1737_v47 }
 0x267   : > { %2256 = vmatmul.bf16.gmra.mxu2 %v2080_v9  ;;  %v2469_v13 = vmax.f32 %v2405_v43, 0.0 }
 0x268   : > { %v1780_v52 = vadd.f32 %v4511_v36, %v1764_v30 }
 0x26a   : > { %v2184_v49 = vpop.f32.mrf.mxu0 }
 0x26b   : > { %v1738_v7 = vpop.f32.mrf.mxu3  ;;  %v2338_v62 = vmul.f32 %v4674_v61, %v2184_v49 }
 0x26c   : > { %v4736_v46 = vpop.f32.mrf.mxu1  ;;  %v1739_v41 = vadd.f32 %v1738_v7, %v4429_v38 }
 0x26d   : > { %v2406_v17 = vadd.f32 %v4685_v18, %v2338_v62 }
 0x26e   : > { %v1765_v9 = vmul.f32 %v4505_v31, %v1739_v41 }
 0x26f   : > { %v2470_v54 = vmax.f32 %v2406_v17, 0.0 }
 0x270   : > { %v1781_v43 = vadd.f32 %v4511_v36, %v1765_v9 }
 0x271   : > { %v2530_v6 = vpack.c.bf16 %v2470_v54, %v2469_v13  ;;  %v1796_v54 = vmax.f32 %v1780_v52, 0.0 }
 0x272   : > { %v2187_v2 = vpop.f32.mrf.mxu0  ;;  %v1797_v42 = vmax.f32 %v1781_v43, 0.0 }
 0x273   : > { %v1741_v37 = vpop.f32.mrf.mxu3  ;;  %2646 = vmatmul.bf16.gmra.mxu1 %v2530_v6  ;;  %v2339_v23 = vmul.f32 %v4674_v61, %v2187_v2 }
 0x274   : > { %v4741_v3 = vpop.f32.mrf.mxu1  ;;  %v2082_v2 = vpack.c.bf16 %v1797_v42, %v1796_v54  ;;  %v1742_v41 = vadd.f32 %v1741_v37, %v4446_v0 }
 0x275   : > { %v2407_v26 = vadd.f32 %v4685_v18, %v2339_v23 }
 0x276   : > { %v1766_v30 = vmul.f32 %v4505_v31, %v1742_v41 }
 0x277   : > { %2261 = vmatmul.bf16.gmra.mxu2 %v2081_v44  ;;  %v2471_v55 = vmax.f32 %v2407_v26, 0.0 }
 0x27a   : > { %v2189_v35 = vpop.f32.mrf.mxu0 }
 0x27b   : > { %v1743_v27 = vpop.f32.mrf.mxu3  ;;  %v2340_v49 = vmul.f32 %v4674_v61, %v2189_v35 }
 0x27c   : > { %v4751_v62 = vpop.f32.mrf.mxu1  ;;  %v1744_v59 = vadd.f32 %v1743_v27, %v4462_v32 }
 0x27d   : > { %v2408_v7 = vadd.f32 %v4685_v18, %v2340_v49 }
 0x27e   : > { %v1767_v23 = vmul.f32 %v4505_v31, %v1744_v59 }
 0x27f   : > { %v2472_v17 = vmax.f32 %v2408_v7, 0.0  ;;  %v1782_v7 = vadd.f32 %v4511_v36, %v1766_v30 }
 0x280   : > { %v1783_v27 = vadd.f32 %v4511_v36, %v1767_v23 }
 0x281   : > { %v2531_v13 = vpack.c.bf16 %v2472_v17, %v2471_v55  ;;  %v1798_v59 = vmax.f32 %v1782_v7, 0.0 }
 0x282   : > { %v2192_v39 = vpop.f32.mrf.mxu0 }
 0x283   : > { %v1746_v6 = vpop.f32.mrf.mxu3  ;;  %2651 = vmatmul.bf16.gmra.mxu1 %v2531_v13  ;;  %v2341_v47 = vmul.f32 %v4674_v61, %v2192_v39  ;;  %v1799_v13 = vmax.f32 %v1783_v27, 0.0 }
 0x284   : > { %v4757_v44 = vpop.f32.mrf.mxu1 }
 0x285   : > { %v2409_v26 = vadd.f32 %v4685_v18, %v2341_v47 }
 0x287   : > { %2266 = vmatmul.bf16.gmra.mxu2 %v2082_v2  ;;  %v2473_v55 = vmax.f32 %v2409_v26, 0.0 }
 0x28a   : > { %v2227_v9 = vpop.f32.mrf.mxu2  ;;  %v2194_v35 = vpop.f32.mrf.mxu0 }
 0x28b   : > { %v2342_v49 = vmul.f32 %v4674_v61, %v2194_v35  ;;  %v1748_v43 = vpop.f32.mrf.mxu3  ;;  %v2355_v52 = vmul.f32 %v4674_v61, %v2227_v9  ;;  %v2083_v35 = vpack.c.bf16 %v1799_v13, %v1798_v59  ;;  %v1747_v9 = vadd.f32 %v1746_v6, %v4483_v16 }
 0x28c   : > { %v4768_v42 = vpop.f32.mrf.mxu1  ;;  %v1749_v23 = vadd.f32 %v1748_v43, %v4492_v45 }
 0x28d   : > { %v2410_v37 = vadd.f32 %v4685_v18, %v2342_v49  ;;  %v2423_v2 = vadd.f32 %v4685_v18, %v2355_v52 }
 0x28e   : > { %v1769_v7 = vmul.f32 %v4505_v31, %v1749_v23 }
 0x28f   : > { %v2474_v17 = vmax.f32 %v2410_v37, 0.0  ;;  %v2487_v26 = vmax.f32 %v2423_v2, 0.0 }
 0x291   : > { %v2532_v39 = vpack.c.bf16 %v2474_v17, %v2473_v55  ;;  %v1768_v17 = vmul.f32 %v4505_v31, %v1747_v9 }
 0x292   : > { %v2229_v54 = vpop.f32.mrf.mxu2  ;;  %v2197_v41 = vpop.f32.mrf.mxu0 }
 0x293   : > { %v2356_v47 = vmul.f32 %v4674_v61, %v2229_v54  ;;  %2656 = vmatmul.bf16.gmra.mxu1 %v2532_v39  ;;  %v1751_v27 = vpop.f32.mrf.mxu3  ;;  %v2343_v37 = vmul.f32 %v4674_v61, %v2197_v41  ;;  %v1785_v39 = vadd.f32 %v4511_v36, %v1769_v7  ;;  %v1784_v2 = vadd.f32 %v4511_v36, %v1768_v17 }
 0x294   : > { %v4778_v54 = vpop.f32.mrf.mxu1 }
 0x295   : > { %v2424_v30 = vadd.f32 %v4685_v18, %v2356_v47  ;;  %v2411_v13 = vadd.f32 %v4685_v18, %v2343_v37 }
 0x297   : > { %v2488_v49 = vmax.f32 %v2424_v30, 0.0  ;;  %2271 = vmatmul.bf16.gmra.mxu2 %v2083_v35  ;;  %v2475_v47 = vmax.f32 %v2411_v13, 0.0  ;;  %v1801_v30 = vmax.f32 %v1785_v39, 0.0  ;;  %v1752_v13 = vadd.f32 %v1751_v27, %v4497_v5 }
 0x299   : > { %v2539_v52 = vpack.c.bf16 %v2488_v49, %v2487_v26  ;;  %v1800_v49 = vmax.f32 %v1784_v2, 0.0 }
 0x29a   : > { %v2232_v55 = vpop.f32.mrf.mxu2  ;;  %v2199_v43 = vpop.f32.mrf.mxu0 }
 0x29b   : > { %2691 = vmatmul.bf16.vlgmr.msra.gmra.mxu3 %v2539_v52  ;;  %v2344_v6 = vmul.f32 %v4674_v61, %v2199_v43  ;;  %v2357_v41 = vmul.f32 %v4674_v61, %v2232_v55  ;;  %v1753_v35 = vpop.f32.mrf.mxu3  ;;  %v2084_v55 = vpack.c.bf16 %v1801_v30, %v1800_v49 }
 0x29c   : > { %v1754_v7 = vadd.f32 %v1753_v35, %v4514_v56 }
 0x29d   : > { %v2412_v59 = vadd.f32 %v4685_v18, %v2344_v6  ;;  %v2425_v52 = vadd.f32 %v4685_v18, %v2357_v41  ;;  %v4789_v6 = vpop.f32.mrf.mxu1 }
 0x29e   : > { %v1771_v41 = vmul.f32 %v4505_v31, %v1754_v7 }
 0x29f   : > { %v2476_v23 = vmax.f32 %v2412_v59, 0.0  ;;  %v2489_v39 = vmax.f32 %v2425_v52, 0.0 }
 0x2a0   : > { %v1787_v30 = vadd.f32 %v4511_v36, %v1771_v41  ;;  %v1977_v41 = vadd.f32 %v4691_v50, %v4331_v8 }
 0x2a1   : > { %v2533_v26 = vpack.c.bf16 %v2476_v23, %v2475_v47 }
 0x2a2   : > { %v2234_v9 = vpop.f32.mrf.mxu2  ;;  %v2202_v37 = vpop.f32.mrf.mxu0 }
 0x2a3   : > { %v2358_v43 = vmul.f32 %v4674_v61, %v2234_v9  ;;  %2661 = vmatmul.bf16.gmra.mxu1 %v2533_v26  ;;  %v2345_v2 = vmul.f32 %v4674_v61, %v2202_v37  ;;  %v1770_v9 = vmul.f32 %v4505_v31, %v1752_v13 }
 0x2a5   : > { %v2426_v17 = vadd.f32 %v4685_v18, %v2358_v43  ;;  %v2413_v35 = vadd.f32 %v4685_v18, %v2345_v2  ;;  %v1786_v49 = vadd.f32 %v4511_v36, %v1770_v9  ;;  %v4801_v52 = vpop.f32.mrf.mxu1 }
 0x2a7   : > { %v2490_v59 = vmax.f32 %v2426_v17, 0.0  ;;  %2276 = vmatmul.bf16.gmra.mxu2 %v2084_v55  ;;  %v2477_v7 = vmax.f32 %v2413_v35, 0.0  ;;  %v1803_v55 = vmax.f32 %v1787_v30, 0.0  ;;  %v4815_v30 = vld [vmem:[%s5311_s5] ss:$0 sm:$0xff] }
 0x2a9   : > { %v2540_v47 = vpack.c.bf16 %v2490_v59, %v2489_v39  ;;  %v1802_v39 = vmax.f32 %v1786_v49, 0.0 }
 0x2aa   : > { %v2237_v23 = vpop.f32.mrf.mxu2  ;;  %v2204_v26 = vpop.f32.mrf.mxu0 }
 0x2ab   : > { %2696 = vmatmul.bf16.gmra.mxu3 %v2540_v47  ;;  %v2346_v43 = vmul.f32 %v4674_v61, %v2204_v26  ;;  %v2359_v37 = vmul.f32 %v4674_v61, %v2237_v23  ;;  %v2085_v9 = vpack.c.bf16 %v1803_v55, %v1802_v39  ;;  %v1975_v23 = vadd.f32 %v4676_v14, %v4312_v60 }
 0x2ad   : > { %v2414_v27 = vadd.f32 %v4685_v18, %v2346_v43  ;;  %v2427_v59 = vadd.f32 %v4685_v18, %v2359_v37  ;;  %v4818_v49 = vpop.f32.mrf.mxu1  ;;  %v2014_v37 = vmul.f32 %v4815_v30, %v1975_v23 }
 0x2af   : > { %v2478_v17 = vmax.f32 %v2414_v27, 0.0  ;;  %v2491_v26 = vmax.f32 %v2427_v59, 0.0  ;;  %v2015_v27 = vmul.f32 %v4815_v30, %v1977_v41 }
 0x2b1   : > { %v2534_v13 = vpack.c.bf16 %v2478_v17, %v2477_v7  ;;  %v4826_v17 = vld [vmem:[%s5312_s6] ss:$0 sm:$0xff] }
 0x2b2   : > { %v2239_v31 = vpop.f32.mrf.mxu2  ;;  %v2207_v2 = vpop.f32.mrf.mxu0  ;;  %v2031_v55 = vadd.f32 %v4826_v17, %v2015_v27  ;;  %v1982_v27 = vadd.f32 %v4706_v29, %v4355_v34 }
 0x2b3   : > { %v2360_v47 = vmul.f32 %v4674_v61, %v2239_v31  ;;  %2666 = vmatmul.bf16.gmra.mxu1 %v2534_v13  ;;  %v2347_v43 = vmul.f32 %v4674_v61, %v2207_v2  ;;  %v2030_v13 = vadd.f32 %v4826_v17, %v2014_v37  ;;  %v1980_v37 = vadd.f32 %v4696_v58, %v4343_v20 }
 0x2b4   : > { %v2047_v41 = vmax.f32 %v2031_v55, 0.0  ;;  %v2017_v55 = vmul.f32 %v4815_v30, %v1982_v27 }
 0x2b5   : > { %v2428_v36 = vadd.f32 %v4685_v18, %v2360_v47  ;;  %v2415_v60 = vadd.f32 %v4685_v18, %v2347_v43  ;;  %v2046_v23 = vmax.f32 %v2030_v13, 0.0 }
 0x2b6   : > { %v2033_v20 = vadd.f32 %v4826_v17, %v2017_v55 }
 0x2b7   : > { %v2492_v35 = vmax.f32 %v2428_v36, 0.0  ;;  %2281 = vmatmul.bf16.gmra.mxu2 %v2085_v9  ;;  %v2479_v59 = vmax.f32 %v2415_v60, 0.0 }
 0x2b9   : > { %v2541_v8 = vpack.c.bf16 %v2492_v35, %v2491_v26 }
 0x2ba   : > { %v2242_v50 = vpop.f32.mrf.mxu2  ;;  %v2209_v7 = vpop.f32.mrf.mxu0 }
 0x2bb   : > { %2701 = vmatmul.bf16.gmra.mxu3 %v2541_v8  ;;  %v2348_v14 = vmul.f32 %v4674_v61, %v2209_v7  ;;  %v2361_v39 = vmul.f32 %v4674_v61, %v2242_v50  ;;  %v2086_v50 = vpack.c.bf16 %v2047_v41, %v2046_v23 }
 0x2bd   : > { %v2416_v31 = vadd.f32 %v4685_v18, %v2348_v14  ;;  %v2429_v26 = vadd.f32 %v4685_v18, %v2361_v39 }
 0x2bf   : > { %v2480_v2 = vmax.f32 %v2416_v31, 0.0  ;;  %v2493_v7 = vmax.f32 %v2429_v26, 0.0 }
 0x2c0   : > { %v4832_v47 = vpop.f32.mrf.mxu1 }
 0x2c1   : > { %v2535_v9 = vpack.c.bf16 %v2480_v2, %v2479_v59  ;;  %v2016_v59 = vmul.f32 %v4815_v30, %v1980_v37 }
 0x2c2   : > { %v2244_v36 = vpop.f32.mrf.mxu2  ;;  %v2212_v35 = vpop.f32.mrf.mxu0 }
 0x2c3   : > { %v2362_v43 = vmul.f32 %v4674_v61, %v2244_v36  ;;  %2671 = vmatmul.bf16.gmra.mxu1 %v2535_v9  ;;  %v2349_v14 = vmul.f32 %v4674_v61, %v2212_v35  ;;  %v2032_v41 = vadd.f32 %v4826_v17, %v2016_v59  ;;  %v2049_v35 = vmax.f32 %v2033_v20, 0.0 }
 0x2c5   : > { %v2430_v8 = vadd.f32 %v4685_v18, %v2362_v43  ;;  %v2417_v29 = vadd.f32 %v4685_v18, %v2349_v14 }
 0x2c7   : > { %v2494_v60 = vmax.f32 %v2430_v8, 0.0  ;;  %2286 = vmatmul.bf16.gmra.mxu2 %v2086_v50  ;;  %v2481_v9 = vmax.f32 %v2417_v29, 0.0  ;;  %v2048_v8 = vmax.f32 %v2032_v41, 0.0 }
 0x2c8   : > { %v4843_v31 = vpop.f32.mrf.mxu1 }
 0x2c9   : > { %v2542_v13 = vpack.c.bf16 %v2494_v60, %v2493_v7  ;;  %v1987_v60 = vadd.f32 %v4721_v51, %v4379_v11  ;;  %v2087_v55 = vpack.c.bf16 %v2049_v35, %v2048_v8 }
 0x2ca   : > { %v2247_v39 = vpop.f32.mrf.mxu2  ;;  %v2214_v34 = vpop.f32.mrf.mxu0 }
 0x2cb   : > { %2706 = vmatmul.bf16.gmra.mxu3 %v2542_v13  ;;  %v2350_v2 = vmul.f32 %v4674_v61, %v2214_v34  ;;  %v2363_v36 = vmul.f32 %v4674_v61, %v2247_v39  ;;  %v1985_v13 = vadd.f32 %v4711_v1, %v4371_v53  ;;  %v2019_v29 = vmul.f32 %v4815_v30, %v1987_v60 }
 0x2cd   : > { %v2418_v58 = vadd.f32 %v4685_v18, %v2350_v2  ;;  %v2431_v50 = vadd.f32 %v4685_v18, %v2363_v36  ;;  %v2018_v41 = vmul.f32 %v4815_v30, %v1985_v13  ;;  %v2035_v53 = vadd.f32 %v4826_v17, %v2019_v29 }
 0x2ce   : > { %v1992_v13 = vadd.f32 %v4736_v46, %v4404_v48 }
 0x2cf   : > { %v2482_v23 = vmax.f32 %v2418_v58, 0.0  ;;  %v2495_v39 = vmax.f32 %v2431_v50, 0.0  ;;  %v2051_v8 = vmax.f32 %v2035_v53, 0.0 }
 0x2d0   : > { %v4852_v26 = vpop.f32.mrf.mxu1 }
 0x2d1   : > { %v2536_v27 = vpack.c.bf16 %v2482_v23, %v2481_v9  ;;  %v2034_v9 = vadd.f32 %v4826_v17, %v2018_v41  ;;  %v2021_v41 = vmul.f32 %v4815_v30, %v1992_v13  ;;  %v1997_v13 = vadd.f32 %v4751_v62, %v4429_v38 }
 0x2d2   : > { %v2249_v43 = vpop.f32.mrf.mxu2  ;;  %v2217_v37 = vpop.f32.mrf.mxu0 }
 0x2d3   : > { %v2364_v7 = vmul.f32 %v4674_v61, %v2249_v43  ;;  %2676 = vmatmul.bf16.gmra.mxu1 %v2536_v27  ;;  %v2351_v34 = vmul.f32 %v4674_v61, %v2217_v37 }
 0x2d5   : > { %v2432_v14 = vadd.f32 %v4685_v18, %v2364_v7  ;;  %v2419_v51 = vadd.f32 %v4685_v18, %v2351_v34  ;;  %v2050_v7 = vmax.f32 %v2034_v9, 0.0  ;;  %v1990_v34 = vadd.f32 %v4726_v57, %v4393_v28 }
 0x2d6   : > { %v2037_v28 = vadd.f32 %v4826_v17, %v2021_v41 }
 0x2d7   : > { %v2496_v59 = vmax.f32 %v2432_v14, 0.0  ;;  %2291 = vmatmul.bf16.gmra.mxu2 %v2087_v55  ;;  %v2483_v35 = vmax.f32 %v2419_v51, 0.0  ;;  %v2020_v53 = vmul.f32 %v4815_v30, %v1990_v34  ;;  %v1995_v34 = vadd.f32 %v4741_v3, %v4415_v22 }
 0x2d8   : > { %v4863_v2 = vpop.f32.mrf.mxu1 }
 0x2d9   : > { %v2543_v20 = vpack.c.bf16 %v2496_v59, %v2495_v39  ;;  %v2088_v59 = vpack.c.bf16 %v2051_v8, %v2050_v7  ;;  %v2036_v9 = vadd.f32 %v4826_v17, %v2020_v53  ;;  %v2022_v53 = vmul.f32 %v4815_v30, %v1995_v34 }
 0x2da   : > { %v2252_v58 = vpop.f32.mrf.mxu2  ;;  %v2219_v11 = vpop.f32.mrf.mxu0 }
 0x2db   : > { %2711 = vmatmul.bf16.gmra.mxu3 %v2543_v20  ;;  %v2352_v36 = vmul.f32 %v4674_v61, %v2219_v11  ;;  %v2365_v23 = vmul.f32 %v4674_v61, %v2252_v58  ;;  %v2038_v62 = vadd.f32 %v4826_v17, %v2022_v53  ;;  %v2005_v53 = vadd.f32 %v4778_v54, %v4483_v16  ;;  %v4938_v16 = vld [vmem:[%s5318_s12] ss:$0 sm:$0xff] }
 0x2dd   : > { %v2420_v1 = vadd.f32 %v4685_v18, %v2352_v36  ;;  %v2433_v60 = vadd.f32 %v4685_v18, %v2365_v23 }
 0x2df   : > { %v2484_v43 = vmax.f32 %v2420_v1, 0.0  ;;  %v2497_v29 = vmax.f32 %v2433_v60, 0.0  ;;  %v2052_v60 = vmax.f32 %v2036_v9, 0.0  ;;  %v2002_v9 = vadd.f32 %v4768_v42, %v4462_v32 }
 0x2e0   : > { %v4872_v27 = vpop.f32.mrf.mxu1 }
 0x2e1   : > { %v2537_v37 = vpack.c.bf16 %v2484_v43, %v2483_v35 }
 0x2e2   : > { %v2254_v50 = vpop.f32.mrf.mxu2  ;;  %v2222_v14 = vpop.f32.mrf.mxu0 }
 0x2e3   : > { %v2366_v55 = vmul.f32 %v4674_v61, %v2254_v50  ;;  %2681 = vmatmul.bf16.gmra.mxu1 %v2537_v37  ;;  %v2353_v58 = vmul.f32 %v4674_v61, %v2222_v14  ;;  %v2053_v50 = vmax.f32 %v2037_v28, 0.0 }
 0x2e5   : > { %v2434_v39 = vadd.f32 %v4685_v18, %v2366_v55  ;;  %v2421_v46 = vadd.f32 %v4685_v18, %v2353_v58  ;;  %v2023_v58 = vmul.f32 %v4815_v30, %v1997_v13 }
 0x2e7   : > { %v2498_v20 = vmax.f32 %v2434_v39, 0.0  ;;  %2296 = vmatmul.bf16.gmra.mxu2 %v2088_v59  ;;  %v2485_v35 = vmax.f32 %v2421_v46, 0.0  ;;  %v2089_v59 = vpack.c.bf16 %v2053_v50, %v2052_v60  ;;  %v2039_v38 = vadd.f32 %v4826_v17, %v2023_v58 }
 0x2e8   : > { %v4883_v11 = vpop.f32.mrf.mxu1  ;;  %v2007_v58 = vadd.f32 %v4789_v6, %v4492_v45  ;;  %v2026_v45 = vmul.f32 %v4815_v30, %v2005_v53 }
 0x2e9   : > { %v2544_v51 = vpack.c.bf16 %v2498_v20, %v2497_v29  ;;  %v2055_v22 = vmax.f32 %v2039_v38, 0.0 }
 0x2ea   : > { %v2257_v36 = vpop.f32.mrf.mxu2  ;;  %v2224_v48 = vpop.f32.mrf.mxu0 }
 0x2eb   : > { %2716 = vmatmul.bf16.gmra.mxu3 %v2544_v51  ;;  %v2354_v1 = vmul.f32 %v4674_v61, %v2224_v48  ;;  %v2367_v23 = vmul.f32 %v4674_v61, %v2257_v36 }
 0x2ed   : > { %v2422_v57 = vadd.f32 %v4685_v18, %v2354_v1  ;;  %v2435_v14 = vadd.f32 %v4685_v18, %v2367_v23  ;;  %v2054_v1 = vmax.f32 %v2038_v62, 0.0 }
 0x2ef   : > { %v2486_v43 = vmax.f32 %v2422_v57, 0.0  ;;  %v2499_v29 = vmax.f32 %v2435_v14, 0.0 }
 0x2f0   : > { %v4892_v8 = vpop.f32.mrf.mxu1 }
 0x2f1   : > { %v2538_v7 = vpack.c.bf16 %v2486_v43, %v2485_v35  ;;  %v2090_v35 = vpack.c.bf16 %v2055_v22, %v2054_v1  ;;  %v2000_v43 = vadd.f32 %v4757_v44, %v4446_v0  ;;  %v2027_v22 = vmul.f32 %v4815_v30, %v2007_v58 }
 0x2f2   : > { %v2259_v37 = vpop.f32.mrf.mxu2 }
 0x2f3   : > { %v2368_v55 = vmul.f32 %v4674_v61, %v2259_v37  ;;  %2686 = vmatmul.bf16.gmra.mxu1 %v2538_v7  ;;  %v2025_v7 = vmul.f32 %v4815_v30, %v2002_v9  ;;  %v2024_v13 = vmul.f32 %v4815_v30, %v2000_v43  ;;  %v2043_v54 = vadd.f32 %v4826_v17, %v2027_v22 }
 0x2f5   : > { %v2436_v39 = vadd.f32 %v4685_v18, %v2368_v55  ;;  %v2040_v32 = vadd.f32 %v4826_v17, %v2024_v13 }
 0x2f7   : > { %v2500_v20 = vmax.f32 %v2436_v39, 0.0  ;;  %2301 = vmatmul.bf16.gmra.mxu2 %v2089_v59  ;;  %v2041_v39 = vadd.f32 %v4826_v17, %v2025_v7  ;;  %v2056_v44 = vmax.f32 %v2040_v32, 0.0 }
 0x2f8   : > { %v4902_v41 = vpop.f32.mrf.mxu1 }
 0x2f9   : > { %v2545_v51 = vpack.c.bf16 %v2500_v20, %v2499_v29  ;;  %v2057_v34 = vmax.f32 %v2041_v39, 0.0 }
 0x2fa   : > { %v2262_v36 = vpop.f32.mrf.mxu2 }
 0x2fb   : > { %2721 = vmatmul.bf16.gmra.mxu3 %v2545_v51  ;;  %v2369_v48 = vmul.f32 %v4674_v61, %v2262_v36  ;;  %v2091_v36 = vpack.c.bf16 %v2057_v34, %v2056_v44  ;;  %v2012_v34 = vadd.f32 %v4818_v49, %v4514_v56 }
 0x2fd   : > { %v2437_v28 = vadd.f32 %v4685_v18, %v2369_v48  ;;  %v4930_v48 = vld [vmem:[%s5317_s11] ss:$0 sm:$0xff] }
 0x2ff   : > { %v2501_v50 = vmax.f32 %v2437_v28, 0.0 }
 0x300   : > { %v2652_v46 = vpop.f32.mrf.mxu1 }
 0x301   : > { %v2804_v6 = vmul.f32 %v4930_v48, %v2652_v46 }
 0x302   : > { %v2264_v3 = vpop.f32.mrf.mxu2 }
 0x303   : > { %v2370_v57 = vmul.f32 %v4674_v61, %v2264_v3  ;;  %v2872_v9 = vadd.f32 %v4938_v16, %v2804_v6 }
 0x305   : > { %v2438_v23 = vadd.f32 %v4685_v18, %v2370_v57  ;;  %v2042_v57 = vadd.f32 %v4826_v17, %v2026_v45 }
 0x307   : > { %v2502_v37 = vmax.f32 %v2438_v23, 0.0  ;;  %2306 = vmatmul.bf16.gmra.mxu2 %v2090_v35  ;;  %v2058_v7 = vmax.f32 %v2042_v57, 0.0 }
 0x308   : > { %v2654_v60 = vpop.f32.mrf.mxu1 }
 0x309   : > { %v2546_v14 = vpack.c.bf16 %v2502_v37, %v2501_v50  ;;  %v2059_v37 = vmax.f32 %v2043_v54, 0.0  ;;  %v2805_v13 = vmul.f32 %v4930_v48, %v2654_v60 }
 0x30a   : > { %v2267_v55 = vpop.f32.mrf.mxu2 }
 0x30b   : > { %2726 = vmatmul.bf16.gmra.mxu3 %v2546_v14  ;;  %v2371_v42 = vmul.f32 %v4674_v61, %v2267_v55  ;;  %v2936_v14 = vmax.f32 %v2872_v9, 0.0 }
 0x30d   : > { %v2439_v29 = vadd.f32 %v4685_v18, %v2371_v42 }
 0x30f   : > { %v2503_v38 = vmax.f32 %v2439_v29, 0.0  ;;  %v2092_v29 = vpack.c.bf16 %v2059_v37, %v2058_v7 }
 0x310   : > { %v2657_v59 = vpop.f32.mrf.mxu1 }
 0x312   : > { %v2269_v0 = vpop.f32.mrf.mxu2 }
 0x313   : > { %v2372_v20 = vmul.f32 %v4674_v61, %v2269_v0 }
 0x315   : > { %v2440_v51 = vadd.f32 %v4685_v18, %v2372_v20  ;;  %v2010_v20 = vadd.f32 %v4801_v52, %v4497_v5 }
 0x317   : > { %v2504_v62 = vmax.f32 %v2440_v51, 0.0  ;;  %2311 = vmatmul.bf16.gmra.mxu2 %v2091_v36  ;;  %v2873_v51 = vadd.f32 %v4938_v16, %v2805_v13  ;;  %v2028_v22 = vmul.f32 %v4815_v30, %v2010_v20 }
 0x318   : > { %v2659_v3 = vpop.f32.mrf.mxu1 }
 0x319   : > { %v2547_v1 = vpack.c.bf16 %v2504_v62, %v2503_v38  ;;  %v2029_v38 = vmul.f32 %v4815_v30, %v2012_v34  ;;  %v2937_v5 = vmax.f32 %v2873_v51, 0.0  ;;  %v2044_v54 = vadd.f32 %v4826_v17, %v2028_v22 }
 0x31a   : > { %v2272_v28 = vpop.f32.mrf.mxu2 }
 0x31b   : > { %2731 = vmatmul.bf16.gmra.mxu3 %v2547_v1  ;;  %v2373_v35 = vmul.f32 %v4674_v61, %v2272_v28  ;;  %v2806_v1 = vmul.f32 %v4930_v48, %v2657_v59  ;;  %v2045_v6 = vadd.f32 %v4826_v17, %v2029_v38 }
 0x31d   : > { %v2441_v39 = vadd.f32 %v4685_v18, %v2373_v35  ;;  %v2874_v57 = vadd.f32 %v4938_v16, %v2806_v1  ;;  %v2061_v59 = vmax.f32 %v2045_v6, 0.0 }
 0x31e   : > { %v2692_v23 = vpop.f32.mrf.mxu3 }
 0x31f   : > { %v2820_v43 = vmul.f32 %v4930_v48, %v2692_v23  ;;  %v2505_v60 = vmax.f32 %v2441_v39, 0.0 }
 0x320   : > { %v2662_v50 = vpop.f32.mrf.mxu1 }
 0x321   : > { %v2888_v46 = vadd.f32 %v4938_v16, %v2820_v43  ;;  %v2060_v43 = vmax.f32 %v2044_v54, 0.0 }
 0x322   : > { %v2274_v55 = vpop.f32.mrf.mxu2 }
 0x323   : > { %v2952_v32 = vmax.f32 %v2888_v46, 0.0  ;;  %v2374_v42 = vmul.f32 %v4674_v61, %v2274_v55  ;;  %v2938_v46 = vmax.f32 %v2874_v57, 0.0 }
 0x325   : > { %v4951_v0 = vadd.f32 %v2952_v32, %v2936_v14  ;;  %v2442_v44 = vadd.f32 %v4685_v18, %v2374_v42  ;;  %v2807_v14 = vmul.f32 %v4930_v48, %v2659_v3  ;;  %v2093_v42 = vpack.c.bf16 %v2061_v59, %v2060_v43 }
 0x326   : > { %v2694_v58 = vpop.f32.mrf.mxu3 }
 0x327   : > { %v2506_v36 = vmax.f32 %v2442_v44, 0.0  ;;  %v2821_v53 = vmul.f32 %v4930_v48, %v2694_v58  ;;  %2316 = vmatmul.bf16.gmra.mxu2 %v2092_v29  ;;  %v2875_v44 = vadd.f32 %v4938_v16, %v2807_v14 }
 0x328   : > { %v2664_v49 = vpop.f32.mrf.mxu1 }
 0x329   : > { %v2889_v56 = vadd.f32 %v4938_v16, %v2821_v53  ;;  %v2548_v62 = vpack.c.bf16 %v2506_v36, %v2505_v60  ;;  %v2808_v60 = vmul.f32 %v4930_v48, %v2662_v50  ;;  %v2939_v53 = vmax.f32 %v2875_v44, 0.0 }
 0x32a   : > { %v2277_v45 = vpop.f32.mrf.mxu2  ;;  %v2809_v50 = vmul.f32 %v4930_v48, %v2664_v49 }
 0x32b   : > { %v2953_v52 = vmax.f32 %v2889_v56, 0.0  ;;  %2736 = vmatmul.bf16.gmra.mxu3 %v2548_v62  ;;  %v2375_v23 = vmul.f32 %v4674_v61, %v2277_v45  ;;  %v2876_v22 = vadd.f32 %v4938_v16, %v2808_v60 }
 0x32d   : > { %v4963_v28 = vadd.f32 %v2953_v52, %v2937_v5  ;;  %v2443_v55 = vadd.f32 %v4685_v18, %v2375_v23  ;;  %v2940_v6 = vmax.f32 %v2876_v22, 0.0 }
 0x32e   : > { %v2697_v9 = vpop.f32.mrf.mxu3 }
 0x32f   : > { %v2822_v35 = vmul.f32 %v4930_v48, %v2697_v9  ;;  %v2507_v29 = vmax.f32 %v2443_v55, 0.0 }
 0x330   : > { %v2667_v37 = vpop.f32.mrf.mxu1 }
 0x331   : > { %v2890_v30 = vadd.f32 %v4938_v16, %v2822_v35 }
 0x332   : > { %v2279_v7 = vpop.f32.mrf.mxu2 }
 0x333   : > { %v2954_v13 = vmax.f32 %v2890_v30, 0.0  ;;  %v2376_v17 = vmul.f32 %v4674_v61, %v2279_v7 }
 0x335   : > { %v4973_v39 = vadd.f32 %v2954_v13, %v2938_v46  ;;  %v2444_v32 = vadd.f32 %v4685_v18, %v2376_v17  ;;  %v2877_v46 = vadd.f32 %v4938_v16, %v2809_v50  ;;  %v2810_v17 = vmul.f32 %v4930_v48, %v2667_v37 }
 0x336   : > { %v2699_v34 = vpop.f32.mrf.mxu3 }
 0x337   : > { %v2508_v20 = vmax.f32 %v2444_v32, 0.0  ;;  %v2823_v58 = vmul.f32 %v4930_v48, %v2699_v34  ;;  %2321 = vmatmul.bf16.gmra.mxu2 %v2093_v42  ;;  %v2941_v42 = vmax.f32 %v2877_v46, 0.0 }
 0x338   : > { %v2669_v56 = vpop.f32.mrf.mxu1 }
 0x339   : > { %v2891_v3 = vadd.f32 %v4938_v16, %v2823_v58  ;;  %v2549_v51 = vpack.c.bf16 %v2508_v20, %v2507_v29  ;;  %v2878_v29 = vadd.f32 %v4938_v16, %v2810_v17  ;;  %v2811_v37 = vmul.f32 %v4930_v48, %v2669_v56 }
 0x33a   : > { %v2282_v36 = vpop.f32.mrf.mxu2 }
 0x33b   : > { %v2955_v38 = vmax.f32 %v2891_v3, 0.0  ;;  %2741 = vmatmul.bf16.gmra.mxu3 %v2549_v51  ;;  %v2377_v45 = vmul.f32 %v4674_v61, %v2282_v36  ;;  %v2942_v36 = vmax.f32 %v2878_v29, 0.0 }
 0x33d   : > { %v4980_v62 = vadd.f32 %v2955_v38, %v2939_v53  ;;  %v2445_v57 = vadd.f32 %v4685_v18, %v2377_v45 }
 0x33e   : > { %v2702_v1 = vpop.f32.mrf.mxu3 }
 0x33f   : > { %v2824_v5 = vmul.f32 %v4930_v48, %v2702_v1  ;;  %v2509_v7 = vmax.f32 %v2445_v57, 0.0  ;;  %v5007_v1 = vld [vmem:[%s5314_s8] ss:$0 sm:$0xff] }
 0x340   : > { %v2672_v59 = vpop.f32.mrf.mxu1 }
 0x341   : > { %v2892_v52 = vadd.f32 %v4938_v16, %v2824_v5  ;;  %v2812_v5 = vmul.f32 %v4930_v48, %v2672_v59 }
 0x342   : > { %v2284_v54 = vpop.f32.mrf.mxu2 }
 0x343   : > { %v2956_v9 = vmax.f32 %v2892_v52, 0.0  ;;  %v2378_v23 = vmul.f32 %v4674_v61, %v2284_v54 }
 0x345   : > { %v4989_v35 = vadd.f32 %v2956_v9, %v2940_v6  ;;  %v2446_v30 = vadd.f32 %v4685_v18, %v2378_v23  ;;  %v2879_v6 = vadd.f32 %v4938_v16, %v2811_v37  ;;  %v610_v9 = vld [vmem:[%s5015_s26] sm:$0xff]  ;;  %v2796_v23 = vmul.f32 %v4930_v48, %v4832_v47 }
 0x346   : > { %v2704_v43 = vpop.f32.mrf.mxu3  ;;  %3074 = vperm.xlu0 %3702, %v610_v9   ;;  %v2798_v9 = vmul.f32 %v4930_v48, %v4852_v26 }
 0x347   : > { %v2510_v14 = vmax.f32 %v2446_v30, 0.0  ;;  %v2825_v55 = vmul.f32 %v4930_v48, %v2704_v43 }
 0x348   : > { %v2674_v51 = vpop.f32.mrf.mxu1 }
 0x349   : > { %v2893_v13 = vadd.f32 %v4938_v16, %v2825_v55  ;;  %v2550_v49 = vpack.c.bf16 %v2510_v14, %v2509_v7  ;;  %v2943_v7 = vmax.f32 %v2879_v6, 0.0  ;;  %v2864_v55 = vadd.f32 %v4938_v16, %v2796_v23 }
 0x34a   : > { %v2287_v32 = vpop.f32.mrf.mxu2  ;;  %v2813_v47 = vmul.f32 %v4930_v48, %v2674_v51  ;;  %v5042_v51 = vld [vmem:[%s5315_s9] ss:$0 sm:$0xff] }
 0x34b   : > { %v2957_v34 = vmax.f32 %v2893_v13, 0.0  ;;  %2746 = vmatmul.bf16.gmra.mxu3 %v2550_v49  ;;  %v2379_v58 = vmul.f32 %v4674_v61, %v2287_v32  ;;  %v2928_v29 = vmax.f32 %v2864_v55, 0.0 }
 0x34d   : > { %v4996_v44 = vadd.f32 %v2957_v34, %v2941_v42  ;;  %v2447_v38 = vadd.f32 %v4685_v18, %v2379_v58  ;;  %v611_v34 = vld [vmem:[%s5015_s26 + $0x8] sm:$0xff] }
 0x34e   : > { %v2707_v20 = vpop.f32.mrf.mxu3  ;;  %3079 = vperm.xlu1 %3703, %v611_v34   ;;  %v613_v34 = vld [vmem:[%s5015_s26 + $0x18] sm:$0xff] }
 0x34f   : > { %v2826_v3 = vmul.f32 %v4930_v48, %v2707_v20  ;;  %v2511_v54 = vmax.f32 %v2447_v38, 0.0  ;;  %v2797_v20 = vmul.f32 %v4930_v48, %v4843_v31 }
 0x350   : > { %v2677_v46 = vpop.f32.mrf.mxu1 }
 0x351   : > { %v2894_v60 = vadd.f32 %v4938_v16, %v2826_v3 }
 0x352   : > { %v2289_v53 = vpop.f32.mrf.mxu2 }
 0x353   : > { %v2958_v22 = vmax.f32 %v2894_v60, 0.0  ;;  %v2380_v45 = vmul.f32 %v5007_v1, %v2289_v53 }
 0x355   : > { %v5017_v61 = vadd.f32 %v2958_v22, %v2942_v36  ;;  %v2448_v56 = vadd.f32 %v4685_v18, %v2380_v45  ;;  %v2880_v18 = vadd.f32 %v4938_v16, %v2812_v5  ;;  %v2881_v36 = vadd.f32 %v4938_v16, %v2813_v47 }
 0x356   : > { %v2709_v52 = vpop.f32.mrf.mxu3  ;;  %v2865_v45 = vadd.f32 %v4938_v16, %v2797_v20  ;;  %v2814_v5 = vmul.f32 %v4930_v48, %v2677_v46  ;;  %v2866_v46 = vadd.f32 %v4938_v16, %v2798_v9  ;;  %3089 = vperm.xlu1 %3703, %v613_v34   ;;  %v2799_v20 = vmul.f32 %v4930_v48, %v4863_v2  ;;  %v615_v34 = vld [vmem:[%s5015_s26 + $0x28] sm:$0xff] }
 0x357   : > { %v2512_v50 = vmax.f32 %v2448_v56, 0.0  ;;  %v2827_v57 = vmul.f32 %v4930_v48, %v2709_v52  ;;  %v2944_v49 = vmax.f32 %v2880_v18, 0.0  ;;  %v2945_v6 = vmax.f32 %v2881_v36, 0.0  ;;  %3099 = vperm.xlu0 %3702, %v615_v34  }
 0x358   : > { %v2679_v22 = vpop.f32.mrf.mxu1  ;;  %v2929_v23 = vmax.f32 %v2865_v45, 0.0  ;;  %v2882_v18 = vadd.f32 %v4938_v16, %v2814_v5 }
 0x359   : > { %v2895_v30 = vadd.f32 %v4938_v16, %v2827_v57  ;;  %v2551_v43 = vpack.c.bf16 %v2512_v50, %v2511_v54  ;;  %v2992_v3 = vadd.f32 %v2944_v49, %v2928_v29  ;;  %v2815_v26 = vmul.f32 %v4930_v48, %v2679_v22 }
 0x35a   : > { %v2292_v59 = vpop.f32.mrf.mxu2  ;;  %v2946_v49 = vmax.f32 %v2882_v18, 0.0  ;;  %v2930_v29 = vmax.f32 %v2866_v46, 0.0  ;;  %v2867_v22 = vadd.f32 %v4938_v16, %v2799_v20  ;;  %v2801_v20 = vmul.f32 %v4930_v48, %v4883_v11 }
 0x35b   : > { %v2959_v14 = vmax.f32 %v2895_v30, 0.0  ;;  %2751 = vmatmul.bf16.gmra.mxu3 %v2551_v43  ;;  %v2381_v32 = vmul.f32 %v5007_v1, %v2292_v59  ;;  %v2883_v36 = vadd.f32 %v4938_v16, %v2815_v26 }
 0x35d   : > { %v5029_v13 = vadd.f32 %v2959_v14, %v2943_v7  ;;  %v2449_v53 = vadd.f32 %v5042_v51, %v2381_v32  ;;  %v2993_v7 = vadd.f32 %v2945_v6, %v2929_v23  ;;  %v2931_v23 = vmax.f32 %v2867_v22, 0.0 }
 0x35e   : > { %v2712_v17 = vpop.f32.mrf.mxu3 }
 0x35f   : > { %v2828_v42 = vmul.f32 %v4930_v48, %v2712_v17  ;;  %v2513_v54 = vmax.f32 %v2449_v53, 0.0 }
 0x360   : > { %v2682_v17 = vpop.f32.mrf.mxu1 }
 0x361   : > { %v2896_v58 = vadd.f32 %v4938_v16, %v2828_v42  ;;  %v2816_v5 = vmul.f32 %v4930_v48, %v2682_v17 }
 0x362   : > { %v2294_v60 = vpop.f32.mrf.mxu2 }
 0x363   : > { %v2960_v37 = vmax.f32 %v2896_v58, 0.0  ;;  %v2382_v38 = vmul.f32 %v5007_v1, %v2294_v60  ;;  %v2884_v18 = vadd.f32 %v4938_v16, %v2816_v5 }
 0x365   : > { %v5047_v31 = vadd.f32 %v2992_v3, %v2960_v37  ;;  %v2450_v56 = vadd.f32 %v5042_v51, %v2382_v38  ;;  %v2994_v3 = vadd.f32 %v2946_v49, %v2930_v29  ;;  %v2948_v17 = vmax.f32 %v2884_v18, 0.0 }
 0x366   : > { %v2714_v52 = vpop.f32.mrf.mxu3 }
 0x367   : > { %v2514_v50 = vmax.f32 %v2450_v56, 0.0  ;;  %v2829_v57 = vmul.f32 %v4930_v48, %v2714_v52  ;;  %v2947_v52 = vmax.f32 %v2883_v36, 0.0 }
 0x368   : > { %v2684_v9 = vpop.f32.mrf.mxu1 }
 0x369   : > { %v2897_v30 = vadd.f32 %v4938_v16, %v2829_v57  ;;  %v2552_v43 = vpack.c.bf16 %v2514_v50, %v2513_v54  ;;  %v2800_v57 = vmul.f32 %v4930_v48, %v4872_v27  ;;  %v2817_v27 = vmul.f32 %v4930_v48, %v2684_v9  ;;  %v616_v9 = vld [vmem:[%s5015_s26 + $0x30] sm:$0xff] }
 0x36a   : > { %v2297_v59 = vpop.f32.mrf.mxu2  ;;  %3104 = vperm.xlu1 %3703, %v616_v9   ;;  %v618_v9 = vld [vmem:[%s5015_s26 + $0x40] sm:$0xff] }
 0x36b   : > { %v2961_v14 = vmax.f32 %v2897_v30, 0.0  ;;  %2756 = vmatmul.bf16.gmra.mxu3 %v2552_v43  ;;  %v2383_v32 = vmul.f32 %v5007_v1, %v2297_v59  ;;  %v2868_v46 = vadd.f32 %v4938_v16, %v2800_v57  ;;  %3114 = vperm.xlu0 %3702, %v618_v9  }
 0x36d   : > { %v5057_v55 = vadd.f32 %v2993_v7, %v2961_v14  ;;  %v2451_v53 = vadd.f32 %v5042_v51, %v2383_v32  ;;  %v2995_v7 = vadd.f32 %v2947_v52, %v2931_v23  ;;  %v2932_v29 = vmax.f32 %v2868_v46, 0.0 }
 0x36e   : > { %v2717_v47 = vpop.f32.mrf.mxu3  ;;  %v2802_v23 = vmul.f32 %v4930_v48, %v4892_v8 }
 0x36f   : > { %v2830_v42 = vmul.f32 %v4930_v48, %v2717_v47  ;;  %v2515_v6 = vmax.f32 %v2451_v53, 0.0  ;;  %v2885_v53 = vadd.f32 %v4938_v16, %v2817_v27 }
 0x371   : > { %v2898_v58 = vadd.f32 %v4938_v16, %v2830_v42  ;;  %v612_v42 = vld [vmem:[%s5015_s26 + $0x10] sm:$0xff] }
 0x372   : > { %v2299_v60 = vpop.f32.mrf.mxu2  ;;  %3084 = vperm.xlu2 %3704, %v612_v42  }
 0x373   : > { %v2962_v37 = vmax.f32 %v2898_v58, 0.0  ;;  %v2384_v38 = vmul.f32 %v5007_v1, %v2299_v60  ;;  %v2687_v60 = vpop.f32.mrf.mxu1 }
 0x374   : > { %v2818_v11 = vmul.f32 %v4930_v48, %v2687_v60 }
 0x375   : > { %v5070_v45 = vadd.f32 %v2994_v3, %v2962_v37  ;;  %v2452_v56 = vadd.f32 %v5042_v51, %v2384_v38  ;;  %v2996_v3 = vadd.f32 %v2948_v17, %v2932_v29  ;;  %v2870_v17 = vadd.f32 %v4938_v16, %v2802_v23  ;;  %v614_v29 = vld [vmem:[%s5015_s26 + $0x20] sm:$0xff] }
 0x376   : > { %v2719_v2 = vpop.f32.mrf.mxu3 }
 0x377   : > { %v2516_v54 = vmax.f32 %v2452_v56, 0.0  ;;  %v2831_v50 = vmul.f32 %v4930_v48, %v2719_v2  ;;  %v2869_v56 = vadd.f32 %v4938_v16, %v2801_v20  ;;  %v2934_v20 = vmax.f32 %v2870_v17, 0.0 }
 0x379   : > { %v2899_v30 = vadd.f32 %v4938_v16, %v2831_v50  ;;  %v2553_v43 = vpack.c.bf16 %v2516_v54, %v2515_v6  ;;  %v2949_v6 = vmax.f32 %v2885_v53, 0.0 }
 0x37a   : > { %v2302_v59 = vpop.f32.mrf.mxu2  ;;  %3094 = vperm.xlu2 %3704, %v614_v29  }
 0x37b   : > { %v2963_v14 = vmax.f32 %v2899_v30, 0.0  ;;  %2761 = vmatmul.bf16.gmra.mxu3 %v2553_v43  ;;  %v2385_v26 = vmul.f32 %v5007_v1, %v2302_v59  ;;  %v2933_v30 = vmax.f32 %v2869_v56, 0.0  ;;  %v2886_v59 = vadd.f32 %v4938_v16, %v2818_v11 }
 0x37d   : > { %v5080_v49 = vadd.f32 %v2995_v7, %v2963_v14  ;;  %v2453_v37 = vadd.f32 %v5042_v51, %v2385_v26  ;;  %v2997_v14 = vadd.f32 %v2949_v6, %v2933_v30  ;;  %v2950_v26 = vmax.f32 %v2886_v59, 0.0 }
 0x37e   : > { %v2722_v47 = vpop.f32.mrf.mxu3 }
 0x37f   : > { %v2832_v32 = vmul.f32 %v4930_v48, %v2722_v47  ;;  %v2517_v54 = vmax.f32 %v2453_v37, 0.0  ;;  %v2689_v47 = vpop.f32.mrf.mxu1  ;;  %v2998_v60 = vadd.f32 %v2950_v26, %v2934_v20  ;;  %v622_v26 = vld [vmem:[%s5015_s26 + $0x60] sm:$0xff] }
 0x380   : > { %v2819_v8 = vmul.f32 %v4930_v48, %v2689_v47 }
 0x381   : > { %v2900_v58 = vadd.f32 %v4938_v16, %v2832_v32 }
 0x382   : > { %v2304_v36 = vpop.f32.mrf.mxu2  ;;  %v2887_v53 = vadd.f32 %v4938_v16, %v2819_v8 }
 0x383   : > { %v2964_v38 = vmax.f32 %v2900_v58, 0.0  ;;  %v2386_v22 = vmul.f32 %v5007_v1, %v2304_v36  ;;  %v2803_v58 = vmul.f32 %v4930_v48, %v4902_v41 }
 0x385   : > { %v5094_v5 = vadd.f32 %v2996_v3, %v2964_v38  ;;  %v2454_v2 = vadd.f32 %v5042_v51, %v2386_v22  ;;  %v2871_v56 = vadd.f32 %v4938_v16, %v2803_v58 }
 0x386   : > { %v2724_v52 = vpop.f32.mrf.mxu3 }
 0x387   : > { %v2518_v50 = vmax.f32 %v2454_v2, 0.0  ;;  %v2833_v57 = vmul.f32 %v4930_v48, %v2724_v52  ;;  %v2951_v52 = vmax.f32 %v2887_v53, 0.0  ;;  %v2935_v23 = vmax.f32 %v2871_v56, 0.0 }
 0x389   : > { %v2901_v43 = vadd.f32 %v4938_v16, %v2833_v57  ;;  %v2554_v18 = vpack.c.bf16 %v2518_v50, %v2517_v54  ;;  %v619_v57 = vld [vmem:[%s5015_s26 + $0x48] sm:$0xff]  ;;  %v2999_v59 = vadd.f32 %v2951_v52, %v2935_v23 }
 0x38a   : > { %v2307_v7 = vpop.f32.mrf.mxu2  ;;  %3119 = vperm.xlu1 %3703, %v619_v57   ;;  %v624_v57 = vld [vmem:[%s5015_s26 + $0x70] sm:$0xff] }
 0x38b   : > { %v2965_v46 = vmax.f32 %v2901_v43, 0.0  ;;  %2766 = vmatmul.bf16.gmra.mxu3 %v2554_v18  ;;  %v2387_v42 = vmul.f32 %v5007_v1, %v2307_v7 }
 0x38d   : > { %v5105_v27 = vadd.f32 %v2997_v14, %v2965_v46  ;;  %v2455_v37 = vadd.f32 %v5042_v51, %v2387_v42 }
 0x38e   : > { %v2727_v32 = vpop.f32.mrf.mxu3 }
 0x38f   : > { %v2834_v34 = vmul.f32 %v4930_v48, %v2727_v32  ;;  %v2519_v6 = vmax.f32 %v2455_v37, 0.0  ;;  %v617_v37 = vld [vmem:[%s5015_s26 + $0x38] sm:$0xff] }
 0x390   : > { %3109 = vperm.xlu2 %3704, %v617_v37  }
 0x391   : > { %v2902_v3 = vadd.f32 %v4938_v16, %v2834_v34 }
 0x392   : > { %v2309_v36 = vpop.f32.mrf.mxu2  ;;  %3134 = vperm.xlu1 %3703, %v622_v26  }
 0x393   : > { %v2966_v38 = vmax.f32 %v2902_v3, 0.0  ;;  %v2388_v22 = vmul.f32 %v5007_v1, %v2309_v36 }
 0x395   : > { %v5118_v2 = vadd.f32 %v2998_v60, %v2966_v38  ;;  %v2456_v11 = vadd.f32 %v5042_v51, %v2388_v22  ;;  %v625_v38 = vld [vmem:[%s5015_s26 + $0x78] sm:$0xff] }
 0x396   : > { %v2729_v41 = vpop.f32.mrf.mxu3  ;;  %v621_v22 = vld [vmem:[%s5015_s26 + $0x58] sm:$0xff] }
 0x397   : > { %v2520_v54 = vmax.f32 %v2456_v11, 0.0  ;;  %v2835_v50 = vmul.f32 %v4930_v48, %v2729_v41  ;;  %3129 = vperm.xlu0 %3702, %v621_v22  }
 0x399   : > { %v2903_v30 = vadd.f32 %v4938_v16, %v2835_v50  ;;  %v2555_v43 = vpack.c.bf16 %v2520_v54, %v2519_v6 }
 0x39a   : > { %v2312_v18 = vpop.f32.mrf.mxu2  ;;  %3149 = vperm.xlu1 %3703, %v625_v38  }
 0x39b   : > { %v2967_v7 = vmax.f32 %v2903_v30, 0.0  ;;  %2771 = vmatmul.bf16.gmra.mxu3 %v2555_v43  ;;  %v2389_v17 = vmul.f32 %v5007_v1, %v2312_v18 }
 0x39d   : > { %v5125_v14 = vadd.f32 %v2999_v59, %v2967_v7  ;;  %v2457_v42 = vadd.f32 %v5042_v51, %v2389_v17 }
 0x39e   : > { %v2732_v46 = vpop.f32.mrf.mxu3 }
 0x39f   : > { %v2836_v47 = vmul.f32 %v4930_v48, %v2732_v46  ;;  %v2521_v60 = vmax.f32 %v2457_v42, 0.0  ;;  %3144 = vperm.xlu0 %3702, %v624_v57  }
 0x3a1   : > { %v2904_v32 = vadd.f32 %v4938_v16, %v2836_v47 }
 0x3a2   : > { %v2314_v8 = vpop.f32.mrf.mxu2 }
 0x3a3   : > { %v2968_v34 = vmax.f32 %v2904_v32, 0.0  ;;  %v2390_v29 = vmul.f32 %v5007_v1, %v2314_v8 }
 0x3a5   : > { %v5134_v20 = vadd.f32 %v4951_v0, %v2968_v34  ;;  %v2458_v58 = vadd.f32 %v5042_v51, %v2390_v29 }
 0x3a6   : > { %v2734_v3 = vpop.f32.mrf.mxu3 }
 0x3a7   : > { %v2522_v36 = vmax.f32 %v2458_v58, 0.0  ;;  %v2837_v53 = vmul.f32 %v4930_v48, %v2734_v3  ;;  %v620_v3 = vld [vmem:[%s5015_s26 + $0x50] sm:$0xff] }
 0x3a8   : > { %3124 = vperm.xlu2 %3704, %v620_v3  }
 0x3a9   : > { %v2905_v56 = vadd.f32 %v4938_v16, %v2837_v53  ;;  %v2556_v11 = vpack.c.bf16 %v2522_v36, %v2521_v60 }
 0x3aa   : > { %v2317_v41 = vpop.f32.mrf.mxu2 }
 0x3ab   : > { %v2969_v0 = vmax.f32 %v2905_v56, 0.0  ;;  %2776 = vmatmul.bf16.gmra.mxu3 %v2556_v11  ;;  %v2391_v54 = vmul.f32 %v5007_v1, %v2317_v41 }
 0x3ad   : > { %v5143_v52 = vadd.f32 %v4963_v28, %v2969_v0  ;;  %v2459_v30 = vadd.f32 %v5042_v51, %v2391_v54 }
 0x3ae   : > { %v2737_v6 = vpop.f32.mrf.mxu3 }
 0x3af   : > { %v2838_v50 = vmul.f32 %v4930_v48, %v2737_v6  ;;  %v2523_v46 = vmax.f32 %v2459_v30, 0.0  ;;  %v623_v6 = vld [vmem:[%s5015_s26 + $0x68] sm:$0xff] }
 0x3b0   : > { %3139 = vperm.xlu2 %3704, %v623_v6  }
 0x3b1   : > { %v2906_v9 = vadd.f32 %v4938_v16, %v2838_v50 }
 0x3b2   : > { %v2319_v23 = vpop.f32.mrf.mxu2 }
 0x3b3   : > { %v2970_v43 = vmax.f32 %v2906_v9, 0.0  ;;  %v2392_v18 = vmul.f32 %v5007_v1, %v2319_v23 }
 0x3b5   : > { %v5152_v59 = vadd.f32 %v4973_v39, %v2970_v43  ;;  %v2460_v28 = vadd.f32 %v5042_v51, %v2392_v18 }
 0x3b6   : > { %v2739_v7 = vpop.f32.mrf.mxu3 }
 0x3b7   : > { %v2524_v17 = vmax.f32 %v2460_v28, 0.0  ;;  %v2839_v47 = vmul.f32 %v4930_v48, %v2739_v7  ;;  %v5186_v7 = vld [vmem:[%s5320_s14] ss:$0 sm:$0xff] }
 0x3b9   : > { %v2907_v26 = vadd.f32 %v4938_v16, %v2839_v47  ;;  %v2557_v32 = vpack.c.bf16 %v2524_v17, %v2523_v46  ;;  %v791_v47 = vmul.f32 %v5186_v7, %v4105_v63 }
 0x3ba   : > { %v2322_v8 = vpop.f32.mrf.mxu2 }
 0x3bb   : > { %v2971_v42 = vmax.f32 %v2907_v26, 0.0  ;;  %2781 = vmatmul.bf16.gmra.mxu3 %v2557_v32  ;;  %v2393_v39 = vmul.f32 %v5007_v1, %v2322_v8 }
 0x3bd   : > { %v5158_v34 = vadd.f32 %v4980_v62, %v2971_v42  ;;  %v2461_v53 = vadd.f32 %v5042_v51, %v2393_v39 }
 0x3be   : > { %v2742_v29 = vpop.f32.mrf.mxu3 }
 0x3bf   : > { %v2840_v58 = vmul.f32 %v4930_v48, %v2742_v29  ;;  %v2525_v11 = vmax.f32 %v2461_v53, 0.0 }
 0x3c1   : > { %v2908_v60 = vadd.f32 %v4938_v16, %v2840_v58  ;;  %v792_v58 = vmul.f32 %v5186_v7, %v4119_v4 }
 0x3c2   : > { %v2324_v36 = vpop.f32.mrf.mxu2 }
 0x3c3   : > { %v2972_v37 = vmax.f32 %v2908_v60, 0.0  ;;  %v2394_v38 = vmul.f32 %v5007_v1, %v2324_v36 }
 0x3c5   : > { %v5167_v22 = vadd.f32 %v4989_v35, %v2972_v37  ;;  %v2462_v62 = vadd.f32 %v5042_v51, %v2394_v38 }
 0x3c6   : > { %v2744_v56 = vpop.f32.mrf.mxu3 }
 0x3c7   : > { %v2526_v41 = vmax.f32 %v2462_v62, 0.0  ;;  %v2841_v0 = vmul.f32 %v4930_v48, %v2744_v56 }
 0x3c9   : > { %v2909_v54 = vadd.f32 %v4938_v16, %v2841_v0  ;;  %v2558_v50 = vpack.c.bf16 %v2526_v41, %v2525_v11  ;;  %v3075_v41 = vpop.permute.xlu0 %3074  ;;  %v3080_v0 = vpop.permute.xlu1 %3079 }
 0x3cb   : > { %v2973_v57 = vmax.f32 %v2909_v54, 0.0  ;;  %2786 = vmatmul.bf16.gmra.mxu3 %v2558_v50 }
 0x3cd   : > { %v5174_v9 = vadd.f32 %v4996_v44, %v2973_v57 }
 0x3ce   : > { %v2747_v1 = vpop.f32.mrf.mxu3 }
 0x3cf   : > { %v2842_v35 = vmul.f32 %v4930_v48, %v2747_v1 }
 0x3d1   : > { %v2910_v51 = vadd.f32 %v4938_v16, %v2842_v35 }
 0x3d3   : > { %v2974_v23 = vmax.f32 %v2910_v51, 0.0 }
 0x3d5   : > { %v5179_v30 = vadd.f32 %v5017_v61, %v2974_v23  ;;  %v5196_v61 = vld [vmem:[%s5321_s15] ss:$0 sm:$0xff] }
 0x3d6   : > { %v2749_v43 = vpop.f32.mrf.mxu3  ;;  %v811_v8 = vadd.f32 %v5196_v61, %v791_v47  ;;  %v812_v53 = vadd.f32 %v5196_v61, %v792_v58 }
 0x3d7   : > { %v2843_v18 = vmul.f32 %v4930_v48, %v2749_v43  ;;  %v794_v43 = vmul.f32 %v5186_v7, %v4147_v15 }
 0x3d8   : > { %v827_v39 = vmax.f32 %v811_v8, 0.0  ;;  %v828_v56 = vmax.f32 %v812_v53, 0.0 }
 0x3d9   : > { %v2911_v28 = vadd.f32 %v4938_v16, %v2843_v18  ;;  %v814_v47 = vadd.f32 %v5196_v61, %v794_v43 }
 0x3db   : > { %v2975_v44 = vmax.f32 %v2911_v28, 0.0 }
 0x3dd   : > { %v5189_v46 = vadd.f32 %v5029_v13, %v2975_v44 }
 0x3de   : > { %v2752_v17 = vpop.f32.mrf.mxu3 }
 0x3df   : > { %v2844_v26 = vmul.f32 %v4930_v48, %v2752_v17 }
 0x3e1   : > { %v2912_v32 = vadd.f32 %v4938_v16, %v2844_v26 }
 0x3e3   : > { %v2976_v42 = vmax.f32 %v2912_v32, 0.0 }
 0x3e5   : > { %v3024_v29 = vadd.f32 %v5047_v31, %v2976_v42  ;;  %v793_v31 = vmul.f32 %v5186_v7, %v4137_v10  ;;  %v830_v42 = vmax.f32 %v814_v47, 0.0 }
 0x3e6   : > { %v2754_v13 = vpop.f32.mrf.mxu3 }
 0x3e7   : > { %v2845_v63 = vmul.f32 %v4930_v48, %v2754_v13  ;;  %v3040_v3 = vmul.f32 0.25, %v3024_v29  ;;  %v813_v50 = vadd.f32 %v5196_v61, %v793_v31  ;;  %v3085_v13 = vpop.permute.xlu2 %3084 }
 0x3e9   : > { %v2913_v60 = vadd.f32 %v4938_v16, %v2845_v63  ;;  %v3056_v36 = vadd.f32 %v3040_v3, %v827_v39  ;;  %v829_v23 = vmax.f32 %v813_v50, 0.0  ;;  %v3090_v39 = vpop.permute.xlu1 %3089 }
 0x3eb   : > { %v2977_v37 = vmax.f32 %v2913_v60, 0.0  ;;  %v3152_v57 = vmul.f32 %v3075_v41, %v3056_v36 }
 0x3ed   : > { %v3025_v38 = vadd.f32 %v5057_v55, %v2977_v37 }
 0x3ee   : > { %v2757_v62 = vpop.f32.mrf.mxu3 }
 0x3ef   : > { %v2846_v11 = vmul.f32 %v4930_v48, %v2757_v62  ;;  %v3041_v4 = vmul.f32 0.25, %v3025_v38 }
 0x3f1   : > { %v2914_v6 = vadd.f32 %v4938_v16, %v2846_v11  ;;  %v3057_v54 = vadd.f32 %v3041_v4, %v828_v56 }
 0x3f3   : > { %v2978_v1 = vmax.f32 %v2914_v6, 0.0  ;;  %v3153_v35 = vmul.f32 %v3080_v0, %v3057_v54 }
 0x3f5   : > { %v3605_v10 = vpack.c.bf16 %v3153_v35, %v3152_v57  ;;  %v3026_v55 = vadd.f32 %v5070_v45, %v2978_v1  ;;  %v795_v45 = vmul.f32 %v5186_v7, %v4169_v21  ;;  %v796_v21 = vmul.f32 %v5186_v7, %v4179_v25  ;;  %v3095_v1 = vpop.permute.xlu2 %3094  ;;  %v3100_v35 = vpop.permute.xlu0 %3099 }
 0x3f6   : > { %v2759_v51 = vpop.f32.mrf.mxu3 }
 0x3f7   : > { %3606 = vst [vmem:[%s5218_s23] sm:$0xff] %v3605_v10   ;;  %v2847_v18 = vmul.f32 %v4930_v48, %v2759_v51  ;;  %v3042_v28 = vmul.f32 0.25, %v3026_v55  ;;  %v815_v3 = vadd.f32 %v5196_v61, %v795_v45  ;;  %v816_v41 = vadd.f32 %v5196_v61, %v796_v21 }
 0x3f9   : > { %v2915_v44 = vadd.f32 %v4938_v16, %v2847_v18  ;;  %v3058_v17 = vadd.f32 %v3042_v28, %v829_v23  ;;  %v831_v62 = vmax.f32 %v815_v3, 0.0  ;;  %v832_v50 = vmax.f32 %v816_v41, 0.0 }
 0x3fb   : > { %v2979_v26 = vmax.f32 %v2915_v44, 0.0  ;;  %v3154_v60 = vmul.f32 %v3085_v13, %v3058_v17 }
 0x3fd   : > { %v3027_v32 = vadd.f32 %v5080_v49, %v2979_v26 }
 0x3fe   : > { %v2762_v8 = vpop.f32.mrf.mxu3 }
 0x3ff   : > { %v2848_v15 = vmul.f32 %v4930_v48, %v2762_v8  ;;  %v3043_v29 = vmul.f32 0.25, %v3027_v32 }
 0x401   : > { %v2916_v58 = vadd.f32 %v4938_v16, %v2848_v15  ;;  %v3059_v63 = vadd.f32 %v3043_v29, %v830_v42 }
 0x403   : > { %v2980_v36 = vmax.f32 %v2916_v58, 0.0  ;;  %v3155_v53 = vmul.f32 %v3090_v39, %v3059_v63  ;;  %v3105_v58 = vpop.permute.xlu1 %3104  ;;  %v3110_v63 = vpop.permute.xlu2 %3109 }
 0x405   : > { %v3610_v49 = vpack.c.bf16 %v3155_v53, %v3154_v60  ;;  %v3028_v37 = vadd.f32 %v5094_v5, %v2980_v36  ;;  %v797_v5 = vmul.f32 %v5186_v7, %v4199_v24  ;;  %v798_v24 = vmul.f32 %v5186_v7, %v4209_v33 }
 0x406   : > { %v2764_v38 = vpop.f32.mrf.mxu3 }
 0x407   : > { %3642 = vst [vmem:[%s5218_s23 + $0x8] sm:$0xff] %v3610_v49   ;;  %v2849_v56 = vmul.f32 %v4930_v48, %v2764_v38  ;;  %v3044_v31 = vmul.f32 0.25, %v3028_v37  ;;  %v817_v51 = vadd.f32 %v5196_v61, %v797_v5  ;;  %v818_v42 = vadd.f32 %v5196_v61, %v798_v24 }
 0x409   : > { %v2917_v11 = vadd.f32 %v4938_v16, %v2849_v56  ;;  %v3060_v4 = vadd.f32 %v3044_v31, %v831_v62  ;;  %v833_v17 = vmax.f32 %v817_v51, 0.0  ;;  %v834_v13 = vmax.f32 %v818_v42, 0.0 }
 0x40b   : > { %v2981_v0 = vmax.f32 %v2917_v11, 0.0  ;;  %v3156_v23 = vmul.f32 %v3095_v1, %v3060_v4 }
 0x40d   : > { %v3029_v6 = vadd.f32 %v5105_v27, %v2981_v0 }
 0x40e   : > { %v2767_v54 = vpop.f32.mrf.mxu3 }
 0x40f   : > { %v2850_v25 = vmul.f32 %v4930_v48, %v2767_v54  ;;  %v3045_v57 = vmul.f32 0.25, %v3029_v6 }
 0x411   : > { %v2918_v10 = vadd.f32 %v4938_v16, %v2850_v25  ;;  %v3061_v55 = vadd.f32 %v3045_v57, %v832_v50  ;;  %v3115_v25 = vpop.permute.xlu0 %3114 }
 0x413   : > { %v2982_v43 = vmax.f32 %v2918_v10, 0.0  ;;  %v3157_v18 = vmul.f32 %v3100_v35, %v3061_v55  ;;  %v3120_v35 = vpop.permute.xlu1 %3119 }
 0x415   : > { %v3615_v27 = vpack.c.bf16 %v3157_v18, %v3156_v23  ;;  %v3030_v28 = vadd.f32 %v5118_v2, %v2982_v43  ;;  %v799_v2 = vmul.f32 %v5186_v7, %v4231_v19  ;;  %v800_v19 = vmul.f32 %v5186_v7, %v4242_v40 }
 0x416   : > { %v2769_v44 = vpop.f32.mrf.mxu3 }
 0x417   : > { %3643 = vst [vmem:[%s5218_s23 + $0x10] sm:$0xff] %v3615_v27   ;;  %v2851_v47 = vmul.f32 %v4930_v48, %v2769_v44  ;;  %v3046_v26 = vmul.f32 0.25, %v3030_v28  ;;  %v819_v36 = vadd.f32 %v5196_v61, %v799_v2  ;;  %v820_v41 = vadd.f32 %v5196_v61, %v800_v19  ;;  %v3125_v2 = vpop.permute.xlu2 %3124 }
 0x419   : > { %v2919_v32 = vadd.f32 %v4938_v16, %v2851_v47  ;;  %v3062_v8 = vadd.f32 %v3046_v26, %v833_v17  ;;  %v835_v21 = vmax.f32 %v819_v36, 0.0  ;;  %v836_v50 = vmax.f32 %v820_v41, 0.0  ;;  %v3718_v17 = vld [vmem:[%s5318_s12] ss:$0 sm:$0xff] }
 0x41b   : > { %v2983_v45 = vmax.f32 %v2919_v32, 0.0  ;;  %v3158_v53 = vmul.f32 %v3105_v58, %v3062_v8  ;;  %v3130_v58 = vpop.permute.xlu0 %3129 }
 0x41d   : > { %v3031_v15 = vadd.f32 %v5125_v14, %v2983_v45  ;;  %v5337_v45 = vld [vmem:[#allocation3_spill] sm:$0xff] }
 0x41e   : > { %v2772_v29 = vpop.f32.mrf.mxu3 }
 0x41f   : > { %v2852_v33 = vmul.f32 %v4930_v48, %v2772_v29  ;;  %v3047_v39 = vmul.f32 0.25, %v3031_v15  ;;  %v803_v15 = vmul.f32 %v5186_v7, %v5337_v45 }
 0x421   : > { %v2920_v3 = vadd.f32 %v4938_v16, %v2852_v33  ;;  %v3063_v60 = vadd.f32 %v3047_v39, %v834_v13 }
 0x423   : > { %v2984_v49 = vmax.f32 %v2920_v3, 0.0  ;;  %v3159_v37 = vmul.f32 %v3110_v63, %v3063_v60  ;;  %v823_v63 = vadd.f32 %v5196_v61, %v803_v15 }
 0x425   : > { %v3620_v14 = vpack.c.bf16 %v3159_v37, %v3158_v53  ;;  %v3032_v38 = vadd.f32 %v5134_v20, %v2984_v49  ;;  %v801_v20 = vmul.f32 %v5186_v7, %v4255_v12  ;;  %v5336_v12 = vld [vmem:[#allocation2_spill] sm:$0xff]  ;;  %v839_v37 = vmax.f32 %v823_v63, 0.0 }
 0x426   : > { %v2774_v62 = vpop.f32.mrf.mxu3  ;;  %v802_v28 = vmul.f32 %v5186_v7, %v5336_v12 }
 0x427   : > { %3644 = vst [vmem:[%s5218_s23 + $0x18] sm:$0xff] %v3620_v14   ;;  %v2853_v56 = vmul.f32 %v4930_v48, %v2774_v62  ;;  %v3048_v31 = vmul.f32 0.25, %v3032_v38  ;;  %v821_v10 = vadd.f32 %v5196_v61, %v801_v20  ;;  %v5338_v14 = vld [vmem:[#allocation4_spill] sm:$0xff] }
 0x428   : > { %v804_v38 = vmul.f32 %v5186_v7, %v5338_v14 }
 0x429   : > { %v2921_v11 = vadd.f32 %v4938_v16, %v2853_v56  ;;  %v3064_v4 = vadd.f32 %v3048_v31, %v835_v21  ;;  %v837_v27 = vmax.f32 %v821_v10, 0.0 }
 0x42a   : > { %v824_v31 = vadd.f32 %v5196_v61, %v804_v38 }
 0x42b   : > { %v2985_v0 = vmax.f32 %v2921_v11, 0.0  ;;  %v3160_v51 = vmul.f32 %v3115_v25, %v3064_v4  ;;  %v3140_v25 = vpop.permute.xlu2 %3139 }
 0x42d   : > { %v3033_v6 = vadd.f32 %v5143_v52, %v2985_v0  ;;  %v840_v0 = vmax.f32 %v824_v31, 0.0 }
 0x42e   : > { %v2777_v54 = vpop.f32.mrf.mxu3 }
 0x42f   : > { %v3049_v5 = vmul.f32 0.25, %v3033_v6  ;;  %v2854_v40 = vmul.f32 %v4930_v48, %v2777_v54  ;;  %v3717_v48 = vld [vmem:[%s5317_s11] ss:$0 sm:$0xff]  ;;  %v5339_v6 = vld [vmem:[#allocation5_spill] sm:$0xff] }
 0x431   : > { %v3065_v57 = vadd.f32 %v3049_v5, %v836_v50  ;;  %v2922_v1 = vadd.f32 %v4938_v16, %v2854_v40  ;;  %v3135_v40 = vpop.permute.xlu1 %3134 }
 0x433   : > { %v3161_v55 = vmul.f32 %v3120_v35, %v3065_v57  ;;  %v2986_v23 = vmax.f32 %v2922_v1, 0.0 }
 0x435   : > { %v3625_v52 = vpack.c.bf16 %v3161_v55, %v3160_v51  ;;  %v3034_v43 = vadd.f32 %v5152_v59, %v2986_v23  ;;  %v822_v59 = vadd.f32 %v5196_v61, %v802_v28 }
 0x436   : > { %v2779_v18 = vpop.f32.mrf.mxu3 }
 0x437   : > { %3645 = vst [vmem:[%s5218_s23 + $0x20] sm:$0xff] %v3625_v52   ;;  %v2855_v16 = vmul.f32 %v3717_v48, %v2779_v18  ;;  %v3050_v44 = vmul.f32 0.25, %v3034_v43  ;;  %v838_v42 = vmax.f32 %v822_v59, 0.0  ;;  %v5340_v52 = vld [vmem:[#allocation6_spill] sm:$0xff] }
 0x438   : > { %v806_v43 = vmul.f32 %v5186_v7, %v5340_v52 }
 0x439   : > { %v2923_v24 = vadd.f32 %v3718_v17, %v2855_v16  ;;  %v3066_v47 = vadd.f32 %v3050_v44, %v837_v27 }
 0x43a   : > { %v826_v16 = vadd.f32 %v5196_v61, %v806_v43 }
 0x43b   : > { %v2987_v26 = vmax.f32 %v2923_v24, 0.0  ;;  %v3162_v3 = vmul.f32 %v3125_v2, %v3066_v47 }
 0x43c   : > { %v842_v47 = vmax.f32 %v826_v16, 0.0 }
 0x43d   : > { %v3035_v32 = vadd.f32 %v5158_v34, %v2987_v26 }
 0x43e   : > { %v2782_v8 = vpop.f32.mrf.mxu3 }
 0x43f   : > { %v3051_v29 = vmul.f32 0.25, %v3035_v32  ;;  %v2856_v13 = vmul.f32 %v3717_v48, %v2782_v8  ;;  %v3145_v32 = vpop.permute.xlu0 %3144 }
 0x441   : > { %v3067_v33 = vadd.f32 %v3051_v29, %v838_v42  ;;  %v2924_v39 = vadd.f32 %v3718_v17, %v2856_v13 }
 0x443   : > { %v3163_v60 = vmul.f32 %v3130_v58, %v3067_v33  ;;  %v2988_v36 = vmax.f32 %v2924_v39, 0.0 }
 0x445   : > { %v3630_v53 = vpack.c.bf16 %v3163_v60, %v3162_v3  ;;  %v3036_v34 = vadd.f32 %v5167_v22, %v2988_v36  ;;  %v805_v22 = vmul.f32 %v5186_v7, %v5339_v6 }
 0x446   : > { %v2784_v49 = vpop.f32.mrf.mxu3 }
 0x447   : > { %3646 = vst [vmem:[%s5218_s23 + $0x28] sm:$0xff] %v3630_v53   ;;  %v3052_v62 = vmul.f32 0.25, %v3036_v34  ;;  %v2857_v21 = vmul.f32 %v3717_v48, %v2784_v49  ;;  %v825_v57 = vadd.f32 %v5196_v61, %v805_v22 }
 0x449   : > { %v3068_v19 = vadd.f32 %v3052_v62, %v839_v37  ;;  %v2925_v56 = vadd.f32 %v3718_v17, %v2857_v21  ;;  %v841_v23 = vmax.f32 %v825_v57, 0.0 }
 0x44b   : > { %v2989_v11 = vmax.f32 %v2925_v56, 0.0  ;;  %v3164_v1 = vmul.f32 %v3135_v40, %v3068_v19 }
 0x44d   : > { %v3037_v4 = vadd.f32 %v5174_v9, %v2989_v11 }
 0x44e   : > { %v2787_v41 = vpop.f32.mrf.mxu3 }
 0x44f   : > { %v3053_v54 = vmul.f32 0.25, %v3037_v4  ;;  %v2858_v50 = vmul.f32 %v3717_v48, %v2787_v41 }
 0x451   : > { %v3069_v20 = vadd.f32 %v3053_v54, %v840_v0  ;;  %v2926_v5 = vadd.f32 %v3718_v17, %v2858_v50 }
 0x453   : > { %v3165_v35 = vmul.f32 %v3140_v25, %v3069_v20  ;;  %v2990_v10 = vmax.f32 %v2926_v5, 0.0 }
 0x455   : > { %v3635_v55 = vpack.c.bf16 %v3165_v35, %v3164_v1  ;;  %v3038_v9 = vadd.f32 %v5179_v30, %v2990_v10  ;;  %v3150_v30 = vpop.permute.xlu1 %3149 }
 0x456   : > { %v2789_v51 = vpop.f32.mrf.mxu3 }
 0x457   : > { %3647 = vst [vmem:[%s5218_s23 + $0x30] sm:$0xff] %v3635_v55   ;;  %v3054_v18 = vmul.f32 0.25, %v3038_v9  ;;  %v2859_v27 = vmul.f32 %v3717_v48, %v2789_v51 }
 0x459   : > { %v3070_v12 = vadd.f32 %v3054_v18, %v841_v23  ;;  %v2927_v28 = vadd.f32 %v3718_v17, %v2859_v27 }
 0x45b   : > { %v2991_v44 = vmax.f32 %v2927_v28, 0.0  ;;  %v3166_v8 = vmul.f32 %v3145_v32, %v3070_v12 }
 0x45d   : > { %v3039_v24 = vadd.f32 %v5189_v46, %v2991_v44 }
 0x45f   : > { %v3055_v59 = vmul.f32 0.25, %v3039_v24 }
 0x461   : > { %v3071_v26 = vadd.f32 %v3055_v59, %v842_v47 }
 0x463   : > { %v3167_v42 = vmul.f32 %v3150_v30, %v3071_v26 }
 0x465   : > { %v3640_v45 = vpack.c.bf16 %v3167_v42, %v3166_v8 }
 0x467   : > { %3648 = vst [vmem:[%s5218_s23 + $0x38] sm:$0xff] %v3640_v45  }
 0x468 PF: > { %s26_s21 = sadd.s32 1, %s3725_s21  }
 0x469   : > { %p23_p4 = scmp.ge.s32.totalorder %s26_s21, 4  }
 0x46b   :  { %25 = sbr.rel (!%p23_p4) target bundleno = 2 (0x2), region = 120 }

// kernel: particlenet_forward.6
= control target key start
LH: loop header
LB: loop body
LE: loop exit
PB: predicated region body
PF: predicated region fallthrough
CT: control target
= control target key end

     0   :  { %s641_s6 = smov 0   ;;  %s1033_s0 = inlined_call_operand.vmem [shape: f32[2,128,2], index: 0, kind: input, shape index: {}]   ;;  %s1034_s1 = inlined_call_operand.vmem [shape: f32[2,128,128], index: 1, kind: output, shape index: {}]  }
   0x1 LB: > { %s522_s7 = sadd.s32 4294967295, %s629_s6   ;;  %p526_p0 = scmp.ge.s32.totalorder %s629_s6, 1  ;;  %s629_s6 = sphi %s641_s6, %s11_s6  }
   0x2   : > { %p87_p1 = scmp.lt.s32.totalorder %s629_s6, 3 }
   0x4   : > { %p88_p2 = pnand %p526_p0, %p87_p1 }
   0x5   : > { %p107_p3 = scmp.lt.s32.totalorder (!%p88_p2), %s522_s7, 1 }
   0x6   : > { %91 = sbr.rel (%p88_p2) target bundleno = 243 (0xf3), region = 24 }
   0xb   : > { %s1036_s7 = smov (!%p107_p3, %s522_s7), 1  ;;  %vm133_vm0 = vcmask 15360   ;;  %v359_v48 = vlaneseq  ;;  %vm364_vm1 = vcmask 130112   ;;  %vm368_vm2 = vcmask 195712  }
   0xc   : > { %s565_s8 = sshll.u32 %s1036_s7, 7  ;;  %vm372_vm3 = vcmask 261312   ;;  %vm376_vm4 = vcmask 326912   ;;  %vm380_vm5 = vcmask 392512   ;;  %vm384_vm6 = vcmask 458112  }
   0xd   : > { %s657_s11 = scalar_lea.vmem %s1033_s0, %s565_s8  ;;  %v917_v50 = vand.u32 127, %v359_v48  ;;  %vm388_vm7 = vcmask 523712   ;;  %vm392_vm8 = vcmask 589312   ;;  %vm396_vm9 = vcmask 654912   ;;  %s984_s14 = scalar_lea.vmem %s1034_s1, %s565_s8 }
   0xe   : > { %v660_v0 = vld [vmem:[%s657_s11 + $0x78] sm:$0xff]  ;;  %v671_v1 = vld [vmem:[%s657_s11 + $0x70] sm:$0xff]  ;;  %v674_v2 = vld [vmem:[%s657_s11] sm:$0xff]  ;;  %vm400_vm10 = vcmask 720512   ;;  %vm404_vm11 = vcmask 786112   ;;  %vm408_vm12 = vcmask 851712  }
   0xf   : > { %531 = vmatpush.xpose.msk.msra.mxu0 %vm133_vm0, %v660_v0  ;;  %567 = vmatpush.xpose.msk.msra.mxu1 %vm133_vm0, %v660_v0  ;;  %v247_v3 = vmul.f32 %v674_v2, %v674_v2  ;;  %v687_v4 = vld [vmem:[%s657_s11 + $0x68] sm:$0xff]  ;;  %v691_v6 = vld [vmem:[%s657_s11 + $0x10] sm:$0xff]  ;;  %v696_v8 = vld [vmem:[%s657_s11 + $0x20] sm:$0xff]  ;;  %v261_v43 = vmul.f32 %v671_v1, %v671_v1  ;;  %v262_v45 = vmul.f32 %v660_v0, %v660_v0  ;;  %v362_v53 = vadd.s32 4294967288, %v917_v50 }
  0x10   : > { %568 = vmatpush.xpose.msk.msra.mxu2 %vm133_vm0, %v660_v0  ;;  %569 = vmatpush.xpose.msk.msra.mxu3 %vm133_vm0, %v660_v0  ;;  %v249_v7 = vmul.f32 %v691_v6, %v691_v6  ;;  %v251_v9 = vmul.f32 %v696_v8, %v696_v8  ;;  %v701_v10 = vld [vmem:[%s657_s11 + $0x8] sm:$0xff]  ;;  %v715_v13 = vld [vmem:[%s657_s11 + $0x60] sm:$0xff]  ;;  %v728_v16 = vld [vmem:[%s657_s11 + $0x58] sm:$0xff]  ;;  %v260_v42 = vmul.f32 %v687_v4, %v687_v4  ;;  %v366_v54 = vadd.s32 4294967280, %v917_v50 }
  0x11   : > { %v263_v5 = vsel %vm133_vm0, %v247_v3, 0.0  ;;  %v248_v12 = vmul.f32 %v701_v10, %v701_v10  ;;  %v731_v17 = vld [vmem:[%s657_s11 + $0x18] sm:$0xff]  ;;  %v734_v18 = vld [vmem:[%s657_s11 + $0x28] sm:$0xff]  ;;  %v739_v20 = vld [vmem:[%s657_s11 + $0x30] sm:$0xff]  ;;  %v258_v37 = vmul.f32 %v728_v16, %v728_v16  ;;  %v259_v39 = vmul.f32 %v715_v13, %v715_v13 }
  0x12   : > { %264 = vadd.xlane.f32.xlu0 %v263_v5  ;;  %v269_v11 = vsel %vm133_vm0, %v249_v7, 0.0  ;;  %v275_v14 = vsel %vm133_vm0, %v251_v9, 0.0  ;;  %v250_v19 = vmul.f32 %v731_v17, %v731_v17  ;;  %v252_v21 = vmul.f32 %v734_v18, %v734_v18  ;;  %v755_v24 = vld [vmem:[%s657_s11 + $0x50] sm:$0xff]  ;;  %v764_v27 = vld [vmem:[%s657_s11 + $0x38] sm:$0xff]  ;;  %v771_v28 = vld [vmem:[%s657_s11 + $0x48] sm:$0xff] }
  0x13   : > { %532 = vmatpush.xpose.msk.msra.mxu0 %vm133_vm0, %v671_v1  ;;  %570 = vmatpush.xpose.msk.msra.mxu1 %vm133_vm0, %v671_v1  ;;  %v266_v15 = vsel %vm133_vm0, %v248_v12, 0.0  ;;  %v253_v23 = vmul.f32 %v739_v20, %v739_v20  ;;  %v254_v29 = vmul.f32 %v764_v27, %v764_v27  ;;  %v776_v30 = vld [vmem:[%s657_s11 + $0x40] sm:$0xff]  ;;  %v256_v33 = vmul.f32 %v771_v28, %v771_v28 }
  0x14   : > { %571 = vmatpush.xpose.msk.msra.mxu2 %vm133_vm0, %v671_v1  ;;  %572 = vmatpush.xpose.msk.msra.mxu3 %vm133_vm0, %v671_v1  ;;  %v272_v22 = vsel %vm133_vm0, %v250_v19, 0.0  ;;  %v278_v25 = vsel %vm133_vm0, %v252_v21, 0.0  ;;  %v255_v32 = vmul.f32 %v776_v30, %v776_v30  ;;  %v257_v36 = vmul.f32 %v755_v24, %v755_v24 }
  0x15   : > { %270 = vadd.xlane.f32.xlu1 %v269_v11  ;;  %276 = vadd.xlane.f32.xlu2 %v275_v14  ;;  %v281_v26 = vsel %vm133_vm0, %v253_v23, 0.0  ;;  %v284_v31 = vsel %vm133_vm0, %v254_v29, 0.0  ;;  %v290_v35 = vsel %vm133_vm0, %v256_v33, 0.0  ;;  %v296_v40 = vsel %vm133_vm0, %v258_v37, 0.0 }
  0x16   : > { %v287_v34 = vsel %vm133_vm0, %v255_v32, 0.0  ;;  %v293_v38 = vsel %vm133_vm0, %v257_v36, 0.0  ;;  %v299_v41 = vsel %vm133_vm0, %v259_v39, 0.0  ;;  %v302_v44 = vsel %vm133_vm0, %v260_v42, 0.0 }
  0x17   : > { %533 = vmatpush.xpose.msk.msra.mxu0 %vm133_vm0, %v687_v4  ;;  %573 = vmatpush.xpose.msk.msra.mxu1 %vm133_vm0, %v687_v4  ;;  %v305_v46 = vsel %vm133_vm0, %v261_v43, 0.0  ;;  %v308_v47 = vsel %vm133_vm0, %v262_v45, 0.0  ;;  %v370_v58 = vadd.s32 4294967272, %v917_v50  ;;  %v374_v62 = vadd.s32 4294967264, %v917_v50 }
  0x18   : > { %574 = vmatpush.xpose.msk.msra.mxu2 %vm133_vm0, %v687_v4  ;;  %575 = vmatpush.xpose.msk.msra.mxu3 %vm133_vm0, %v687_v4  ;;  %v390_v14 = vadd.s32 4294967232, %v917_v50  ;;  %v398_v21 = vadd.s32 4294967216, %v917_v50  ;;  %v406_v29 = vadd.s32 4294967200, %v917_v50  ;;  %v410_v33 = vadd.s32 4294967192, %v917_v50 }
  0x19   : > { %v414_v37 = vadd.s32 4294967184, %v917_v50  ;;  %vm412_vm13 = vcmask 917312   ;;  %vm416_vm14 = vcmask 982912   ;;  %vm420_vm15 = vcmask 1048512  }
  0x1a   : > { %267 = vadd.xlane.f32.xlu0 %v266_v15 }
  0x1b   : > { %534 = vmatpush.xpose.msk.msra.mxu0 %vm133_vm0, %v715_v13  ;;  %576 = vmatpush.xpose.msk.msra.mxu1 %vm133_vm0, %v715_v13 }
  0x1c   : > { %577 = vmatpush.xpose.msk.msra.mxu2 %vm133_vm0, %v715_v13  ;;  %578 = vmatpush.xpose.msk.msra.mxu3 %vm133_vm0, %v715_v13 }
  0x1d   : > { %273 = vadd.xlane.f32.xlu1 %v272_v22  ;;  %279 = vadd.xlane.f32.xlu2 %v278_v25  ;;  %v402_v25 = vadd.s32 4294967208, %v917_v50 }
  0x1f   : > { %535 = vmatpush.xpose.msk.msra.mxu0 %vm133_vm0, %v728_v16  ;;  %579 = vmatpush.xpose.msk.msra.mxu1 %vm133_vm0, %v728_v16 }
  0x20   : > { %580 = vmatpush.xpose.msk.msra.mxu2 %vm133_vm0, %v728_v16  ;;  %581 = vmatpush.xpose.msk.msra.mxu3 %vm133_vm0, %v728_v16 }
  0x22   : > { %282 = vadd.xlane.f32.xlu0 %v281_v26 }
  0x23   : > { %536 = vmatpush.xpose.msk.msra.mxu0 %vm133_vm0, %v755_v24  ;;  %582 = vmatpush.xpose.msk.msra.mxu1 %vm133_vm0, %v755_v24 }
  0x24   : > { %583 = vmatpush.xpose.msk.msra.mxu2 %vm133_vm0, %v755_v24  ;;  %584 = vmatpush.xpose.msk.msra.mxu3 %vm133_vm0, %v755_v24 }
  0x25   : > { %285 = vadd.xlane.f32.xlu1 %v284_v31  ;;  %288 = vadd.xlane.f32.xlu2 %v287_v34 }
  0x27   : > { %537 = vmatpush.xpose.msk.msra.mxu0 %vm133_vm0, %v771_v28  ;;  %585 = vmatpush.xpose.msk.msra.mxu1 %vm133_vm0, %v771_v28 }
  0x28   : > { %586 = vmatpush.xpose.msk.msra.mxu2 %vm133_vm0, %v771_v28  ;;  %587 = vmatpush.xpose.msk.msra.mxu3 %vm133_vm0, %v771_v28 }
  0x2a   : > { %291 = vadd.xlane.f32.xlu0 %v290_v35 }
  0x2b   : > { %538 = vmatpush.xpose.msk.msra.mxu0 %vm133_vm0, %v776_v30  ;;  %588 = vmatpush.xpose.msk.msra.mxu1 %vm133_vm0, %v776_v30 }
  0x2c   : > { %589 = vmatpush.xpose.msk.msra.mxu2 %vm133_vm0, %v776_v30  ;;  %590 = vmatpush.xpose.msk.msra.mxu3 %vm133_vm0, %v776_v30 }
  0x2d   : > { %294 = vadd.xlane.f32.xlu1 %v293_v38  ;;  %297 = vadd.xlane.f32.xlu2 %v296_v40 }
  0x2f   : > { %539 = vmatpush.xpose.msk.msra.mxu0 %vm133_vm0, %v764_v27  ;;  %591 = vmatpush.xpose.msk.msra.mxu1 %vm133_vm0, %v764_v27 }
  0x30   : > { %592 = vmatpush.xpose.msk.msra.mxu2 %vm133_vm0, %v764_v27  ;;  %593 = vmatpush.xpose.msk.msra.mxu3 %vm133_vm0, %v764_v27 }
  0x32   : > { %300 = vadd.xlane.f32.xlu0 %v299_v41  ;;  %v418_v41 = vadd.s32 4294967176, %v917_v50 }
  0x33   : > { %540 = vmatpush.xpose.msk.msra.mxu0 %vm133_vm0, %v739_v20  ;;  %594 = vmatpush.xpose.msk.msra.mxu1 %vm133_vm0, %v739_v20 }
  0x34   : > { %595 = vmatpush.xpose.msk.msra.mxu2 %vm133_vm0, %v739_v20  ;;  %596 = vmatpush.xpose.msk.msra.mxu3 %vm133_vm0, %v739_v20 }
  0x35   : > { %303 = vadd.xlane.f32.xlu1 %v302_v44  ;;  %306 = vadd.xlane.f32.xlu2 %v305_v46 }
  0x37   : > { %541 = vmatpush.xpose.msk.msra.mxu0 %vm133_vm0, %v734_v18  ;;  %597 = vmatpush.xpose.msk.msra.mxu1 %vm133_vm0, %v734_v18 }
  0x38   : > { %598 = vmatpush.xpose.msk.msra.mxu2 %vm133_vm0, %v734_v18  ;;  %599 = vmatpush.xpose.msk.msra.mxu3 %vm133_vm0, %v734_v18 }
  0x3a   : > { %309 = vadd.xlane.f32.xlu0 %v308_v47 }
  0x3b   : > { %542 = vmatpush.xpose.msk.msra.mxu0 %vm133_vm0, %v696_v8  ;;  %600 = vmatpush.xpose.msk.msra.mxu1 %vm133_vm0, %v696_v8 }
  0x3c   : > { %601 = vmatpush.xpose.msk.msra.mxu2 %vm133_vm0, %v696_v8  ;;  %602 = vmatpush.xpose.msk.msra.mxu3 %vm133_vm0, %v696_v8 }
  0x3f   : > { %543 = vmatpush.xpose.msk.msra.mxu0 %vm133_vm0, %v731_v17  ;;  %603 = vmatpush.xpose.msk.msra.mxu1 %vm133_vm0, %v731_v17 }
  0x40   : > { %604 = vmatpush.xpose.msk.msra.mxu2 %vm133_vm0, %v731_v17  ;;  %605 = vmatpush.xpose.msk.msra.mxu3 %vm133_vm0, %v731_v17 }
  0x43   : > { %544 = vmatpush.xpose.msk.msra.mxu0 %vm133_vm0, %v691_v6  ;;  %606 = vmatpush.xpose.msk.msra.mxu1 %vm133_vm0, %v691_v6 }
  0x44   : > { %607 = vmatpush.xpose.msk.msra.mxu2 %vm133_vm0, %v691_v6  ;;  %608 = vmatpush.xpose.msk.msra.mxu3 %vm133_vm0, %v691_v6 }
  0x47   : > { %545 = vmatpush.xpose.msk.msra.mxu0 %vm133_vm0, %v701_v10  ;;  %609 = vmatpush.xpose.msk.msra.mxu1 %vm133_vm0, %v701_v10 }
  0x48   : > { %610 = vmatpush.xpose.msk.msra.mxu2 %vm133_vm0, %v701_v10  ;;  %611 = vmatpush.xpose.msk.msra.mxu3 %vm133_vm0, %v701_v10 }
  0x4b   : > { %546 = vmatpush.xpose.msk.msra.mxu0 %vm133_vm0, %v674_v2  ;;  %612 = vmatpush.xpose.msk.msra.mxu1 %vm133_vm0, %v674_v2 }
  0x4c   : > { %613 = vmatpush.xpose.msk.msra.mxu2 %vm133_vm0, %v674_v2  ;;  %614 = vmatpush.xpose.msk.msra.mxu3 %vm133_vm0, %v674_v2 }
  0x4e   : > { %547 = vmatmul.msk.f32.vlgmr.msra.gmra.mxu0 %vm133_vm0, %v674_v2  ;;  %551 = vmatmul.msk.f32.vlgmr.msra.gmra.mxu1 %vm133_vm0, %v696_v8  ;;  %v378_v2 = vadd.s32 4294967256, %v917_v50 }
  0x4f   : > { %555 = vmatmul.msk.f32.vlgmr.msra.gmra.mxu2 %vm133_vm0, %v776_v30  ;;  %559 = vmatmul.msk.f32.vlgmr.msra.gmra.mxu3 %vm133_vm0, %v715_v13 }
  0x56   : > { %548 = vmatmul.msk.f32.gmra.mxu0 %vm133_vm0, %v701_v10  ;;  %552 = vmatmul.msk.f32.gmra.mxu1 %vm133_vm0, %v734_v18  ;;  %v386_v10 = vadd.s32 4294967240, %v917_v50  ;;  %v394_v18 = vadd.s32 4294967224, %v917_v50 }
  0x57   : > { %556 = vmatmul.msk.f32.gmra.mxu2 %vm133_vm0, %v771_v28  ;;  %560 = vmatmul.msk.f32.gmra.mxu3 %vm133_vm0, %v687_v4 }
  0x5e   : > { %549 = vmatmul.msk.f32.gmra.mxu0 %vm133_vm0, %v691_v6  ;;  %553 = vmatmul.msk.f32.gmra.mxu1 %vm133_vm0, %v739_v20  ;;  %v382_v6 = vadd.s32 4294967248, %v917_v50 }
  0x5f   : > { %557 = vmatmul.msk.f32.gmra.mxu2 %vm133_vm0, %v755_v24  ;;  %561 = vmatmul.msk.f32.gmra.mxu3 %vm133_vm0, %v671_v1 }
  0x66   : > { %550 = vmatmul.msk.f32.gmra.mxu0 %vm133_vm0, %v731_v17  ;;  %554 = vmatmul.msk.f32.gmra.mxu1 %vm133_vm0, %v764_v27 }
  0x67   : > { %558 = vmatmul.msk.f32.gmra.mxu2 %vm133_vm0, %v728_v16  ;;  %562 = vmatmul.msk.f32.gmra.mxu3 %vm133_vm0, %v660_v0 }
  0x85   : > { %v915_v49 = vpop.xlane.xlu0 %264 }
  0x86   : > { %v361_v56 = vperm.slane %v915_v49, %v917_v50 }
  0x88   : > { %v919_v51 = vpop.xlane.xlu1 %270  ;;  %v921_v52 = vpop.xlane.xlu2 %276 }
  0x89   : > { %v367_v59 = vperm.slane %v919_v51, %v366_v54  ;;  %v375_v3 = vperm.slane %v921_v52, %v374_v62 }
  0x8d   : > { %v925_v55 = vpop.xlane.xlu0 %267 }
  0x8e   : > { %v363_v57 = vperm.slane %v925_v55, %v362_v53 }
  0x90   : > { %v932_v60 = vpop.xlane.xlu1 %273  ;;  %v365_v61 = vsel %vm364_vm1, %v363_v57, %v361_v56  ;;  %v936_v0 = vpop.xlane.xlu2 %279 }
  0x91   : > { %v371_v63 = vperm.slane %v932_v60, %v370_v58  ;;  %v369_v1 = vsel %vm368_vm2, %v367_v59, %v365_v61  ;;  %v379_v7 = vperm.slane %v936_v0, %v378_v2 }
  0x93   : > { %v373_v5 = vsel %vm372_vm3, %v371_v63, %v369_v1 }
  0x94   : > { %v377_v8 = vsel %vm376_vm4, %v375_v3, %v373_v5 }
  0x95   : > { %v940_v4 = vpop.xlane.xlu0 %282  ;;  %v381_v12 = vsel %vm380_vm5, %v379_v7, %v377_v8 }
  0x96   : > { %v383_v11 = vperm.slane %v940_v4, %v382_v6 }
  0x98   : > { %v944_v9 = vpop.xlane.xlu1 %285  ;;  %v948_v13 = vpop.xlane.xlu2 %288  ;;  %v385_v16 = vsel %vm384_vm6, %v383_v11, %v381_v12 }
  0x99   : > { %v387_v15 = vperm.slane %v944_v9, %v386_v10  ;;  %v391_v19 = vperm.slane %v948_v13, %v390_v14 }
  0x9b   : > { %v389_v20 = vsel %vm388_vm7, %v387_v15, %v385_v16 }
  0x9c   : > { %v393_v24 = vsel %vm392_vm8, %v391_v19, %v389_v20 }
  0x9d   : > { %v952_v17 = vpop.xlane.xlu0 %291 }
  0x9e   : > { %v395_v23 = vperm.slane %v952_v17, %v394_v18 }
  0xa0   : > { %v957_v22 = vpop.xlane.xlu1 %294  ;;  %v961_v26 = vpop.xlane.xlu2 %297  ;;  %v397_v28 = vsel %vm396_vm9, %v395_v23, %v393_v24 }
  0xa1   : > { %v399_v27 = vperm.slane %v957_v22, %v398_v21  ;;  %v403_v31 = vperm.slane %v961_v26, %v402_v25 }
  0xa3   : > { %v401_v32 = vsel %vm400_vm10, %v399_v27, %v397_v28 }
  0xa4   : > { %v405_v36 = vsel %vm404_vm11, %v403_v31, %v401_v32 }
  0xa5   : > { %v301_v30 = vpop.xlane.xlu0 %300 }
  0xa6   : > { %v407_v34 = vperm.slane %v301_v30, %v406_v29 }
  0xa8   : > { %v304_v35 = vpop.xlane.xlu1 %303  ;;  %v968_v39 = vpop.xlane.xlu2 %306  ;;  %v409_v40 = vsel %vm408_vm12, %v407_v34, %v405_v36 }
  0xa9   : > { %v411_v38 = vperm.slane %v304_v35, %v410_v33  ;;  %v415_v42 = vperm.slane %v968_v39, %v414_v37 }
  0xab   : > { %v413_v44 = vsel %vm412_vm13, %v411_v38, %v409_v40 }
  0xac   : > { %v417_v46 = vsel %vm416_vm14, %v415_v42, %v413_v44 }
  0xad   : > { %v972_v43 = vpop.xlane.xlu0 %309 }
  0xae   : > { %v419_v45 = vperm.slane %v972_v43, %v418_v41 }
  0xb0   : > { %v975_v56 = vsel %vm420_vm15, %v419_v45, %v417_v46 }
  0xcb   : > { %v199_v47 = vpop.f32.mrf.mxu0  ;;  %v211_v48 = vpop.f32.mrf.mxu1 }
  0xcc   : > { %v311_v53 = vmul.f32 2.0, %v199_v47  ;;  %v315_v54 = vmul.f32 2.0, %v211_v48 }
  0xce   : > { %v327_v57 = vsub.f32 %v915_v49, %v311_v53  ;;  %v331_v50 = vsub.f32 %v921_v52, %v315_v54 }
  0xd0   : > { %v435_v58 = vadd.f32 %v975_v56, %v327_v57  ;;  %v439_v59 = vadd.f32 %v975_v56, %v331_v50 }
  0xd2   : > { %v223_v61 = vpop.f32.mrf.mxu2  ;;  %451 = vst [vmem:[%s984_s14] sm:$0xff] %v435_v58  ;;  %v235_v62 = vpop.f32.mrf.mxu3 }
  0xd3   : > { %v319_v63 = vmul.f32 2.0, %v223_v61  ;;  %455 = vst [vmem:[%s984_s14 + $0x20] sm:$0xff] %v439_v59  ;;  %v323_v49 = vmul.f32 2.0, %v235_v62  ;;  %v202_v52 = vpop.f32.mrf.mxu0  ;;  %v214_v1 = vpop.f32.mrf.mxu1 }
  0xd4   : > { %v312_v2 = vmul.f32 2.0, %v202_v52  ;;  %v316_v3 = vmul.f32 2.0, %v214_v1 }
  0xd5   : > { %v335_v5 = vsub.f32 %v948_v13, %v319_v63  ;;  %v339_v6 = vsub.f32 %v301_v30, %v323_v49 }
  0xd6   : > { %v328_v7 = vsub.f32 %v925_v55, %v312_v2  ;;  %v332_v8 = vsub.f32 %v936_v0, %v316_v3 }
  0xd7   : > { %v443_v10 = vadd.f32 %v975_v56, %v335_v5  ;;  %v447_v11 = vadd.f32 %v975_v56, %v339_v6 }
  0xd8   : > { %v436_v12 = vadd.f32 %v975_v56, %v328_v7  ;;  %v440_v14 = vadd.f32 %v975_v56, %v332_v8 }
  0xd9   : > { %459 = vst [vmem:[%s984_s14 + $0x40] sm:$0xff] %v443_v10 }
  0xda   : > { %463 = vst [vmem:[%s984_s14 + $0x60] sm:$0xff] %v447_v11  ;;  %v226_v15 = vpop.f32.mrf.mxu2  ;;  %v238_v16 = vpop.f32.mrf.mxu3 }
  0xdb   : > { %452 = vst [vmem:[%s984_s14 + $0x8] sm:$0xff] %v436_v12  ;;  %v320_v13 = vmul.f32 2.0, %v226_v15  ;;  %v324_v18 = vmul.f32 2.0, %v238_v16  ;;  %v205_v55 = vpop.f32.mrf.mxu0  ;;  %v217_v19 = vpop.f32.mrf.mxu1 }
  0xdc   : > { %456 = vst [vmem:[%s984_s14 + $0x28] sm:$0xff] %v440_v14  ;;  %v313_v0 = vmul.f32 2.0, %v205_v55  ;;  %v317_v20 = vmul.f32 2.0, %v217_v19 }
  0xdd   : > { %v336_v21 = vsub.f32 %v952_v17, %v320_v13  ;;  %v340_v23 = vsub.f32 %v304_v35, %v324_v18 }
  0xde   : > { %v329_v24 = vsub.f32 %v919_v51, %v313_v0  ;;  %v333_v25 = vsub.f32 %v940_v4, %v317_v20 }
  0xdf   : > { %v444_v27 = vadd.f32 %v975_v56, %v336_v21  ;;  %v448_v28 = vadd.f32 %v975_v56, %v340_v23 }
  0xe0   : > { %v437_v29 = vadd.f32 %v975_v56, %v329_v24  ;;  %v441_v30 = vadd.f32 %v975_v56, %v333_v25 }
  0xe1   : > { %460 = vst [vmem:[%s984_s14 + $0x48] sm:$0xff] %v444_v27 }
  0xe2   : > { %464 = vst [vmem:[%s984_s14 + $0x68] sm:$0xff] %v448_v28  ;;  %v229_v31 = vpop.f32.mrf.mxu2  ;;  %v241_v32 = vpop.f32.mrf.mxu3 }
  0xe3   : > { %453 = vst [vmem:[%s984_s14 + $0x10] sm:$0xff] %v437_v29  ;;  %v321_v17 = vmul.f32 2.0, %v229_v31  ;;  %v325_v33 = vmul.f32 2.0, %v241_v32  ;;  %v208_v51 = vpop.f32.mrf.mxu0  ;;  %v220_v34 = vpop.f32.mrf.mxu1 }
  0xe4   : > { %457 = vst [vmem:[%s984_s14 + $0x30] sm:$0xff] %v441_v30  ;;  %v314_v4 = vmul.f32 2.0, %v208_v51  ;;  %v318_v35 = vmul.f32 2.0, %v220_v34 }
  0xe5   : > { %v337_v36 = vsub.f32 %v957_v22, %v321_v17  ;;  %v341_v37 = vsub.f32 %v968_v39, %v325_v33 }
  0xe6   : > { %v330_v38 = vsub.f32 %v932_v60, %v314_v4  ;;  %v334_v40 = vsub.f32 %v944_v9, %v318_v35 }
  0xe7   : > { %v445_v41 = vadd.f32 %v975_v56, %v337_v36  ;;  %v449_v42 = vadd.f32 %v975_v56, %v341_v37 }
  0xe8   : > { %v438_v44 = vadd.f32 %v975_v56, %v330_v38  ;;  %v442_v45 = vadd.f32 %v975_v56, %v334_v40 }
  0xe9   : > { %461 = vst [vmem:[%s984_s14 + $0x50] sm:$0xff] %v445_v41 }
  0xea   : > { %465 = vst [vmem:[%s984_s14 + $0x70] sm:$0xff] %v449_v42  ;;  %v232_v46 = vpop.f32.mrf.mxu2  ;;  %v244_v22 = vpop.f32.mrf.mxu3 }
  0xeb   : > { %454 = vst [vmem:[%s984_s14 + $0x18] sm:$0xff] %v438_v44  ;;  %v322_v39 = vmul.f32 2.0, %v232_v46  ;;  %v326_v47 = vmul.f32 2.0, %v244_v22 }
  0xec   : > { %458 = vst [vmem:[%s984_s14 + $0x38] sm:$0xff] %v442_v45 }
  0xed   : > { %v338_v60 = vsub.f32 %v961_v26, %v322_v39  ;;  %v342_v9 = vsub.f32 %v972_v43, %v326_v47 }
  0xef   : > { %v446_v48 = vadd.f32 %v975_v56, %v338_v60  ;;  %v450_v53 = vadd.f32 %v975_v56, %v342_v9 }
  0xf1   : > { %462 = vst [vmem:[%s984_s14 + $0x58] sm:$0xff] %v446_v48 }
  0xf2   : > { %466 = vst [vmem:[%s984_s14 + $0x78] sm:$0xff] %v450_v53 }
  0xf3 PF: > { %s11_s6 = sadd.s32 1, %s629_s6  }
  0xf4   : > { %p8_p4 = scmp.ge.s32.totalorder %s11_s6, 4  }
  0xf6   :  { %10 = sbr.rel (!%p8_p4) target bundleno = 1 (0x1), region = 54 }

// kernel: particlenet_forward.8
= control target key start
LH: loop header
LB: loop body
LE: loop exit
PB: predicated region body
PF: predicated region fallthrough
CT: control target
= control target key end

     0   :  { %s544_s6 = smov 0   ;;  %s831_s0 = inlined_call_operand.vmem [shape: f32[2,128,128], index: 0, kind: input, shape index: {}]   ;;  %s832_s1 = inlined_call_operand.vmem [shape: f32[2,128,128], index: 1, kind: output, shape index: {}]  }
   0x1 LB: > { %s457_s7 = sadd.s32 4294967295, %s532_s6   ;;  %p461_p0 = scmp.ge.s32.totalorder %s532_s6, 1  ;;  %s532_s6 = sphi %s544_s6, %s11_s6  }
   0x2   : > { %p87_p1 = scmp.lt.s32.totalorder %s532_s6, 3 }
   0x4   : > { %p88_p2 = pnand %p461_p0, %p87_p1 }
   0x5   : > { %p107_p3 = scmp.lt.s32.totalorder (!%p88_p2), %s457_s7, 1 }
   0x6   : > { %91 = sbr.rel (%p88_p2) target bundleno = 243 (0xf3), region = 24 }
   0xb   : > { %s834_s7 = smov (!%p107_p3, %s457_s7), 1  ;;  %v294_v32 = vlaneseq  ;;  %vm299_vm0 = vcmask 130112   ;;  %vm303_vm1 = vcmask 195712   ;;  %vm307_vm2 = vcmask 261312  }
   0xc   : > { %s468_s8 = sshll.u32 %s834_s7, 7  ;;  %vm311_vm3 = vcmask 326912   ;;  %vm315_vm4 = vcmask 392512   ;;  %vm319_vm5 = vcmask 458112   ;;  %vm323_vm6 = vcmask 523712  }
   0xd   : > { %s560_s11 = scalar_lea.vmem %s831_s0, %s468_s8  ;;  %v715_v34 = vand.u32 127, %v294_v32  ;;  %vm327_vm7 = vcmask 589312   ;;  %vm331_vm8 = vcmask 654912   ;;  %vm335_vm9 = vcmask 720512   ;;  %s782_s14 = scalar_lea.vmem %s832_s1, %s468_s8 }
   0xe   : > { %v563_v0 = vld [vmem:[%s560_s11 + $0x78] sm:$0xff]  ;;  %v570_v1 = vld [vmem:[%s560_s11 + $0x70] sm:$0xff]  ;;  %v573_v2 = vld [vmem:[%s560_s11] sm:$0xff]  ;;  %vm339_vm10 = vcmask 786112   ;;  %vm343_vm11 = vcmask 851712   ;;  %vm347_vm12 = vcmask 917312  }
   0xf   : > { %133 = vmatpush.xpose.msra.mxu0 %v563_v0  ;;  %470 = vmatpush.xpose.msra.mxu1 %v563_v0  ;;  %v198_v3 = vmul.f32 %v573_v2, %v573_v2  ;;  %v582_v4 = vld [vmem:[%s560_s11 + $0x68] sm:$0xff]  ;;  %v585_v5 = vld [vmem:[%s560_s11 + $0x10] sm:$0xff]  ;;  %v590_v7 = vld [vmem:[%s560_s11 + $0x20] sm:$0xff]  ;;  %v212_v30 = vmul.f32 %v570_v1, %v570_v1  ;;  %v213_v31 = vmul.f32 %v563_v0, %v563_v0  ;;  %v297_v37 = vadd.s32 4294967288, %v715_v34 }
  0x10   : > { %471 = vmatpush.xpose.msra.mxu2 %v563_v0  ;;  %472 = vmatpush.xpose.msra.mxu3 %v563_v0  ;;  %v200_v6 = vmul.f32 %v585_v5, %v585_v5  ;;  %v202_v8 = vmul.f32 %v590_v7, %v590_v7  ;;  %v597_v9 = vld [vmem:[%s560_s11 + $0x8] sm:$0xff]  ;;  %v602_v10 = vld [vmem:[%s560_s11 + $0x60] sm:$0xff]  ;;  %v611_v12 = vld [vmem:[%s560_s11 + $0x58] sm:$0xff]  ;;  %v211_v29 = vmul.f32 %v582_v4, %v582_v4  ;;  %v301_v38 = vadd.s32 4294967280, %v715_v34 }
  0x11   : > { %214 = vadd.xlane.f32.xlu0 %v198_v3  ;;  %v199_v11 = vmul.f32 %v597_v9, %v597_v9  ;;  %v614_v13 = vld [vmem:[%s560_s11 + $0x18] sm:$0xff]  ;;  %v617_v14 = vld [vmem:[%s560_s11 + $0x28] sm:$0xff]  ;;  %v628_v17 = vld [vmem:[%s560_s11 + $0x50] sm:$0xff]  ;;  %v209_v27 = vmul.f32 %v611_v12, %v611_v12  ;;  %v210_v28 = vmul.f32 %v602_v10, %v602_v10  ;;  %v305_v42 = vadd.s32 4294967272, %v715_v34 }
  0x12   : > { %218 = vadd.xlane.f32.xlu1 %v200_v6  ;;  %222 = vadd.xlane.f32.xlu2 %v202_v8  ;;  %v201_v15 = vmul.f32 %v614_v13, %v614_v13  ;;  %v203_v16 = vmul.f32 %v617_v14, %v617_v14  ;;  %v631_v18 = vld [vmem:[%s560_s11 + $0x30] sm:$0xff]  ;;  %v640_v20 = vld [vmem:[%s560_s11 + $0x48] sm:$0xff]  ;;  %v643_v21 = vld [vmem:[%s560_s11 + $0x38] sm:$0xff]  ;;  %v208_v26 = vmul.f32 %v628_v17, %v628_v17  ;;  %v309_v46 = vadd.s32 4294967264, %v715_v34 }
  0x13   : > { %134 = vmatpush.xpose.msra.mxu0 %v570_v1  ;;  %473 = vmatpush.xpose.msra.mxu1 %v570_v1  ;;  %v204_v19 = vmul.f32 %v631_v18, %v631_v18  ;;  %v205_v22 = vmul.f32 %v643_v21, %v643_v21  ;;  %v125_v23 = vld [vmem:[%s560_s11 + $0x40] sm:$0xff]  ;;  %v207_v25 = vmul.f32 %v640_v20, %v640_v20  ;;  %v313_v50 = vadd.s32 4294967256, %v715_v34 }
  0x14   : > { %474 = vmatpush.xpose.msra.mxu2 %v570_v1  ;;  %475 = vmatpush.xpose.msra.mxu3 %v570_v1  ;;  %v206_v24 = vmul.f32 %v125_v23, %v125_v23  ;;  %v317_v54 = vadd.s32 4294967248, %v715_v34  ;;  %v321_v58 = vadd.s32 4294967240, %v715_v34  ;;  %v325_v62 = vadd.s32 4294967232, %v715_v34 }
  0x15   : > { %vm351_vm13 = vcmask 982912   ;;  %vm355_vm14 = vcmask 1048512  }
  0x17   : > { %135 = vmatpush.xpose.msra.mxu0 %v582_v4  ;;  %476 = vmatpush.xpose.msra.mxu1 %v582_v4 }
  0x18   : > { %477 = vmatpush.xpose.msra.mxu2 %v582_v4  ;;  %478 = vmatpush.xpose.msra.mxu3 %v582_v4 }
  0x19   : > { %216 = vadd.xlane.f32.xlu0 %v199_v11 }
  0x1a   : > { %220 = vadd.xlane.f32.xlu1 %v201_v15  ;;  %224 = vadd.xlane.f32.xlu2 %v203_v16 }
  0x1b   : > { %136 = vmatpush.xpose.msra.mxu0 %v602_v10  ;;  %479 = vmatpush.xpose.msra.mxu1 %v602_v10 }
  0x1c   : > { %480 = vmatpush.xpose.msra.mxu2 %v602_v10  ;;  %481 = vmatpush.xpose.msra.mxu3 %v602_v10 }
  0x1f   : > { %137 = vmatpush.xpose.msra.mxu0 %v611_v12  ;;  %482 = vmatpush.xpose.msra.mxu1 %v611_v12 }
  0x20   : > { %483 = vmatpush.xpose.msra.mxu2 %v611_v12  ;;  %484 = vmatpush.xpose.msra.mxu3 %v611_v12 }
  0x21   : > { %226 = vadd.xlane.f32.xlu0 %v204_v19 }
  0x22   : > { %228 = vadd.xlane.f32.xlu1 %v205_v22  ;;  %230 = vadd.xlane.f32.xlu2 %v206_v24 }
  0x23   : > { %138 = vmatpush.xpose.msra.mxu0 %v628_v17  ;;  %485 = vmatpush.xpose.msra.mxu1 %v628_v17 }
  0x24   : > { %486 = vmatpush.xpose.msra.mxu2 %v628_v17  ;;  %487 = vmatpush.xpose.msra.mxu3 %v628_v17 }
  0x27   : > { %139 = vmatpush.xpose.msra.mxu0 %v640_v20  ;;  %488 = vmatpush.xpose.msra.mxu1 %v640_v20 }
  0x28   : > { %489 = vmatpush.xpose.msra.mxu2 %v640_v20  ;;  %490 = vmatpush.xpose.msra.mxu3 %v640_v20 }
  0x29   : > { %232 = vadd.xlane.f32.xlu0 %v207_v25  ;;  %v353_v25 = vadd.s32 4294967176, %v715_v34 }
  0x2a   : > { %234 = vadd.xlane.f32.xlu1 %v208_v26  ;;  %236 = vadd.xlane.f32.xlu2 %v209_v27 }
  0x2b   : > { %140 = vmatpush.xpose.msra.mxu0 %v125_v23  ;;  %491 = vmatpush.xpose.msra.mxu1 %v125_v23 }
  0x2c   : > { %492 = vmatpush.xpose.msra.mxu2 %v125_v23  ;;  %493 = vmatpush.xpose.msra.mxu3 %v125_v23 }
  0x2f   : > { %141 = vmatpush.xpose.msra.mxu0 %v643_v21  ;;  %494 = vmatpush.xpose.msra.mxu1 %v643_v21 }
  0x30   : > { %495 = vmatpush.xpose.msra.mxu2 %v643_v21  ;;  %496 = vmatpush.xpose.msra.mxu3 %v643_v21 }
  0x31   : > { %238 = vadd.xlane.f32.xlu0 %v210_v28 }
  0x32   : > { %240 = vadd.xlane.f32.xlu1 %v211_v29  ;;  %242 = vadd.xlane.f32.xlu2 %v212_v30 }
  0x33   : > { %142 = vmatpush.xpose.msra.mxu0 %v631_v18  ;;  %497 = vmatpush.xpose.msra.mxu1 %v631_v18 }
  0x34   : > { %498 = vmatpush.xpose.msra.mxu2 %v631_v18  ;;  %499 = vmatpush.xpose.msra.mxu3 %v631_v18 }
  0x37   : > { %143 = vmatpush.xpose.msra.mxu0 %v617_v14  ;;  %500 = vmatpush.xpose.msra.mxu1 %v617_v14 }
  0x38   : > { %501 = vmatpush.xpose.msra.mxu2 %v617_v14  ;;  %502 = vmatpush.xpose.msra.mxu3 %v617_v14 }
  0x39   : > { %244 = vadd.xlane.f32.xlu0 %v213_v31 }
  0x3b   : > { %144 = vmatpush.xpose.msra.mxu0 %v590_v7  ;;  %503 = vmatpush.xpose.msra.mxu1 %v590_v7 }
  0x3c   : > { %504 = vmatpush.xpose.msra.mxu2 %v590_v7  ;;  %505 = vmatpush.xpose.msra.mxu3 %v590_v7 }
  0x3f   : > { %145 = vmatpush.xpose.msra.mxu0 %v614_v13  ;;  %506 = vmatpush.xpose.msra.mxu1 %v614_v13 }
  0x40   : > { %507 = vmatpush.xpose.msra.mxu2 %v614_v13  ;;  %508 = vmatpush.xpose.msra.mxu3 %v614_v13 }
  0x43   : > { %146 = vmatpush.xpose.msra.mxu0 %v585_v5  ;;  %509 = vmatpush.xpose.msra.mxu1 %v585_v5 }
  0x44   : > { %510 = vmatpush.xpose.msra.mxu2 %v585_v5  ;;  %511 = vmatpush.xpose.msra.mxu3 %v585_v5 }
  0x47   : > { %147 = vmatpush.xpose.msra.mxu0 %v597_v9  ;;  %512 = vmatpush.xpose.msra.mxu1 %v597_v9 }
  0x48   : > { %513 = vmatpush.xpose.msra.mxu2 %v597_v9  ;;  %514 = vmatpush.xpose.msra.mxu3 %v597_v9 }
  0x4b   : > { %148 = vmatpush.xpose.msra.mxu0 %v573_v2  ;;  %515 = vmatpush.xpose.msra.mxu1 %v573_v2 }
  0x4c   : > { %516 = vmatpush.xpose.msra.mxu2 %v573_v2  ;;  %517 = vmatpush.xpose.msra.mxu3 %v573_v2 }
  0x4e   : > { %149 = vmatmul.f32.vlgmr.msra.gmra.mxu0 %v573_v2  ;;  %161 = vmatmul.f32.vlgmr.msra.gmra.mxu1 %v590_v7  ;;  %v329_v2 = vadd.s32 4294967224, %v715_v34 }
  0x4f   : > { %173 = vmatmul.f32.vlgmr.msra.gmra.mxu2 %v125_v23  ;;  %185 = vmatmul.f32.vlgmr.msra.gmra.mxu3 %v602_v10 }
  0x56   : > { %152 = vmatmul.f32.gmra.mxu0 %v597_v9  ;;  %164 = vmatmul.f32.gmra.mxu1 %v617_v14  ;;  %v337_v9 = vadd.s32 4294967208, %v715_v34 }
  0x57   : > { %176 = vmatmul.f32.gmra.mxu2 %v640_v20  ;;  %188 = vmatmul.f32.gmra.mxu3 %v582_v4 }
  0x5e   : > { %155 = vmatmul.f32.gmra.mxu0 %v585_v5  ;;  %167 = vmatmul.f32.gmra.mxu1 %v631_v18  ;;  %v333_v5 = vadd.s32 4294967216, %v715_v34 }
  0x5f   : > { %179 = vmatmul.f32.gmra.mxu2 %v628_v17  ;;  %191 = vmatmul.f32.gmra.mxu3 %v570_v1  ;;  %v345_v17 = vadd.s32 4294967192, %v715_v34 }
  0x66   : > { %158 = vmatmul.f32.gmra.mxu0 %v614_v13  ;;  %170 = vmatmul.f32.gmra.mxu1 %v643_v21  ;;  %v341_v13 = vadd.s32 4294967200, %v715_v34  ;;  %v349_v21 = vadd.s32 4294967184, %v715_v34 }
  0x67   : > { %182 = vmatmul.f32.gmra.mxu2 %v611_v12  ;;  %194 = vmatmul.f32.gmra.mxu3 %v563_v0 }
  0x84   : > { %v713_v33 = vpop.xlane.xlu0 %214 }
  0x85   : > { %v717_v35 = vpop.xlane.xlu1 %218  ;;  %v719_v36 = vpop.xlane.xlu2 %222  ;;  %v296_v40 = vperm.slane %v713_v33, %v715_v34 }
  0x86   : > { %v302_v43 = vperm.slane %v717_v35, %v301_v38  ;;  %v310_v51 = vperm.slane %v719_v36, %v309_v46 }
  0x8c   : > { %v723_v39 = vpop.xlane.xlu0 %216 }
  0x8d   : > { %v298_v41 = vperm.slane %v723_v39, %v297_v37  ;;  %v730_v44 = vpop.xlane.xlu1 %220  ;;  %v734_v48 = vpop.xlane.xlu2 %224 }
  0x8e   : > { %v306_v47 = vperm.slane %v730_v44, %v305_v42  ;;  %v314_v55 = vperm.slane %v734_v48, %v313_v50 }
  0x8f   : > { %v300_v45 = vsel %vm299_vm0, %v298_v41, %v296_v40 }
  0x90   : > { %v304_v49 = vsel %vm303_vm1, %v302_v43, %v300_v45 }
  0x91   : > { %v308_v53 = vsel %vm307_vm2, %v306_v47, %v304_v49 }
  0x92   : > { %v312_v56 = vsel %vm311_vm3, %v310_v51, %v308_v53 }
  0x93   : > { %v316_v60 = vsel %vm315_vm4, %v314_v55, %v312_v56 }
  0x94   : > { %v738_v52 = vpop.xlane.xlu0 %226 }
  0x95   : > { %v742_v57 = vpop.xlane.xlu1 %228  ;;  %v318_v59 = vperm.slane %v738_v52, %v317_v54  ;;  %v746_v61 = vpop.xlane.xlu2 %230 }
  0x96   : > { %v322_v63 = vperm.slane %v742_v57, %v321_v58  ;;  %v326_v3 = vperm.slane %v746_v61, %v325_v62 }
  0x97   : > { %v320_v0 = vsel %vm319_vm5, %v318_v59, %v316_v60 }
  0x98   : > { %v324_v4 = vsel %vm323_vm6, %v322_v63, %v320_v0 }
  0x99   : > { %v328_v8 = vsel %vm327_vm7, %v326_v3, %v324_v4 }
  0x9c   : > { %v750_v1 = vpop.xlane.xlu0 %232 }
  0x9d   : > { %v755_v6 = vpop.xlane.xlu1 %234  ;;  %v330_v7 = vperm.slane %v750_v1, %v329_v2  ;;  %v759_v10 = vpop.xlane.xlu2 %236 }
  0x9e   : > { %v334_v11 = vperm.slane %v755_v6, %v333_v5  ;;  %v338_v15 = vperm.slane %v759_v10, %v337_v9 }
  0x9f   : > { %v332_v12 = vsel %vm331_vm8, %v330_v7, %v328_v8 }
  0xa0   : > { %v336_v16 = vsel %vm335_vm9, %v334_v11, %v332_v12 }
  0xa1   : > { %v340_v20 = vsel %vm339_vm10, %v338_v15, %v336_v16 }
  0xa4   : > { %v239_v14 = vpop.xlane.xlu0 %238 }
  0xa5   : > { %v342_v18 = vperm.slane %v239_v14, %v341_v13  ;;  %v241_v19 = vpop.xlane.xlu1 %240  ;;  %v766_v23 = vpop.xlane.xlu2 %242 }
  0xa6   : > { %v346_v22 = vperm.slane %v241_v19, %v345_v17  ;;  %v350_v26 = vperm.slane %v766_v23, %v349_v21 }
  0xa7   : > { %v344_v24 = vsel %vm343_vm11, %v342_v18, %v340_v20 }
  0xa8   : > { %v348_v28 = vsel %vm347_vm12, %v346_v22, %v344_v24 }
  0xa9   : > { %v352_v30 = vsel %vm351_vm13, %v350_v26, %v348_v28 }
  0xac   : > { %v770_v27 = vpop.xlane.xlu0 %244 }
  0xad   : > { %v354_v29 = vperm.slane %v770_v27, %v353_v25 }
  0xaf   : > { %v773_v40 = vsel %vm355_vm14, %v354_v29, %v352_v30 }
  0xcb   : > { %v150_v31 = vpop.f32.mrf.mxu0  ;;  %v162_v32 = vpop.f32.mrf.mxu1 }
  0xcc   : > { %v246_v37 = vmul.f32 2.0, %v150_v31  ;;  %v250_v38 = vmul.f32 2.0, %v162_v32 }
  0xce   : > { %v262_v41 = vsub.f32 %v713_v33, %v246_v37  ;;  %v266_v34 = vsub.f32 %v719_v36, %v250_v38 }
  0xd0   : > { %v370_v42 = vadd.f32 %v773_v40, %v262_v41  ;;  %v374_v43 = vadd.f32 %v773_v40, %v266_v34 }
  0xd2   : > { %v174_v45 = vpop.f32.mrf.mxu2  ;;  %386 = vst [vmem:[%s782_s14] sm:$0xff] %v370_v42  ;;  %v186_v46 = vpop.f32.mrf.mxu3 }
  0xd3   : > { %v254_v47 = vmul.f32 2.0, %v174_v45  ;;  %390 = vst [vmem:[%s782_s14 + $0x20] sm:$0xff] %v374_v43  ;;  %v258_v33 = vmul.f32 2.0, %v186_v46  ;;  %v153_v36 = vpop.f32.mrf.mxu0  ;;  %v165_v49 = vpop.f32.mrf.mxu1 }
  0xd4   : > { %v247_v50 = vmul.f32 2.0, %v153_v36  ;;  %v251_v51 = vmul.f32 2.0, %v165_v49 }
  0xd5   : > { %v270_v53 = vsub.f32 %v746_v61, %v254_v47  ;;  %v274_v54 = vsub.f32 %v239_v14, %v258_v33 }
  0xd6   : > { %v263_v55 = vsub.f32 %v723_v39, %v247_v50  ;;  %v267_v56 = vsub.f32 %v734_v48, %v251_v51 }
  0xd7   : > { %v378_v58 = vadd.f32 %v773_v40, %v270_v53  ;;  %v382_v59 = vadd.f32 %v773_v40, %v274_v54 }
  0xd8   : > { %v371_v60 = vadd.f32 %v773_v40, %v263_v55  ;;  %v375_v62 = vadd.f32 %v773_v40, %v267_v56 }
  0xd9   : > { %394 = vst [vmem:[%s782_s14 + $0x40] sm:$0xff] %v378_v58 }
  0xda   : > { %398 = vst [vmem:[%s782_s14 + $0x60] sm:$0xff] %v382_v59  ;;  %v177_v63 = vpop.f32.mrf.mxu2  ;;  %v189_v0 = vpop.f32.mrf.mxu3 }
  0xdb   : > { %387 = vst [vmem:[%s782_s14 + $0x8] sm:$0xff] %v371_v60  ;;  %v255_v61 = vmul.f32 2.0, %v177_v63  ;;  %v259_v2 = vmul.f32 2.0, %v189_v0  ;;  %v156_v39 = vpop.f32.mrf.mxu0  ;;  %v168_v3 = vpop.f32.mrf.mxu1 }
  0xdc   : > { %391 = vst [vmem:[%s782_s14 + $0x28] sm:$0xff] %v375_v62  ;;  %v248_v48 = vmul.f32 2.0, %v156_v39  ;;  %v252_v4 = vmul.f32 2.0, %v168_v3 }
  0xdd   : > { %v271_v5 = vsub.f32 %v750_v1, %v255_v61  ;;  %v275_v7 = vsub.f32 %v241_v19, %v259_v2 }
  0xde   : > { %v264_v8 = vsub.f32 %v717_v35, %v248_v48  ;;  %v268_v9 = vsub.f32 %v738_v52, %v252_v4 }
  0xdf   : > { %v379_v11 = vadd.f32 %v773_v40, %v271_v5  ;;  %v383_v12 = vadd.f32 %v773_v40, %v275_v7 }
  0xe0   : > { %v372_v13 = vadd.f32 %v773_v40, %v264_v8  ;;  %v376_v14 = vadd.f32 %v773_v40, %v268_v9 }
  0xe1   : > { %395 = vst [vmem:[%s782_s14 + $0x48] sm:$0xff] %v379_v11 }
  0xe2   : > { %399 = vst [vmem:[%s782_s14 + $0x68] sm:$0xff] %v383_v12  ;;  %v180_v15 = vpop.f32.mrf.mxu2  ;;  %v192_v16 = vpop.f32.mrf.mxu3 }
  0xe3   : > { %388 = vst [vmem:[%s782_s14 + $0x10] sm:$0xff] %v372_v13  ;;  %v256_v1 = vmul.f32 2.0, %v180_v15  ;;  %v260_v17 = vmul.f32 2.0, %v192_v16  ;;  %v159_v35 = vpop.f32.mrf.mxu0  ;;  %v171_v18 = vpop.f32.mrf.mxu1 }
  0xe4   : > { %392 = vst [vmem:[%s782_s14 + $0x30] sm:$0xff] %v376_v14  ;;  %v249_v52 = vmul.f32 2.0, %v159_v35  ;;  %v253_v19 = vmul.f32 2.0, %v171_v18 }
  0xe5   : > { %v272_v20 = vsub.f32 %v755_v6, %v256_v1  ;;  %v276_v21 = vsub.f32 %v766_v23, %v260_v17 }
  0xe6   : > { %v265_v22 = vsub.f32 %v730_v44, %v249_v52  ;;  %v269_v24 = vsub.f32 %v742_v57, %v253_v19 }
  0xe7   : > { %v380_v25 = vadd.f32 %v773_v40, %v272_v20  ;;  %v384_v26 = vadd.f32 %v773_v40, %v276_v21 }
  0xe8   : > { %v373_v28 = vadd.f32 %v773_v40, %v265_v22  ;;  %v377_v29 = vadd.f32 %v773_v40, %v269_v24 }
  0xe9   : > { %396 = vst [vmem:[%s782_s14 + $0x50] sm:$0xff] %v380_v25 }
  0xea   : > { %400 = vst [vmem:[%s782_s14 + $0x70] sm:$0xff] %v384_v26  ;;  %v183_v30 = vpop.f32.mrf.mxu2  ;;  %v195_v6 = vpop.f32.mrf.mxu3 }
  0xeb   : > { %389 = vst [vmem:[%s782_s14 + $0x18] sm:$0xff] %v373_v28  ;;  %v257_v23 = vmul.f32 2.0, %v183_v30  ;;  %v261_v31 = vmul.f32 2.0, %v195_v6 }
  0xec   : > { %393 = vst [vmem:[%s782_s14 + $0x38] sm:$0xff] %v377_v29 }
  0xed   : > { %v273_v44 = vsub.f32 %v759_v10, %v257_v23  ;;  %v277_v57 = vsub.f32 %v770_v27, %v261_v31 }
  0xef   : > { %v381_v32 = vadd.f32 %v773_v40, %v273_v44  ;;  %v385_v37 = vadd.f32 %v773_v40, %v277_v57 }
  0xf1   : > { %397 = vst [vmem:[%s782_s14 + $0x58] sm:$0xff] %v381_v32 }
  0xf2   : > { %401 = vst [vmem:[%s782_s14 + $0x78] sm:$0xff] %v385_v37 }
  0xf3 PF: > { %s11_s6 = sadd.s32 1, %s532_s6  }
  0xf4   : > { %p8_p4 = scmp.ge.s32.totalorder %s11_s6, 4  }
  0xf6   :  { %10 = sbr.rel (!%p8_p4) target bundleno = 1 (0x1), region = 54 }

// kernel: particlenet_forward.10
= control target key start
LH: loop header
LB: loop body
LE: loop exit
PB: predicated region body
PF: predicated region fallthrough
CT: control target
= control target key end

     0   :  { %s912_s18 = smov 0   ;;  %s1059_s0 = inlined_call_operand.vmem [shape: bf16[256,128], index: 0, kind: input, shape index: {}]   ;;  %s1060_s1 = inlined_call_operand.vmem [shape: bf16[128,128], index: 1, kind: input, shape index: {}]   ;;  %s1061_s2 = inlined_call_operand.vmem [shape: f32[1,128], index: 2, kind: input, shape index: {}]   ;;  %s1062_s3 = inlined_call_operand.vmem [shape: f32[1,128], index: 3, kind: input, shape index: {}]   ;;  %s1063_s4 = inlined_call_operand.vmem [shape: f32[256,1], index: 4, kind: input, shape index: {}]   ;;  %s1064_s5 = inlined_call_operand.vmem [shape: bf16[256,128], index: 5, kind: output, shape index: {}]  }
   0x1 LB: > { %s695_s19 = sadd.s32 4294967295, %s879_s18   ;;  %p699_p0 = scmp.ge.s32.totalorder %s879_s18, 1  ;;  %s879_s18 = sphi %s912_s18, %s15_s18  }
   0x2   : > { %p199_p1 = scmp.lt.s32.totalorder %s879_s18, 3 }
   0x4   : > { %p200_p2 = pnand %p699_p0, %p199_p1 }
   0x5   : > { %s700_s22 = sshll.u32 (!%p200_p2), %s695_s19, 4 }
   0x6   : > { %203 = sbr.rel (%p200_p2) target bundleno = 213 (0xd5), region = 40  ;;  %p233_p3 = scmp.lt.s32.totalorder (!%p200_p2), %s700_s22, 31 }
   0xb   : > { %v787_v0 = vld [vmem:[%s1060_s1 + $0x38] sm:$0xff]  ;;  %v881_v1 = vmov 0   ;;  %v786_v2 = vld [vmem:[%s1060_s1 + $0x30] sm:$0xff]  ;;  %s1066_s22 = smov (!%p233_p3, %s700_s22), 31  ;;  %v785_v3 = vld [vmem:[%s1060_s1 + $0x28] sm:$0xff] }
   0xc   : > { %868 = vset.pattern.permute.xlu0 %v881_v1  ;;  %869 = vset.pattern.permute.xlu1 %v881_v1  ;;  %s703_s25 = sshll.u32 %s1066_s22, 3  ;;  %v784_v6 = vld [vmem:[%s1060_s1 + $0x20] sm:$0xff]  ;;  %v783_v10 = vld [vmem:[%s1060_s1 + $0x18] sm:$0xff]  ;;  %v782_v12 = vld [vmem:[%s1060_s1 + $0x10] sm:$0xff]  ;;  %s701_s14 = sshll.u32 %s1066_s22, 2 }
   0xd   : > { %378 = vmatpush.bf16.msra.mxu0 %v787_v0  ;;  %835 = vmatpush.bf16.msra.mxu1 %v787_v0  ;;  %s932_s28 = scalar_lea.vmem %s1063_s4, %s703_s25  ;;  %v781_v15 = vld [vmem:[%s1060_s1 + $0x8] sm:$0xff]  ;;  %v780_v17 = vld [vmem:[%s1060_s1] sm:$0xff]  ;;  %s967_s20 = scalar_lea.vmem %s1059_s0, %s701_s14 }
   0xe   : > { %836 = vmatpush.bf16.msra.mxu2 %v787_v0  ;;  %837 = vmatpush.bf16.msra.mxu3 %v787_v0  ;;  %v483_v4 = vld [vmem:[%s932_s28] sm:$0xff]  ;;  %v485_v5 = vld [vmem:[%s932_s28 + $0x10] sm:$0xff]  ;;  %v484_v8 = vld [vmem:[%s932_s28 + $0x8] sm:$0xff] }
   0xf   : > { %870 = vset.pattern.permute.xlu2 %v881_v1  ;;  %501 = vperm.xlu0 %868, %v483_v4   ;;  %v487_v7 = vld [vmem:[%s932_s28 + $0x20] sm:$0xff]  ;;  %v486_v9 = vld [vmem:[%s932_s28 + $0x18] sm:$0xff]  ;;  %v488_v11 = vld [vmem:[%s932_s28 + $0x28] sm:$0xff] }
  0x10   : > { %511 = vperm.xlu1 %869, %v485_v5   ;;  %521 = vperm.xlu2 %870, %v487_v7   ;;  %v489_v13 = vld [vmem:[%s932_s28 + $0x30] sm:$0xff]  ;;  %v490_v14 = vld [vmem:[%s932_s28 + $0x38] sm:$0xff]  ;;  %v491_v16 = vld [vmem:[%s932_s28 + $0x40] sm:$0xff] }
  0x11   : > { %379 = vmatpush.bf16.msra.mxu0 %v786_v2  ;;  %838 = vmatpush.bf16.msra.mxu1 %v786_v2  ;;  %v492_v18 = vld [vmem:[%s932_s28 + $0x48] sm:$0xff]  ;;  %v772_v19 = vld [vmem:[%s967_s20] sm:$0xff]  ;;  %v774_v20 = vld [vmem:[%s967_s20 + $0x10] sm:$0xff] }
  0x12   : > { %839 = vmatpush.bf16.msra.mxu2 %v786_v2  ;;  %840 = vmatpush.bf16.msra.mxu3 %v786_v2  ;;  %v493_v21 = vld [vmem:[%s932_s28 + $0x50] sm:$0xff]  ;;  %v776_v22 = vld [vmem:[%s967_s20 + $0x20] sm:$0xff]  ;;  %v494_v24 = vld [vmem:[%s932_s28 + $0x58] sm:$0xff] }
  0x13   : > { %v778_v23 = vld [vmem:[%s967_s20 + $0x30] sm:$0xff]  ;;  %v495_v25 = vld [vmem:[%s932_s28 + $0x60] sm:$0xff]  ;;  %v496_v26 = vld [vmem:[%s932_s28 + $0x68] sm:$0xff] }
  0x14   : > { %v497_v27 = vld [vmem:[%s932_s28 + $0x70] sm:$0xff]  ;;  %v498_v28 = vld [vmem:[%s932_s28 + $0x78] sm:$0xff]  ;;  %v773_v29 = vld [vmem:[%s967_s20 + $0x8] sm:$0xff]  ;;  %s1021_s28 = scalar_lea.vmem %s1064_s5, %s701_s14 }
  0x15   : > { %380 = vmatpush.bf16.msra.mxu0 %v785_v3  ;;  %841 = vmatpush.bf16.msra.mxu1 %v785_v3  ;;  %v775_v30 = vld [vmem:[%s967_s20 + $0x18] sm:$0xff]  ;;  %v777_v31 = vld [vmem:[%s967_s20 + $0x28] sm:$0xff]  ;;  %v991_v38 = vld [vmem:[%s1061_s2] ss:$0 sm:$0xff] }
  0x16   : > { %842 = vmatpush.bf16.msra.mxu2 %v785_v3  ;;  %843 = vmatpush.bf16.msra.mxu3 %v785_v3  ;;  %v779_v32 = vld [vmem:[%s967_s20 + $0x38] sm:$0xff]  ;;  %v1001_v44 = vld [vmem:[%s1062_s3] ss:$0 sm:$0xff] }
  0x17   : > { %506 = vperm.xlu0 %868, %v484_v8  }
  0x18   : > { %516 = vperm.xlu1 %869, %v486_v9   ;;  %526 = vperm.xlu2 %870, %v488_v11  }
  0x19   : > { %381 = vmatpush.bf16.msra.mxu0 %v784_v6  ;;  %844 = vmatpush.bf16.msra.mxu1 %v784_v6 }
  0x1a   : > { %845 = vmatpush.bf16.msra.mxu2 %v784_v6  ;;  %846 = vmatpush.bf16.msra.mxu3 %v784_v6 }
  0x1d   : > { %382 = vmatpush.bf16.msra.mxu0 %v783_v10  ;;  %847 = vmatpush.bf16.msra.mxu1 %v783_v10 }
  0x1e   : > { %848 = vmatpush.bf16.msra.mxu2 %v783_v10  ;;  %849 = vmatpush.bf16.msra.mxu3 %v783_v10 }
  0x1f   : > { %531 = vperm.xlu0 %868, %v489_v13  }
  0x20   : > { %536 = vperm.xlu1 %869, %v490_v14   ;;  %541 = vperm.xlu2 %870, %v491_v16  }
  0x21   : > { %383 = vmatpush.bf16.msra.mxu0 %v782_v12  ;;  %850 = vmatpush.bf16.msra.mxu1 %v782_v12 }
  0x22   : > { %851 = vmatpush.bf16.msra.mxu2 %v782_v12  ;;  %852 = vmatpush.bf16.msra.mxu3 %v782_v12 }
  0x25   : > { %384 = vmatpush.bf16.msra.mxu0 %v781_v15  ;;  %853 = vmatpush.bf16.msra.mxu1 %v781_v15 }
  0x26   : > { %854 = vmatpush.bf16.msra.mxu2 %v781_v15  ;;  %855 = vmatpush.bf16.msra.mxu3 %v781_v15 }
  0x27   : > { %546 = vperm.xlu0 %868, %v492_v18  }
  0x28   : > { %551 = vperm.xlu1 %869, %v493_v21   ;;  %556 = vperm.xlu2 %870, %v494_v24  }
  0x29   : > { %385 = vmatpush.bf16.msra.mxu0 %v780_v17  ;;  %856 = vmatpush.bf16.msra.mxu1 %v780_v17 }
  0x2a   : > { %857 = vmatpush.bf16.msra.mxu2 %v780_v17  ;;  %858 = vmatpush.bf16.msra.mxu3 %v780_v17 }
  0x2c   : > { %386 = vmatmul.bf16.vlgmr.msra.gmra.mxu0 %v772_v19  ;;  %396 = vmatmul.bf16.vlgmr.msra.gmra.mxu1 %v774_v20 }
  0x2d   : > { %406 = vmatmul.bf16.vlgmr.msra.gmra.mxu2 %v776_v22  ;;  %416 = vmatmul.bf16.vlgmr.msra.gmra.mxu3 %v778_v23 }
  0x2f   : > { %561 = vperm.xlu0 %868, %v495_v25  }
  0x30   : > { %566 = vperm.xlu1 %869, %v496_v26   ;;  %571 = vperm.xlu2 %870, %v497_v27  }
  0x37   : > { %576 = vperm.xlu0 %868, %v498_v28  }
  0x3c   : > { %391 = vmatmul.bf16.gmra.mxu0 %v773_v29  ;;  %401 = vmatmul.bf16.gmra.mxu1 %v775_v30 }
  0x3d   : > { %411 = vmatmul.bf16.gmra.mxu2 %v777_v31  ;;  %421 = vmatmul.bf16.gmra.mxu3 %v779_v32 }
  0x6a   : > { %v522_v37 = vpop.permute.xlu2 %521 }
  0x72   : > { %v527_v46 = vpop.permute.xlu2 %526 }
  0x7a   : > { %v542_v13 = vpop.permute.xlu2 %541 }
  0x81   : > { %v502_v33 = vpop.permute.xlu0 %501 }
  0x82   : > { %v984_v34 = vpop.permute.xlu1 %511 }
  0x89   : > { %v507_v35 = vpop.permute.xlu0 %506 }
  0x8a   : > { %v986_v36 = vpop.permute.xlu1 %516 }
  0x91   : > { %v993_v41 = vpop.permute.xlu0 %531 }
  0x92   : > { %v995_v42 = vpop.permute.xlu1 %536 }
  0x99   : > { %v547_v57 = vpop.permute.xlu0 %546 }
  0x9a   : > { %v1010_v58 = vpop.permute.xlu1 %551 }
  0xa1   : > { %v562_v24 = vpop.permute.xlu0 %561 }
  0xa2   : > { %v567_v25 = vpop.permute.xlu1 %566 }
  0xa9   : > { %v387_v39 = vpop.f32.mrf.mxu0  ;;  %v397_v40 = vpop.f32.mrf.mxu1 }
  0xaa   : > { %v431_v43 = vmul.f32 %v991_v38, %v387_v39  ;;  %v435_v45 = vmul.f32 %v991_v38, %v397_v40 }
  0xac   : > { %v451_v47 = vadd.f32 %v1001_v44, %v431_v43  ;;  %v455_v48 = vadd.f32 %v1001_v44, %v435_v45 }
  0xae   : > { %v467_v59 = vmax.f32 %v451_v47, 0.0  ;;  %v471_v60 = vmax.f32 %v455_v48, 0.0  ;;  %v557_v48 = vpop.permute.xlu2 %556 }
  0xb0   : > { %v407_v49 = vpop.f32.mrf.mxu2  ;;  %v417_v50 = vpop.f32.mrf.mxu3  ;;  %v579_v3 = vmul.f32 %v502_v33, %v467_v59  ;;  %v583_v4 = vmul.f32 %v522_v37, %v471_v60 }
  0xb1   : > { %v389_v51 = vpop.f32.mrf.mxu0  ;;  %v399_v52 = vpop.f32.mrf.mxu1  ;;  %v439_v55 = vmul.f32 %v991_v38, %v407_v49  ;;  %v443_v56 = vmul.f32 %v991_v38, %v417_v50 }
  0xb2   : > { %v432_v53 = vmul.f32 %v991_v38, %v389_v51  ;;  %v436_v54 = vmul.f32 %v991_v38, %v399_v52 }
  0xb3   : > { %v459_v1 = vadd.f32 %v1001_v44, %v439_v55  ;;  %v463_v2 = vadd.f32 %v1001_v44, %v443_v56 }
  0xb4   : > { %v452_v61 = vadd.f32 %v1001_v44, %v432_v53  ;;  %v456_v62 = vadd.f32 %v1001_v44, %v436_v54 }
  0xb5   : > { %v475_v16 = vmax.f32 %v459_v1, 0.0  ;;  %v479_v17 = vmax.f32 %v463_v2, 0.0 }
  0xb6   : > { %v468_v63 = vmax.f32 %v452_v61, 0.0  ;;  %v472_v0 = vmax.f32 %v456_v62, 0.0 }
  0xb7   : > { %v587_v26 = vmul.f32 %v542_v13, %v475_v16  ;;  %v591_v27 = vmul.f32 %v562_v24, %v479_v17 }
  0xb8   : > { %v580_v5 = vmul.f32 %v507_v35, %v468_v63  ;;  %v584_v6 = vmul.f32 %v527_v46, %v472_v0  ;;  %v409_v7 = vpop.f32.mrf.mxu2  ;;  %v419_v8 = vpop.f32.mrf.mxu3 }
  0xb9   : > { %v440_v9 = vmul.f32 %v991_v38, %v409_v7  ;;  %v444_v10 = vmul.f32 %v991_v38, %v419_v8  ;;  %v392_v11 = vpop.f32.mrf.mxu0  ;;  %v402_v12 = vpop.f32.mrf.mxu1 }
  0xba   : > { %v791_v14 = vpack.c.bf16 %v580_v5, %v579_v3  ;;  %v801_v15 = vpack.c.bf16 %v584_v6, %v583_v4  ;;  %v433_v20 = vmul.f32 %v991_v38, %v392_v11  ;;  %v437_v21 = vmul.f32 %v991_v38, %v402_v12  ;;  %v577_v6 = vpop.permute.xlu0 %576  ;;  %v572_v7 = vpop.permute.xlu2 %571 }
  0xbb   : > { %v460_v18 = vadd.f32 %v1001_v44, %v440_v9  ;;  %v464_v19 = vadd.f32 %v1001_v44, %v444_v10 }
  0xbc   : > { %792 = vst [vmem:[%s1021_s28] sm:$0xff] %v791_v14   ;;  %v453_v30 = vadd.f32 %v1001_v44, %v433_v20  ;;  %v457_v31 = vadd.f32 %v1001_v44, %v437_v21 }
  0xbd   : > { %829 = vst [vmem:[%s1021_s28 + $0x10] sm:$0xff] %v801_v15   ;;  %v476_v22 = vmax.f32 %v460_v18, 0.0  ;;  %v480_v23 = vmax.f32 %v464_v19, 0.0 }
  0xbe   : > { %v469_v49 = vmax.f32 %v453_v30, 0.0  ;;  %v473_v50 = vmax.f32 %v457_v31, 0.0 }
  0xbf   : > { %v588_v28 = vmul.f32 %v547_v57, %v476_v22  ;;  %v592_v29 = vmul.f32 %v567_v25, %v480_v23 }
  0xc0   : > { %v412_v32 = vpop.f32.mrf.mxu2  ;;  %v422_v33 = vpop.f32.mrf.mxu3  ;;  %v581_v57 = vmul.f32 %v984_v34, %v469_v49  ;;  %v585_v59 = vmul.f32 %v993_v41, %v473_v50 }
  0xc1   : > { %v811_v35 = vpack.c.bf16 %v588_v28, %v587_v26  ;;  %v821_v37 = vpack.c.bf16 %v592_v29, %v591_v27  ;;  %v394_v39 = vpop.f32.mrf.mxu0  ;;  %v404_v40 = vpop.f32.mrf.mxu1  ;;  %v441_v46 = vmul.f32 %v991_v38, %v412_v32  ;;  %v445_v47 = vmul.f32 %v991_v38, %v422_v33 }
  0xc2   : > { %v434_v43 = vmul.f32 %v991_v38, %v394_v39  ;;  %v438_v45 = vmul.f32 %v991_v38, %v404_v40 }
  0xc3   : > { %831 = vst [vmem:[%s1021_s28 + $0x20] sm:$0xff] %v811_v35   ;;  %v461_v55 = vadd.f32 %v1001_v44, %v441_v46  ;;  %v465_v56 = vadd.f32 %v1001_v44, %v445_v47 }
  0xc4   : > { %833 = vst [vmem:[%s1021_s28 + $0x30] sm:$0xff] %v821_v37   ;;  %v454_v51 = vadd.f32 %v1001_v44, %v434_v43  ;;  %v458_v52 = vadd.f32 %v1001_v44, %v438_v45 }
  0xc5   : > { %v477_v4 = vmax.f32 %v461_v55, 0.0  ;;  %v481_v5 = vmax.f32 %v465_v56, 0.0 }
  0xc6   : > { %v470_v53 = vmax.f32 %v454_v51, 0.0  ;;  %v474_v54 = vmax.f32 %v458_v52, 0.0 }
  0xc7   : > { %v589_v8 = vmul.f32 %v1010_v58, %v477_v4  ;;  %v593_v9 = vmul.f32 %v572_v7, %v481_v5 }
  0xc8   : > { %v582_v60 = vmul.f32 %v986_v36, %v470_v53  ;;  %v586_v61 = vmul.f32 %v995_v42, %v474_v54  ;;  %v414_v62 = vpop.f32.mrf.mxu2  ;;  %v424_v63 = vpop.f32.mrf.mxu3 }
  0xc9   : > { %v442_v0 = vmul.f32 %v991_v38, %v414_v62  ;;  %v446_v1 = vmul.f32 %v991_v38, %v424_v63 }
  0xca   : > { %v796_v2 = vpack.c.bf16 %v582_v60, %v581_v57  ;;  %v806_v3 = vpack.c.bf16 %v586_v61, %v585_v59 }
  0xcb   : > { %v462_v34 = vadd.f32 %v1001_v44, %v442_v0  ;;  %v466_v41 = vadd.f32 %v1001_v44, %v446_v1 }
  0xcc   : > { %828 = vst [vmem:[%s1021_s28 + $0x8] sm:$0xff] %v796_v2  }
  0xcd   : > { %830 = vst [vmem:[%s1021_s28 + $0x18] sm:$0xff] %v806_v3   ;;  %v478_v36 = vmax.f32 %v462_v34, 0.0  ;;  %v482_v42 = vmax.f32 %v466_v41, 0.0 }
  0xcf   : > { %v590_v38 = vmul.f32 %v557_v48, %v478_v36  ;;  %v594_v10 = vmul.f32 %v577_v6, %v482_v42 }
  0xd1   : > { %v816_v11 = vpack.c.bf16 %v590_v38, %v589_v8  ;;  %v826_v12 = vpack.c.bf16 %v594_v10, %v593_v9 }
  0xd3   : > { %832 = vst [vmem:[%s1021_s28 + $0x28] sm:$0xff] %v816_v11  }
  0xd4   : > { %834 = vst [vmem:[%s1021_s28 + $0x38] sm:$0xff] %v826_v12  }
  0xd5 PF: > { %s15_s18 = sadd.s32 1, %s879_s18  }
  0xd6   : > { %p12_p4 = scmp.ge.s32.totalorder %s15_s18, 4  }
  0xd8   :  { %14 = sbr.rel (!%p12_p4) target bundleno = 1 (0x1), region = 73 }

// kernel: particlenet_forward.11
= control target key start
LH: loop header
LB: loop body
LE: loop exit
PB: predicated region body
PF: predicated region fallthrough
CT: control target
= control target key end

     0   :  { %vm126_vm0 = vcmask 261120   ;;  %vm143_vm1 = vcmask 39936   ;;  %s274_s1 = inlined_call_operand.vmem [shape: bf16[128,32], index: 1, kind: input, shape index: {}]   ;;  %s275_s2 = inlined_call_operand.vmem [shape: f32[1,32], index: 2, kind: input, shape index: {}]   ;;  %s276_s0 = inlined_call_operand.vmem [shape: f32[8,128], index: 0, kind: input, shape index: {}]   ;;  %s277_s4 = inlined_call_operand.vmem [shape: f32[1,5], index: 4, kind: input, shape index: {}]   ;;  %s278_s3 = inlined_call_operand.vmem [shape: bf16[32,5], index: 3, kind: input, shape index: {}]   ;;  %s279_s5 = inlined_call_operand.vmem [shape: f32[8,5], index: 5, kind: output, shape index: {}]  }
   0x1   :  { %v197_v0 = vld [vmem:[%s274_s1 + $0x38] sm:$0xff]  ;;  %v196_v1 = vld [vmem:[%s274_s1 + $0x30] sm:$0xff]  ;;  %v195_v2 = vld [vmem:[%s274_s1 + $0x28] sm:$0xff] }
   0x2   :  { %91 = vmatpush.bf16.msra.mxu0 %v197_v0  ;;  %v194_v3 = vld [vmem:[%s274_s1 + $0x20] sm:$0xff]  ;;  %v193_v4 = vld [vmem:[%s274_s1 + $0x18] sm:$0xff]  ;;  %v192_v5 = vld [vmem:[%s274_s1 + $0x10] sm:$0xff] }
   0x3   :  { %v191_v6 = vld [vmem:[%s274_s1 + $0x8] sm:$0xff]  ;;  %v190_v7 = vld [vmem:[%s274_s1] sm:$0xff] }
   0x4   :  { %v21_v8 = vld [vmem:[%s276_s0] sm:$0xff]  ;;  %v199_v10 = vld [vmem:[%s278_s3 + $0x8] sm:$0xff] }
   0x5   :  { %v22_v9 = vpack.c.bf16 %v21_v8, %v21_v8  ;;  %136 = vmatpush.bf16.msra.mxu1 %v199_v10  ;;  %v198_v11 = vld [vmem:[%s278_s3] sm:$0xff] }
   0x6   :  { %92 = vmatpush.bf16.msra.mxu0 %v196_v1  ;;  %v200_v12 = vld [vmem:[%s275_s2] ss:$0 sm:$0xff] }
   0x7   :  { %v201_v18 = vld [vmem:[%s277_s4] ss:$0 sm:$0xff] }
   0x9   :  { %137 = vmatpush.bf16.msra.mxu1 %v198_v11 }
   0xa   :  { %93 = vmatpush.bf16.msra.mxu0 %v195_v2 }
   0xe   :  { %94 = vmatpush.bf16.msra.mxu0 %v194_v3 }
  0x12   :  { %95 = vmatpush.bf16.msra.mxu0 %v193_v4 }
  0x16   :  { %96 = vmatpush.bf16.msra.mxu0 %v192_v5 }
  0x1a   :  { %97 = vmatpush.bf16.msra.mxu0 %v191_v6 }
  0x1e   :  { %98 = vmatpush.bf16.msra.mxu0 %v190_v7 }
  0x21   :  { %99 = vmatmul.bf16.vlgmr.msra.gmra.mxu0 %v22_v9 }
  0x9e   :  { %v100_v13 = vpop.f32.mrf.mxu0 }
  0x9f   :  { %v101_v14 = vadd.f32 %v200_v12, %v100_v13 }
  0xa1   :  { %v104_v15 = vmax.f32 %v101_v14, 0.0 }
  0xa3   :  { %v105_v16 = vpack.c.bf16 %v104_v15, %v104_v15 }
  0xa5   :  { %189 = vmatmul.msk.bf16.vlgmr.msra.gmra.mxu1 %vm126_vm0, %v105_v16 }
  0xa6   :  { %v102_v17 = vpop.f32.mrf.mxu0 }
 0x122   :  { %v139_v19 = vpop.f32.mrf.mxu1 }
 0x123   :  { %v140_v20 = vadd.f32 %v201_v18, %v139_v19 }
 0x125   :  { %144 = vst.msk [vmem:[%s279_s5] sm:$0xff] %vm143_vm1, %v140_v20 }
 0x12a   :  { %v141_v21 = vpop.f32.mrf.mxu1 }

</bundles_post_ra>
